<compile_context>
chip_gen: v5e
topology: v5e:2x2
jax: 0.10.0
libtpu: 0.0.40
codegen_flags: <defaults>
</compile_context>

<pallas_src>
import math

import jax
import jax.numpy as jnp
from jax.experimental import pallas as pl
from jax.experimental.pallas import tpu as pltpu

# --------------------------- configuration ---------------------------------
D_MODEL = 32
NHEAD = 4
HEAD_DIM = D_MODEL // NHEAD
DIM_FF = 64
NUM_LAYERS = 2
T = 8     # number of target queries
S = 16    # memory sequence length
B = 2     # batch
EPS = 1e-5

# w_slab lane layout (per layer, 512 lanes, every block 128-group friendly):
#   [  0:128] sa_vo   (Wv_h @ Wo_h per head, D-wide blocks)
#   [128:256] ca_vo
#   [256:288] sa_wq (scaled)   [288:320] sa_wk
#   [320:352] ca_wq (scaled)   [352:384] ca_wk
#   [384:448] w1               [448:512] w2^T  (out x in)
# b_slab rows (per layer, 4 x 128):
#   row0: [sa_bq(s) | sa_bk | ca_bq(s) | ca_bk]
#   row1: [b1(64)   | sa_vo_b | ca_vo_b]
#   row2: [b2       | ln1_w   | ln2_w   | ln3_w]
#   row3: [ln1_b    | ln2_b   | ln3_b   | 0]
# b_slab slot NUM_LAYERS, row0: [final_norm_w | final_norm_b | 0 | 0]


# --------------------------- in-kernel math ---------------------------------
def _layer_norm(x, w, b):
    # single-pass stats: var = E[x^2] - mu^2
    mu = jnp.mean(x, axis=-1, keepdims=True)
    ms = jnp.mean(x * x, axis=-1, keepdims=True)
    var = ms - mu * mu
    return (x - mu) * jax.lax.rsqrt(var + EPS) * w + b


def _attn(q, k, vo, tq, tk):
    """Multi-head attention core with the V/output projection already folded into `vo`.

    q: (B*tq, D) (already scaled), k: (B*tk, D), vo: (B*tk, NHEAD*D) where
    vo[:, h*D:(h+1)*D] = v_in @ (Wv_h @ Wo_h). Returns (B*tq, D)."""
    outs = []
    for b in range(B):                      # per-batch score/PV (heads have tiny K)
        qb = q[b * tq:(b + 1) * tq, :]
        kb = k[b * tk:(b + 1) * tk, :]
        vob = vo[b * tk:(b + 1) * tk, :]
        acc = None
        for h in range(NHEAD):
            lo, hi = h * HEAD_DIM, (h + 1) * HEAD_DIM
            logits = jax.lax.dot_general(
                qb[:, lo:hi], kb[:, lo:hi],
                dimension_numbers=(((1,), (1,)), ((), ())),
                preferred_element_type=jnp.float32)          # (tq, tk)
            m = jnp.max(logits, axis=-1, keepdims=True)
            p = jnp.exp(logits - m)
            p = p / jnp.sum(p, axis=-1, keepdims=True)        # exact (needed for bias fold)
            c = jnp.dot(p, vob[:, h * D_MODEL:(h + 1) * D_MODEL],
                        preferred_element_type=jnp.float32)   # (tq, D)
            acc = c if acc is None else acc + c
        outs.append(acc)
    return jnp.concatenate(outs, axis=0)


# --------------------------- fused Pallas kernel -----------------------------
def decoder_kernel(acts_ref, w_ref, b_ref, out_ref):
    D = D_MODEL
    NT = B * T
    NS = B * S
    x    = acts_ref[0:NT, :]                       # (16, 32) tgt (batch-major rows)
    qpos = acts_ref[NT:2 * NT, :]                  # (16, 32)
    mem  = acts_ref[2 * NT:2 * NT + NS, :]         # (32, 32)
    pos  = acts_ref[2 * NT + NS:2 * NT + 2 * NS, :]
    kmem = mem + pos                               # cross-attn key input, layer-invariant

    for l in range(NUM_LAYERS):                    # layers unrolled (L = 2)
        w = w_ref[l]                               # (32, 512)
        bs = b_ref[l]                              # (4, 128)

        # ---- self attention: fused Q/K projection, folded V*O projection ----
        qk = jnp.dot(x + qpos, w[:, 256:320],
                     preferred_element_type=jnp.float32) + bs[0:1, 0:64]      # (16, 64)
        svo = jnp.dot(x, w[:, 0:128], preferred_element_type=jnp.float32)     # (16, 128)
        sa = _attn(qk[:, 0:D], qk[:, D:2 * D], svo, T, T) + bs[1:2, 64:96]
        x = _layer_norm(x + sa, bs[2:3, 32:64], bs[3:4, 0:32])

        # ---- cross attention ----
        cq = jnp.dot(x + qpos, w[:, 320:352],
                     preferred_element_type=jnp.float32) + bs[0:1, 64:96]     # (16, 32)
        ck = jnp.dot(kmem, w[:, 352:384],
                     preferred_element_type=jnp.float32) + bs[0:1, 96:128]    # (32, 32)
        cvo = jnp.dot(mem, w[:, 128:256], preferred_element_type=jnp.float32) # (32, 128)
        ca = _attn(cq, ck, cvo, T, S) + bs[1:2, 96:128]
        x = _layer_norm(x + ca, bs[2:3, 64:96], bs[3:4, 32:64])

        # ---- feed forward (relu); w2 stored transposed (contract on dim 1) ----
        h = jnp.maximum(jnp.dot(x, w[:, 384:448],
                                preferred_element_type=jnp.float32) + bs[1:2, 0:64], 0.0)
        f = jax.lax.dot_general(h, w[:, 448:512],
                                dimension_numbers=(((1,), (1,)), ((), ())),
                                preferred_element_type=jnp.float32) + bs[2:3, 0:32]
        x = _layer_norm(x + f, bs[2:3, 96:128], bs[3:4, 64:96])

    # ---- final decoder LayerNorm ----
    fb = b_ref[NUM_LAYERS]
    x = _layer_norm(x, fb[0:1, 0:D], fb[0:1, D:2 * D])
    out_ref[...] = x                               # contiguous (16, 32) store


# --------------------------- host-side packing --------------------------------
def pack_params(layer_params, norm_w, norm_b):
    """One-time prep: fold softmax scale into Q weights/bias, fold per-head V and output
    projections into one (D, NHEAD*D) matrix (+ bias fold), and pack everything into two
    lane-dense slabs."""
    D = D_MODEL
    scale = 1.0 / math.sqrt(HEAD_DIM)

    def fold_vo(wv, wo):
        return jnp.concatenate(
            [wv[:, h * HEAD_DIM:(h + 1) * HEAD_DIM] @ wo[h * HEAD_DIM:(h + 1) * HEAD_DIM, :]
             for h in range(NHEAD)], axis=1)       # (D, NHEAD*D) = (32, 128)

    w_layers, b_layers = [], []
    for p in layer_params:
        sa_wq = p['sa_in_w'][:, :D] * scale
        sa_wk = p['sa_in_w'][:, D:2 * D]
        sa_wv = p['sa_in_w'][:, 2 * D:]
        sa_bq = p['sa_in_b'][:, :D] * scale
        sa_bk = p['sa_in_b'][:, D:2 * D]
        sa_bv = p['sa_in_b'][:, 2 * D:]
        sa_vo = fold_vo(sa_wv, p['sa_out_w'])
        sa_vo_b = p['sa_out_b'] + sa_bv @ p['sa_out_w']

        ca_wq = p['ca_in_w'][:, :D] * scale
        ca_wk = p['ca_in_w'][:, D:2 * D]
        ca_wv = p['ca_in_w'][:, 2 * D:]
        ca_bq = p['ca_in_b'][:, :D] * scale
        ca_bk = p['ca_in_b'][:, D:2 * D]
        ca_bv = p['ca_in_b'][:, 2 * D:]
        ca_vo = fold_vo(ca_wv, p['ca_out_w'])
        ca_vo_b = p['ca_out_b'] + ca_bv @ p['ca_out_w']

        w_layers.append(jnp.concatenate(
            [sa_vo, ca_vo, sa_wq, sa_wk, ca_wq, ca_wk, p['w1'], p['w2'].T], axis=1))  # (32, 512)

        row0 = jnp.concatenate([sa_bq, sa_bk, ca_bq, ca_bk], axis=1)                  # (1, 128)
        row1 = jnp.concatenate([p['b1'], sa_vo_b, ca_vo_b], axis=1)                   # (1, 128)
        row2 = jnp.concatenate([p['b2'], p['ln_w'][0:1], p['ln_w'][1:2], p['ln_w'][2:3]], axis=1)
        row3 = jnp.concatenate([p['ln_b'][0:1], p['ln_b'][1:2], p['ln_b'][2:3],
                                jnp.zeros((1, D), jnp.float32)], axis=1)
        b_layers.append(jnp.concatenate([row0, row1, row2, row3], axis=0))            # (4, 128)

    fin = jnp.zeros((4, 4 * D), jnp.float32)
    fin = fin.at[0:1, 0:D].set(norm_w).at[0:1, D:2 * D].set(norm_b)

    w_slab = jnp.stack(w_layers, axis=0)                   # (L, 32, 512)
    b_slab = jnp.stack(b_layers + [fin], axis=0)           # (L+1, 4, 128)
    return w_slab, b_slab


# --------------------------- wrapper ------------------------------------------
@jax.jit
def transformer_decoder_forward(tgt, memory, query_pos, pos, w_slab, b_slab):
    # Native PyTorch layout in: (T, B, D) / (S, B, D). One-time layout plumbing to
    # batch-major flat rows (done in the jitted wrapper, outside the kernel).
    tf = jnp.transpose(tgt, (1, 0, 2)).reshape(B * T, D_MODEL)
    qf = jnp.transpose(query_pos, (1, 0, 2)).reshape(B * T, D_MODEL)
    mf = jnp.transpose(memory, (1, 0, 2)).reshape(B * S, D_MODEL)
    pf = jnp.transpose(pos, (1, 0, 2)).reshape(B * S, D_MODEL)
    acts = jnp.concatenate([tf, qf, mf, pf], axis=0)       # (96, 32): one activation DMA

    vmem = pl.BlockSpec(memory_space=pltpu.MemorySpace.VMEM)
    out = pl.pallas_call(
        decoder_kernel,
        out_shape=jax.ShapeDtypeStruct((B * T, D_MODEL), jnp.float32),
        in_specs=[vmem, vmem, vmem],
        out_specs=vmem,
    )(acts, w_slab, b_slab)

    out = jnp.transpose(out.reshape(B, T, D_MODEL), (1, 0, 2))   # back to (T, B, D)
    return out[None]                                             # unsqueeze(0) -> (1, T, B, D)


# --------------------------- pure-JAX reference -----------------------------
def reference_forward(tgt, memory, query_pos, pos, layer_params, norm_w, norm_b):
    # Independent of the kernel packing: unscaled weights, explicit scale, exact softmax,
    # per-head concat, two-pass LayerNorm.
    def ln(x, w, b):
        mu = jnp.mean(x, axis=-1, keepdims=True)
        var = jnp.mean((x - mu) ** 2, axis=-1, keepdims=True)
        return (x - mu) / jnp.sqrt(var + EPS) * w + b

    def mha(q_in, k_in, v_in, in_w, in_b, out_w, out_b):
        D = D_MODEL
        q = q_in @ in_w[:, :D] + in_b[:, :D]
        k = k_in @ in_w[:, D:2 * D] + in_b[:, D:2 * D]
        v = v_in @ in_w[:, 2 * D:] + in_b[:, 2 * D:]
        scale = 1.0 / math.sqrt(HEAD_DIM)
        heads = []
        for h in range(NHEAD):
            sl = slice(h * HEAD_DIM, (h + 1) * HEAD_DIM)
            logits = (q[:, sl] * scale) @ k[:, sl].T
            p = jax.nn.softmax(logits, axis=-1)
            heads.append(p @ v[:, sl])
        return jnp.concatenate(heads, axis=-1) @ out_w + out_b

    outs = []
    for b in range(tgt.shape[1]):
        x = tgt[:, b, :]
        m = memory[:, b, :]
        qp = query_pos[:, b, :]
        ps = pos[:, b, :]
        for p in layer_params:
            t2 = mha(x + qp, x + qp, x, p['sa_in_w'], p['sa_in_b'], p['sa_out_w'], p['sa_out_b'])
            x = ln(x + t2, p['ln_w'][0:1], p['ln_b'][0:1])
            t2 = mha(x + qp, m + ps, m, p['ca_in_w'], p['ca_in_b'], p['ca_out_w'], p['ca_out_b'])
            x = ln(x + t2, p['ln_w'][1:2], p['ln_b'][1:2])
            h = jnp.maximum(x @ p['w1'] + p['b1'], 0.0)
            t2 = h @ p['w2'] + p['b2']
            x = ln(x + t2, p['ln_w'][2:3], p['ln_b'][2:3])
        x = ln(x, norm_w, norm_b)
        outs.append(x)
    return jnp.stack(outs, axis=1)[None]    # (1, T, B, D)


# --------------------------- params ------------------------------------------
def init_params(key):
    layer_params = []
    s = 0.05
    for _ in range(NUM_LAYERS):
        key, *ks = jax.random.split(key, 13)
        p = {
            'sa_in_w':  jax.random.normal(ks[0],  (D_MODEL, 3 * D_MODEL), jnp.float32) * s,
            'sa_in_b':  jax.random.normal(ks[1],  (1, 3 * D_MODEL), jnp.float32) * s,
            'sa_out_w': jax.random.normal(ks[2],  (D_MODEL, D_MODEL), jnp.float32) * s,
            'sa_out_b': jax.random.normal(ks[3],  (1, D_MODEL), jnp.float32) * s,
            'ca_in_w':  jax.random.normal(ks[4],  (D_MODEL, 3 * D_MODEL), jnp.float32) * s,
            'ca_in_b':  jax.random.normal(ks[5],  (1, 3 * D_MODEL), jnp.float32) * s,
            'ca_out_w': jax.random.normal(ks[6],  (D_MODEL, D_MODEL), jnp.float32) * s,
            'ca_out_b': jax.random.normal(ks[7],  (1, D_MODEL), jnp.float32) * s,
            'w1':       jax.random.normal(ks[8],  (D_MODEL, DIM_FF), jnp.float32) * s,
            'b1':       jax.random.normal(ks[9],  (1, DIM_FF), jnp.float32) * s,
            'w2':       jax.random.normal(ks[10], (DIM_FF, D_MODEL), jnp.float32) * s,
            'b2':       jax.random.normal(ks[11], (1, D_MODEL), jnp.float32) * s,
            'ln_w':     jnp.ones((3, D_MODEL), jnp.float32),   # norm1/2/3 gamma
            'ln_b':     jnp.zeros((3, D_MODEL), jnp.float32),  # norm1/2/3 beta
        }
        layer_params.append(p)
    norm_w = jnp.ones((1, D_MODEL), jnp.float32)   # final decoder LayerNorm
    norm_b = jnp.zeros((1, D_MODEL), jnp.float32)
    return layer_params, norm_w, norm_b


# --------------------------- main --------------------------------------------
if __name__ == "__main__":
    key = jax.random.PRNGKey(0)
    k1, k2, k3, k4, kp = jax.random.split(key, 5)
    tgt = jax.random.normal(k1, (T, B, D_MODEL), jnp.float32)
    memory = jax.random.normal(k2, (S, B, D_MODEL), jnp.float32)
    query_pos = jax.random.normal(k3, (T, B, D_MODEL), jnp.float32)
    pos = jax.random.normal(k4, (S, B, D_MODEL), jnp.float32)
    layer_params, norm_w, norm_b = init_params(kp)

    w_slab, b_slab = pack_params(layer_params, norm_w, norm_b)
    out = transformer_decoder_forward(tgt, memory, query_pos, pos, w_slab, b_slab)
    out = jax.block_until_ready(out)

    assert out.shape == (1, T, B, D_MODEL), out.shape
    assert bool(jnp.all(jnp.isfinite(out)))

    ref = reference_forward(tgt, memory, query_pos, pos, layer_params, norm_w, norm_b)
    max_err = float(jnp.max(jnp.abs(out - ref)))
    assert jnp.allclose(out, ref, atol=1e-2, rtol=1e-2), f"max_err={max_err}"

    print("KERNEL_OK")
</pallas_src>

<mosaic_0001>
module attributes {stable_mosaic.version = 11 : i64} {
  func.func @decoder_kernel(%arg0: memref<96x32xf32, #tpu.memory_space<vmem>>, %arg1: memref<2x32x512xf32, #tpu.memory_space<vmem>>, %arg2: memref<3x4x128xf32, #tpu.memory_space<vmem>>, %arg3: memref<16x32xf32, #tpu.memory_space<vmem>>) attributes {dimension_semantics = [], scalar_prefetch = 0 : i64, scratch_operands = 0 : i64, tpu.core_type = #tpu.core_type<tc>} {
    %c0 = arith.constant 0 : index
    %c0_0 = arith.constant 0 : index
    %0 = vector.load %arg0[%c0, %c0_0] : memref<96x32xf32, #tpu.memory_space<vmem>>, vector<16x32xf32>
    %c16 = arith.constant 16 : index
    %c0_1 = arith.constant 0 : index
    %1 = vector.load %arg0[%c16, %c0_1] : memref<96x32xf32, #tpu.memory_space<vmem>>, vector<16x32xf32>
    %c32 = arith.constant 32 : index
    %c0_2 = arith.constant 0 : index
    %2 = vector.load %arg0[%c32, %c0_2] : memref<96x32xf32, #tpu.memory_space<vmem>>, vector<32x32xf32>
    %c64 = arith.constant 64 : index
    %c0_3 = arith.constant 0 : index
    %3 = vector.load %arg0[%c64, %c0_3] : memref<96x32xf32, #tpu.memory_space<vmem>>, vector<32x32xf32>
    %4 = arith.addf %2, %3 : vector<32x32xf32>
    %c0_4 = arith.constant 0 : index
    %c0_5 = arith.constant 0 : index
    %c0_6 = arith.constant 0 : index
    %5 = vector.load %arg1[%c0_4, %c0_5, %c0_6] : memref<2x32x512xf32, #tpu.memory_space<vmem>>, vector<1x32x512xf32>
    %6 = vector.shape_cast %5 : vector<1x32x512xf32> to vector<32x512xf32>
    %c0_7 = arith.constant 0 : index
    %c0_8 = arith.constant 0 : index
    %c0_9 = arith.constant 0 : index
    %7 = vector.load %arg2[%c0_7, %c0_8, %c0_9] : memref<3x4x128xf32, #tpu.memory_space<vmem>>, vector<1x4x128xf32>
    %8 = vector.shape_cast %7 : vector<1x4x128xf32> to vector<4x128xf32>
    %9 = arith.addf %0, %1 : vector<16x32xf32>
    %10 = vector.extract_strided_slice %6 {offsets = [0, 256], sizes = [32, 64], strides = [1, 1]} : vector<32x512xf32> to vector<32x64xf32>
    %cst = arith.constant dense<0.000000e+00> : vector<16x64xf32>
    %11 = tpu.matmul %9, %10, %cst {dimension_numbers = #tpu.dot_dimension_numbers<[1], [0], [0], [1], [0, 0, 1, 1], [], []>} : vector<16x32xf32>, vector<32x64xf32>, vector<16x64xf32> -> vector<16x64xf32>
    %12 = vector.extract_strided_slice %8 {offsets = [0, 0], sizes = [1, 64], strides = [1, 1]} : vector<4x128xf32> to vector<1x64xf32>
    %13 = vector.broadcast %12 : vector<1x64xf32> to vector<16x64xf32>
    %14 = arith.addf %11, %13 : vector<16x64xf32>
    %15 = vector.extract_strided_slice %6 {offsets = [0, 0], sizes = [32, 128], strides = [1, 1]} : vector<32x512xf32> to vector<32x128xf32>
    %cst_10 = arith.constant dense<0.000000e+00> : vector<16x128xf32>
    %16 = tpu.matmul %0, %15, %cst_10 {dimension_numbers = #tpu.dot_dimension_numbers<[1], [0], [0], [1], [0, 0, 1, 1], [], []>} : vector<16x32xf32>, vector<32x128xf32>, vector<16x128xf32> -> vector<16x128xf32>
    %17 = vector.extract_strided_slice %14 {offsets = [0, 0], sizes = [16, 32], strides = [1, 1]} : vector<16x64xf32> to vector<16x32xf32>
    %18 = vector.extract_strided_slice %14 {offsets = [0, 32], sizes = [16, 32], strides = [1, 1]} : vector<16x64xf32> to vector<16x32xf32>
    %19 = vector.extract_strided_slice %17 {offsets = [0, 0], sizes = [8, 32], strides = [1, 1]} : vector<16x32xf32> to vector<8x32xf32>
    %20 = vector.extract_strided_slice %18 {offsets = [0, 0], sizes = [8, 32], strides = [1, 1]} : vector<16x32xf32> to vector<8x32xf32>
    %21 = vector.extract_strided_slice %16 {offsets = [0, 0], sizes = [8, 128], strides = [1, 1]} : vector<16x128xf32> to vector<8x128xf32>
    %22 = vector.extract_strided_slice %19 {offsets = [0, 0], sizes = [8, 8], strides = [1, 1]} : vector<8x32xf32> to vector<8x8xf32>
    %23 = vector.extract_strided_slice %20 {offsets = [0, 0], sizes = [8, 8], strides = [1, 1]} : vector<8x32xf32> to vector<8x8xf32>
    %cst_11 = arith.constant dense<0.000000e+00> : vector<8x8xf32>
    %24 = tpu.matmul %22, %23, %cst_11 {dimension_numbers = #tpu.dot_dimension_numbers<[1], [1], [0], [0], [0, 0, 1, 0], [], []>} : vector<8x8xf32>, vector<8x8xf32>, vector<8x8xf32> -> vector<8x8xf32>
    %cst_12 = arith.constant dense<0xFF800000> : vector<8xf32>
    %25 = vector.multi_reduction <maximumf>, %24, %cst_12 [1] : vector<8x8xf32> to vector<8xf32>
    %26 = vector.shape_cast %25 : vector<8xf32> to vector<8x1xf32>
    %27 = vector.broadcast %26 : vector<8x1xf32> to vector<8x8xf32>
    %28 = arith.subf %24, %27 : vector<8x8xf32>
    %29 = math.exp %28 : vector<8x8xf32>
    %cst_13 = arith.constant dense<0.000000e+00> : vector<8xf32>
    %30 = vector.multi_reduction <add>, %29, %cst_13 [1] : vector<8x8xf32> to vector<8xf32>
    %31 = vector.shape_cast %30 : vector<8xf32> to vector<8x1xf32>
    %32 = vector.broadcast %31 : vector<8x1xf32> to vector<8x8xf32>
    %33 = arith.divf %29, %32 : vector<8x8xf32>
    %34 = vector.extract_strided_slice %21 {offsets = [0, 0], sizes = [8, 32], strides = [1, 1]} : vector<8x128xf32> to vector<8x32xf32>
    %cst_14 = arith.constant dense<0.000000e+00> : vector<8x32xf32>
    %35 = tpu.matmul %33, %34, %cst_14 {dimension_numbers = #tpu.dot_dimension_numbers<[1], [0], [0], [1], [0, 0, 1, 1], [], []>} : vector<8x8xf32>, vector<8x32xf32>, vector<8x32xf32> -> vector<8x32xf32>
    %36 = vector.extract_strided_slice %19 {offsets = [0, 8], sizes = [8, 8], strides = [1, 1]} : vector<8x32xf32> to vector<8x8xf32>
    %37 = vector.extract_strided_slice %20 {offsets = [0, 8], sizes = [8, 8], strides = [1, 1]} : vector<8x32xf32> to vector<8x8xf32>
    %cst_15 = arith.constant dense<0.000000e+00> : vector<8x8xf32>
    %38 = tpu.matmul %36, %37, %cst_15 {dimension_numbers = #tpu.dot_dimension_numbers<[1], [1], [0], [0], [0, 0, 1, 0], [], []>} : vector<8x8xf32>, vector<8x8xf32>, vector<8x8xf32> -> vector<8x8xf32>
    %cst_16 = arith.constant dense<0xFF800000> : vector<8xf32>
    %39 = vector.multi_reduction <maximumf>, %38, %cst_16 [1] : vector<8x8xf32> to vector<8xf32>
    %40 = vector.shape_cast %39 : vector<8xf32> to vector<8x1xf32>
    %41 = vector.broadcast %40 : vector<8x1xf32> to vector<8x8xf32>
    %42 = arith.subf %38, %41 : vector<8x8xf32>
    %43 = math.exp %42 : vector<8x8xf32>
    %cst_17 = arith.constant dense<0.000000e+00> : vector<8xf32>
    %44 = vector.multi_reduction <add>, %43, %cst_17 [1] : vector<8x8xf32> to vector<8xf32>
    %45 = vector.shape_cast %44 : vector<8xf32> to vector<8x1xf32>
    %46 = vector.broadcast %45 : vector<8x1xf32> to vector<8x8xf32>
    %47 = arith.divf %43, %46 : vector<8x8xf32>
    %48 = vector.extract_strided_slice %21 {offsets = [0, 32], sizes = [8, 32], strides = [1, 1]} : vector<8x128xf32> to vector<8x32xf32>
    %cst_18 = arith.constant dense<0.000000e+00> : vector<8x32xf32>
    %49 = tpu.matmul %47, %48, %cst_18 {dimension_numbers = #tpu.dot_dimension_numbers<[1], [0], [0], [1], [0, 0, 1, 1], [], []>} : vector<8x8xf32>, vector<8x32xf32>, vector<8x32xf32> -> vector<8x32xf32>
    %50 = arith.addf %35, %49 : vector<8x32xf32>
    %51 = vector.extract_strided_slice %19 {offsets = [0, 16], sizes = [8, 8], strides = [1, 1]} : vector<8x32xf32> to vector<8x8xf32>
    %52 = vector.extract_strided_slice %20 {offsets = [0, 16], sizes = [8, 8], strides = [1, 1]} : vector<8x32xf32> to vector<8x8xf32>
    %cst_19 = arith.constant dense<0.000000e+00> : vector<8x8xf32>
    %53 = tpu.matmul %51, %52, %cst_19 {dimension_numbers = #tpu.dot_dimension_numbers<[1], [1], [0], [0], [0, 0, 1, 0], [], []>} : vector<8x8xf32>, vector<8x8xf32>, vector<8x8xf32> -> vector<8x8xf32>
    %cst_20 = arith.constant dense<0xFF800000> : vector<8xf32>
    %54 = vector.multi_reduction <maximumf>, %53, %cst_20 [1] : vector<8x8xf32> to vector<8xf32>
    %55 = vector.shape_cast %54 : vector<8xf32> to vector<8x1xf32>
    %56 = vector.broadcast %55 : vector<8x1xf32> to vector<8x8xf32>
    %57 = arith.subf %53, %56 : vector<8x8xf32>
    %58 = math.exp %57 : vector<8x8xf32>
    %cst_21 = arith.constant dense<0.000000e+00> : vector<8xf32>
    %59 = vector.multi_reduction <add>, %58, %cst_21 [1] : vector<8x8xf32> to vector<8xf32>
    %60 = vector.shape_cast %59 : vector<8xf32> to vector<8x1xf32>
    %61 = vector.broadcast %60 : vector<8x1xf32> to vector<8x8xf32>
    %62 = arith.divf %58, %61 : vector<8x8xf32>
    %63 = vector.extract_strided_slice %21 {offsets = [0, 64], sizes = [8, 32], strides = [1, 1]} : vector<8x128xf32> to vector<8x32xf32>
    %cst_22 = arith.constant dense<0.000000e+00> : vector<8x32xf32>
    %64 = tpu.matmul %62, %63, %cst_22 {dimension_numbers = #tpu.dot_dimension_numbers<[1], [0], [0], [1], [0, 0, 1, 1], [], []>} : vector<8x8xf32>, vector<8x32xf32>, vector<8x32xf32> -> vector<8x32xf32>
    %65 = arith.addf %50, %64 : vector<8x32xf32>
    %66 = vector.extract_strided_slice %19 {offsets = [0, 24], sizes = [8, 8], strides = [1, 1]} : vector<8x32xf32> to vector<8x8xf32>
    %67 = vector.extract_strided_slice %20 {offsets = [0, 24], sizes = [8, 8], strides = [1, 1]} : vector<8x32xf32> to vector<8x8xf32>
    %cst_23 = arith.constant dense<0.000000e+00> : vector<8x8xf32>
    %68 = tpu.matmul %66, %67, %cst_23 {dimension_numbers = #tpu.dot_dimension_numbers<[1], [1], [0], [0], [0, 0, 1, 0], [], []>} : vector<8x8xf32>, vector<8x8xf32>, vector<8x8xf32> -> vector<8x8xf32>
    %cst_24 = arith.constant dense<0xFF800000> : vector<8xf32>
    %69 = vector.multi_reduction <maximumf>, %68, %cst_24 [1] : vector<8x8xf32> to vector<8xf32>
    %70 = vector.shape_cast %69 : vector<8xf32> to vector<8x1xf32>
    %71 = vector.broadcast %70 : vector<8x1xf32> to vector<8x8xf32>
    %72 = arith.subf %68, %71 : vector<8x8xf32>
    %73 = math.exp %72 : vector<8x8xf32>
    %cst_25 = arith.constant dense<0.000000e+00> : vector<8xf32>
    %74 = vector.multi_reduction <add>, %73, %cst_25 [1] : vector<8x8xf32> to vector<8xf32>
    %75 = vector.shape_cast %74 : vector<8xf32> to vector<8x1xf32>
    %76 = vector.broadcast %75 : vector<8x1xf32> to vector<8x8xf32>
    %77 = arith.divf %73, %76 : vector<8x8xf32>
    %78 = vector.extract_strided_slice %21 {offsets = [0, 96], sizes = [8, 32], strides = [1, 1]} : vector<8x128xf32> to vector<8x32xf32>
    %cst_26 = arith.constant dense<0.000000e+00> : vector<8x32xf32>
    %79 = tpu.matmul %77, %78, %cst_26 {dimension_numbers = #tpu.dot_dimension_numbers<[1], [0], [0], [1], [0, 0, 1, 1], [], []>} : vector<8x8xf32>, vector<8x32xf32>, vector<8x32xf32> -> vector<8x32xf32>
    %80 = arith.addf %65, %79 : vector<8x32xf32>
    %81 = vector.extract_strided_slice %17 {offsets = [8, 0], sizes = [8, 32], strides = [1, 1]} : vector<16x32xf32> to vector<8x32xf32>
    %82 = vector.extract_strided_slice %18 {offsets = [8, 0], sizes = [8, 32], strides = [1, 1]} : vector<16x32xf32> to vector<8x32xf32>
    %83 = vector.extract_strided_slice %16 {offsets = [8, 0], sizes = [8, 128], strides = [1, 1]} : vector<16x128xf32> to vector<8x128xf32>
    %84 = vector.extract_strided_slice %81 {offsets = [0, 0], sizes = [8, 8], strides = [1, 1]} : vector<8x32xf32> to vector<8x8xf32>
    %85 = vector.extract_strided_slice %82 {offsets = [0, 0], sizes = [8, 8], strides = [1, 1]} : vector<8x32xf32> to vector<8x8xf32>
    %cst_27 = arith.constant dense<0.000000e+00> : vector<8x8xf32>
    %86 = tpu.matmul %84, %85, %cst_27 {dimension_numbers = #tpu.dot_dimension_numbers<[1], [1], [0], [0], [0, 0, 1, 0], [], []>} : vector<8x8xf32>, vector<8x8xf32>, vector<8x8xf32> -> vector<8x8xf32>
    %cst_28 = arith.constant dense<0xFF800000> : vector<8xf32>
    %87 = vector.multi_reduction <maximumf>, %86, %cst_28 [1] : vector<8x8xf32> to vector<8xf32>
    %88 = vector.shape_cast %87 : vector<8xf32> to vector<8x1xf32>
    %89 = vector.broadcast %88 : vector<8x1xf32> to vector<8x8xf32>
    %90 = arith.subf %86, %89 : vector<8x8xf32>
    %91 = math.exp %90 : vector<8x8xf32>
    %cst_29 = arith.constant dense<0.000000e+00> : vector<8xf32>
    %92 = vector.multi_reduction <add>, %91, %cst_29 [1] : vector<8x8xf32> to vector<8xf32>
    %93 = vector.shape_cast %92 : vector<8xf32> to vector<8x1xf32>
    %94 = vector.broadcast %93 : vector<8x1xf32> to vector<8x8xf32>
    %95 = arith.divf %91, %94 : vector<8x8xf32>
    %96 = vector.extract_strided_slice %83 {offsets = [0, 0], sizes = [8, 32], strides = [1, 1]} : vector<8x128xf32> to vector<8x32xf32>
    %cst_30 = arith.constant dense<0.000000e+00> : vector<8x32xf32>
    %97 = tpu.matmul %95, %96, %cst_30 {dimension_numbers = #tpu.dot_dimension_numbers<[1], [0], [0], [1], [0, 0, 1, 1], [], []>} : vector<8x8xf32>, vector<8x32xf32>, vector<8x32xf32> -> vector<8x32xf32>
    %98 = vector.extract_strided_slice %81 {offsets = [0, 8], sizes = [8, 8], strides = [1, 1]} : vector<8x32xf32> to vector<8x8xf32>
    %99 = vector.extract_strided_slice %82 {offsets = [0, 8], sizes = [8, 8], strides = [1, 1]} : vector<8x32xf32> to vector<8x8xf32>
    %cst_31 = arith.constant dense<0.000000e+00> : vector<8x8xf32>
    %100 = tpu.matmul %98, %99, %cst_31 {dimension_numbers = #tpu.dot_dimension_numbers<[1], [1], [0], [0], [0, 0, 1, 0], [], []>} : vector<8x8xf32>, vector<8x8xf32>, vector<8x8xf32> -> vector<8x8xf32>
    %cst_32 = arith.constant dense<0xFF800000> : vector<8xf32>
    %101 = vector.multi_reduction <maximumf>, %100, %cst_32 [1] : vector<8x8xf32> to vector<8xf32>
    %102 = vector.shape_cast %101 : vector<8xf32> to vector<8x1xf32>
    %103 = vector.broadcast %102 : vector<8x1xf32> to vector<8x8xf32>
    %104 = arith.subf %100, %103 : vector<8x8xf32>
    %105 = math.exp %104 : vector<8x8xf32>
    %cst_33 = arith.constant dense<0.000000e+00> : vector<8xf32>
    %106 = vector.multi_reduction <add>, %105, %cst_33 [1] : vector<8x8xf32> to vector<8xf32>
    %107 = vector.shape_cast %106 : vector<8xf32> to vector<8x1xf32>
    %108 = vector.broadcast %107 : vector<8x1xf32> to vector<8x8xf32>
    %109 = arith.divf %105, %108 : vector<8x8xf32>
    %110 = vector.extract_strided_slice %83 {offsets = [0, 32], sizes = [8, 32], strides = [1, 1]} : vector<8x128xf32> to vector<8x32xf32>
    %cst_34 = arith.constant dense<0.000000e+00> : vector<8x32xf32>
    %111 = tpu.matmul %109, %110, %cst_34 {dimension_numbers = #tpu.dot_dimension_numbers<[1], [0], [0], [1], [0, 0, 1, 1], [], []>} : vector<8x8xf32>, vector<8x32xf32>, vector<8x32xf32> -> vector<8x32xf32>
    %112 = arith.addf %97, %111 : vector<8x32xf32>
    %113 = vector.extract_strided_slice %81 {offsets = [0, 16], sizes = [8, 8], strides = [1, 1]} : vector<8x32xf32> to vector<8x8xf32>
    %114 = vector.extract_strided_slice %82 {offsets = [0, 16], sizes = [8, 8], strides = [1, 1]} : vector<8x32xf32> to vector<8x8xf32>
    %cst_35 = arith.constant dense<0.000000e+00> : vector<8x8xf32>
    %115 = tpu.matmul %113, %114, %cst_35 {dimension_numbers = #tpu.dot_dimension_numbers<[1], [1], [0], [0], [0, 0, 1, 0], [], []>} : vector<8x8xf32>, vector<8x8xf32>, vector<8x8xf32> -> vector<8x8xf32>
    %cst_36 = arith.constant dense<0xFF800000> : vector<8xf32>
    %116 = vector.multi_reduction <maximumf>, %115, %cst_36 [1] : vector<8x8xf32> to vector<8xf32>
    %117 = vector.shape_cast %116 : vector<8xf32> to vector<8x1xf32>
    %118 = vector.broadcast %117 : vector<8x1xf32> to vector<8x8xf32>
    %119 = arith.subf %115, %118 : vector<8x8xf32>
    %120 = math.exp %119 : vector<8x8xf32>
    %cst_37 = arith.constant dense<0.000000e+00> : vector<8xf32>
    %121 = vector.multi_reduction <add>, %120, %cst_37 [1] : vector<8x8xf32> to vector<8xf32>
    %122 = vector.shape_cast %121 : vector<8xf32> to vector<8x1xf32>
    %123 = vector.broadcast %122 : vector<8x1xf32> to vector<8x8xf32>
    %124 = arith.divf %120, %123 : vector<8x8xf32>
    %125 = vector.extract_strided_slice %83 {offsets = [0, 64], sizes = [8, 32], strides = [1, 1]} : vector<8x128xf32> to vector<8x32xf32>
    %cst_38 = arith.constant dense<0.000000e+00> : vector<8x32xf32>
    %126 = tpu.matmul %124, %125, %cst_38 {dimension_numbers = #tpu.dot_dimension_numbers<[1], [0], [0], [1], [0, 0, 1, 1], [], []>} : vector<8x8xf32>, vector<8x32xf32>, vector<8x32xf32> -> vector<8x32xf32>
    %127 = arith.addf %112, %126 : vector<8x32xf32>
    %128 = vector.extract_strided_slice %81 {offsets = [0, 24], sizes = [8, 8], strides = [1, 1]} : vector<8x32xf32> to vector<8x8xf32>
    %129 = vector.extract_strided_slice %82 {offsets = [0, 24], sizes = [8, 8], strides = [1, 1]} : vector<8x32xf32> to vector<8x8xf32>
    %cst_39 = arith.constant dense<0.000000e+00> : vector<8x8xf32>
    %130 = tpu.matmul %128, %129, %cst_39 {dimension_numbers = #tpu.dot_dimension_numbers<[1], [1], [0], [0], [0, 0, 1, 0], [], []>} : vector<8x8xf32>, vector<8x8xf32>, vector<8x8xf32> -> vector<8x8xf32>
    %cst_40 = arith.constant dense<0xFF800000> : vector<8xf32>
    %131 = vector.multi_reduction <maximumf>, %130, %cst_40 [1] : vector<8x8xf32> to vector<8xf32>
    %132 = vector.shape_cast %131 : vector<8xf32> to vector<8x1xf32>
    %133 = vector.broadcast %132 : vector<8x1xf32> to vector<8x8xf32>
    %134 = arith.subf %130, %133 : vector<8x8xf32>
    %135 = math.exp %134 : vector<8x8xf32>
    %cst_41 = arith.constant dense<0.000000e+00> : vector<8xf32>
    %136 = vector.multi_reduction <add>, %135, %cst_41 [1] : vector<8x8xf32> to vector<8xf32>
    %137 = vector.shape_cast %136 : vector<8xf32> to vector<8x1xf32>
    %138 = vector.broadcast %137 : vector<8x1xf32> to vector<8x8xf32>
    %139 = arith.divf %135, %138 : vector<8x8xf32>
    %140 = vector.extract_strided_slice %83 {offsets = [0, 96], sizes = [8, 32], strides = [1, 1]} : vector<8x128xf32> to vector<8x32xf32>
    %cst_42 = arith.constant dense<0.000000e+00> : vector<8x32xf32>
    %141 = tpu.matmul %139, %140, %cst_42 {dimension_numbers = #tpu.dot_dimension_numbers<[1], [0], [0], [1], [0, 0, 1, 1], [], []>} : vector<8x8xf32>, vector<8x32xf32>, vector<8x32xf32> -> vector<8x32xf32>
    %142 = arith.addf %127, %141 : vector<8x32xf32>
    %143 = tpu.concatenate %80, %142 in 0 : vector<8x32xf32>, vector<8x32xf32> -> vector<16x32xf32>
    %144 = vector.extract_strided_slice %8 {offsets = [1, 64], sizes = [1, 32], strides = [1, 1]} : vector<4x128xf32> to vector<1x32xf32>
    %145 = vector.broadcast %144 : vector<1x32xf32> to vector<16x32xf32>
    %146 = arith.addf %143, %145 : vector<16x32xf32>
    %147 = arith.addf %0, %146 : vector<16x32xf32>
    %148 = vector.extract_strided_slice %8 {offsets = [2, 32], sizes = [1, 32], strides = [1, 1]} : vector<4x128xf32> to vector<1x32xf32>
    %149 = vector.extract_strided_slice %8 {offsets = [3, 0], sizes = [1, 32], strides = [1, 1]} : vector<4x128xf32> to vector<1x32xf32>
    %cst_43 = arith.constant dense<0.000000e+00> : vector<16xf32>
    %150 = vector.multi_reduction <add>, %147, %cst_43 [1] : vector<16x32xf32> to vector<16xf32>
    %151 = vector.shape_cast %150 : vector<16xf32> to vector<16x1xf32>
    %cst_44 = arith.constant 3.200000e+01 : f32
    %152 = vector.broadcast %cst_44 : f32 to vector<16x1xf32>
    %153 = arith.divf %151, %152 : vector<16x1xf32>
    %154 = arith.mulf %147, %147 : vector<16x32xf32>
    %cst_45 = arith.constant dense<0.000000e+00> : vector<16xf32>
    %155 = vector.multi_reduction <add>, %154, %cst_45 [1] : vector<16x32xf32> to vector<16xf32>
    %156 = vector.shape_cast %155 : vector<16xf32> to vector<16x1xf32>
    %cst_46 = arith.constant 3.200000e+01 : f32
    %157 = vector.broadcast %cst_46 : f32 to vector<16x1xf32>
    %158 = arith.divf %156, %157 : vector<16x1xf32>
    %159 = arith.mulf %153, %153 : vector<16x1xf32>
    %160 = arith.subf %158, %159 : vector<16x1xf32>
    %161 = vector.broadcast %153 : vector<16x1xf32> to vector<16x32xf32>
    %162 = arith.subf %147, %161 : vector<16x32xf32>
    %cst_47 = arith.constant 9.99999974E-6 : f32
    %163 = vector.broadcast %cst_47 : f32 to vector<16x1xf32>
    %164 = arith.addf %160, %163 : vector<16x1xf32>
    %165 = math.rsqrt %164 : vector<16x1xf32>
    %166 = vector.broadcast %165 : vector<16x1xf32> to vector<16x32xf32>
    %167 = arith.mulf %162, %166 : vector<16x32xf32>
    %168 = vector.broadcast %148 : vector<1x32xf32> to vector<16x32xf32>
    %169 = arith.mulf %167, %168 : vector<16x32xf32>
    %170 = vector.broadcast %149 : vector<1x32xf32> to vector<16x32xf32>
    %171 = arith.addf %169, %170 : vector<16x32xf32>
    %172 = arith.addf %171, %1 : vector<16x32xf32>
    %173 = vector.extract_strided_slice %6 {offsets = [0, 320], sizes = [32, 32], strides = [1, 1]} : vector<32x512xf32> to vector<32x32xf32>
    %cst_48 = arith.constant dense<0.000000e+00> : vector<16x32xf32>
    %174 = tpu.matmul %172, %173, %cst_48 {dimension_numbers = #tpu.dot_dimension_numbers<[1], [0], [0], [1], [0, 0, 1, 1], [], []>} : vector<16x32xf32>, vector<32x32xf32>, vector<16x32xf32> -> vector<16x32xf32>
    %175 = vector.extract_strided_slice %8 {offsets = [0, 64], sizes = [1, 32], strides = [1, 1]} : vector<4x128xf32> to vector<1x32xf32>
    %176 = vector.broadcast %175 : vector<1x32xf32> to vector<16x32xf32>
    %177 = arith.addf %174, %176 : vector<16x32xf32>
    %178 = vector.extract_strided_slice %6 {offsets = [0, 352], sizes = [32, 32], strides = [1, 1]} : vector<32x512xf32> to vector<32x32xf32>
    %cst_49 = arith.constant dense<0.000000e+00> : vector<32x32xf32>
    %179 = tpu.matmul %4, %178, %cst_49 {dimension_numbers = #tpu.dot_dimension_numbers<[1], [0], [0], [1], [0, 0, 1, 1], [], []>} : vector<32x32xf32>, vector<32x32xf32>, vector<32x32xf32> -> vector<32x32xf32>
    %180 = vector.extract_strided_slice %8 {offsets = [0, 96], sizes = [1, 32], strides = [1, 1]} : vector<4x128xf32> to vector<1x32xf32>
    %181 = vector.broadcast %180 : vector<1x32xf32> to vector<32x32xf32>
    %182 = arith.addf %179, %181 : vector<32x32xf32>
    %183 = vector.extract_strided_slice %6 {offsets = [0, 128], sizes = [32, 128], strides = [1, 1]} : vector<32x512xf32> to vector<32x128xf32>
    %cst_50 = arith.constant dense<0.000000e+00> : vector<32x128xf32>
    %184 = tpu.matmul %2, %183, %cst_50 {dimension_numbers = #tpu.dot_dimension_numbers<[1], [0], [0], [1], [0, 0, 1, 1], [], []>} : vector<32x32xf32>, vector<32x128xf32>, vector<32x128xf32> -> vector<32x128xf32>
    %185 = vector.extract_strided_slice %177 {offsets = [0, 0], sizes = [8, 32], strides = [1, 1]} : vector<16x32xf32> to vector<8x32xf32>
    %186 = vector.extract_strided_slice %182 {offsets = [0, 0], sizes = [16, 32], strides = [1, 1]} : vector<32x32xf32> to vector<16x32xf32>
    %187 = vector.extract_strided_slice %184 {offsets = [0, 0], sizes = [16, 128], strides = [1, 1]} : vector<32x128xf32> to vector<16x128xf32>
    %188 = vector.extract_strided_slice %185 {offsets = [0, 0], sizes = [8, 8], strides = [1, 1]} : vector<8x32xf32> to vector<8x8xf32>
    %189 = vector.extract_strided_slice %186 {offsets = [0, 0], sizes = [16, 8], strides = [1, 1]} : vector<16x32xf32> to vector<16x8xf32>
    %cst_51 = arith.constant dense<0.000000e+00> : vector<8x16xf32>
    %190 = tpu.matmul %188, %189, %cst_51 {dimension_numbers = #tpu.dot_dimension_numbers<[1], [1], [0], [0], [0, 0, 1, 0], [], []>} : vector<8x8xf32>, vector<16x8xf32>, vector<8x16xf32> -> vector<8x16xf32>
    %cst_52 = arith.constant dense<0xFF800000> : vector<8xf32>
    %191 = vector.multi_reduction <maximumf>, %190, %cst_52 [1] : vector<8x16xf32> to vector<8xf32>
    %192 = vector.shape_cast %191 : vector<8xf32> to vector<8x1xf32>
    %193 = vector.broadcast %192 : vector<8x1xf32> to vector<8x16xf32>
    %194 = arith.subf %190, %193 : vector<8x16xf32>
    %195 = math.exp %194 : vector<8x16xf32>
    %cst_53 = arith.constant dense<0.000000e+00> : vector<8xf32>
    %196 = vector.multi_reduction <add>, %195, %cst_53 [1] : vector<8x16xf32> to vector<8xf32>
    %197 = vector.shape_cast %196 : vector<8xf32> to vector<8x1xf32>
    %198 = vector.broadcast %197 : vector<8x1xf32> to vector<8x16xf32>
    %199 = arith.divf %195, %198 : vector<8x16xf32>
    %200 = vector.extract_strided_slice %187 {offsets = [0, 0], sizes = [16, 32], strides = [1, 1]} : vector<16x128xf32> to vector<16x32xf32>
    %cst_54 = arith.constant dense<0.000000e+00> : vector<8x32xf32>
    %201 = tpu.matmul %199, %200, %cst_54 {dimension_numbers = #tpu.dot_dimension_numbers<[1], [0], [0], [1], [0, 0, 1, 1], [], []>} : vector<8x16xf32>, vector<16x32xf32>, vector<8x32xf32> -> vector<8x32xf32>
    %202 = vector.extract_strided_slice %185 {offsets = [0, 8], sizes = [8, 8], strides = [1, 1]} : vector<8x32xf32> to vector<8x8xf32>
    %203 = vector.extract_strided_slice %186 {offsets = [0, 8], sizes = [16, 8], strides = [1, 1]} : vector<16x32xf32> to vector<16x8xf32>
    %cst_55 = arith.constant dense<0.000000e+00> : vector<8x16xf32>
    %204 = tpu.matmul %202, %203, %cst_55 {dimension_numbers = #tpu.dot_dimension_numbers<[1], [1], [0], [0], [0, 0, 1, 0], [], []>} : vector<8x8xf32>, vector<16x8xf32>, vector<8x16xf32> -> vector<8x16xf32>
    %cst_56 = arith.constant dense<0xFF800000> : vector<8xf32>
    %205 = vector.multi_reduction <maximumf>, %204, %cst_56 [1] : vector<8x16xf32> to vector<8xf32>
    %206 = vector.shape_cast %205 : vector<8xf32> to vector<8x1xf32>
    %207 = vector.broadcast %206 : vector<8x1xf32> to vector<8x16xf32>
    %208 = arith.subf %204, %207 : vector<8x16xf32>
    %209 = math.exp %208 : vector<8x16xf32>
    %cst_57 = arith.constant dense<0.000000e+00> : vector<8xf32>
    %210 = vector.multi_reduction <add>, %209, %cst_57 [1] : vector<8x16xf32> to vector<8xf32>
    %211 = vector.shape_cast %210 : vector<8xf32> to vector<8x1xf32>
    %212 = vector.broadcast %211 : vector<8x1xf32> to vector<8x16xf32>
    %213 = arith.divf %209, %212 : vector<8x16xf32>
    %214 = vector.extract_strided_slice %187 {offsets = [0, 32], sizes = [16, 32], strides = [1, 1]} : vector<16x128xf32> to vector<16x32xf32>
    %cst_58 = arith.constant dense<0.000000e+00> : vector<8x32xf32>
    %215 = tpu.matmul %213, %214, %cst_58 {dimension_numbers = #tpu.dot_dimension_numbers<[1], [0], [0], [1], [0, 0, 1, 1], [], []>} : vector<8x16xf32>, vector<16x32xf32>, vector<8x32xf32> -> vector<8x32xf32>
    %216 = arith.addf %201, %215 : vector<8x32xf32>
    %217 = vector.extract_strided_slice %185 {offsets = [0, 16], sizes = [8, 8], strides = [1, 1]} : vector<8x32xf32> to vector<8x8xf32>
    %218 = vector.extract_strided_slice %186 {offsets = [0, 16], sizes = [16, 8], strides = [1, 1]} : vector<16x32xf32> to vector<16x8xf32>
    %cst_59 = arith.constant dense<0.000000e+00> : vector<8x16xf32>
    %219 = tpu.matmul %217, %218, %cst_59 {dimension_numbers = #tpu.dot_dimension_numbers<[1], [1], [0], [0], [0, 0, 1, 0], [], []>} : vector<8x8xf32>, vector<16x8xf32>, vector<8x16xf32> -> vector<8x16xf32>
    %cst_60 = arith.constant dense<0xFF800000> : vector<8xf32>
    %220 = vector.multi_reduction <maximumf>, %219, %cst_60 [1] : vector<8x16xf32> to vector<8xf32>
    %221 = vector.shape_cast %220 : vector<8xf32> to vector<8x1xf32>
    %222 = vector.broadcast %221 : vector<8x1xf32> to vector<8x16xf32>
    %223 = arith.subf %219, %222 : vector<8x16xf32>
    %224 = math.exp %223 : vector<8x16xf32>
    %cst_61 = arith.constant dense<0.000000e+00> : vector<8xf32>
    %225 = vector.multi_reduction <add>, %224, %cst_61 [1] : vector<8x16xf32> to vector<8xf32>
    %226 = vector.shape_cast %225 : vector<8xf32> to vector<8x1xf32>
    %227 = vector.broadcast %226 : vector<8x1xf32> to vector<8x16xf32>
    %228 = arith.divf %224, %227 : vector<8x16xf32>
    %229 = vector.extract_strided_slice %187 {offsets = [0, 64], sizes = [16, 32], strides = [1, 1]} : vector<16x128xf32> to vector<16x32xf32>
    %cst_62 = arith.constant dense<0.000000e+00> : vector<8x32xf32>
    %230 = tpu.matmul %228, %229, %cst_62 {dimension_numbers = #tpu.dot_dimension_numbers<[1], [0], [0], [1], [0, 0, 1, 1], [], []>} : vector<8x16xf32>, vector<16x32xf32>, vector<8x32xf32> -> vector<8x32xf32>
    %231 = arith.addf %216, %230 : vector<8x32xf32>
    %232 = vector.extract_strided_slice %185 {offsets = [0, 24], sizes = [8, 8], strides = [1, 1]} : vector<8x32xf32> to vector<8x8xf32>
    %233 = vector.extract_strided_slice %186 {offsets = [0, 24], sizes = [16, 8], strides = [1, 1]} : vector<16x32xf32> to vector<16x8xf32>
    %cst_63 = arith.constant dense<0.000000e+00> : vector<8x16xf32>
    %234 = tpu.matmul %232, %233, %cst_63 {dimension_numbers = #tpu.dot_dimension_numbers<[1], [1], [0], [0], [0, 0, 1, 0], [], []>} : vector<8x8xf32>, vector<16x8xf32>, vector<8x16xf32> -> vector<8x16xf32>
    %cst_64 = arith.constant dense<0xFF800000> : vector<8xf32>
    %235 = vector.multi_reduction <maximumf>, %234, %cst_64 [1] : vector<8x16xf32> to vector<8xf32>
    %236 = vector.shape_cast %235 : vector<8xf32> to vector<8x1xf32>
    %237 = vector.broadcast %236 : vector<8x1xf32> to vector<8x16xf32>
    %238 = arith.subf %234, %237 : vector<8x16xf32>
    %239 = math.exp %238 : vector<8x16xf32>
    %cst_65 = arith.constant dense<0.000000e+00> : vector<8xf32>
    %240 = vector.multi_reduction <add>, %239, %cst_65 [1] : vector<8x16xf32> to vector<8xf32>
    %241 = vector.shape_cast %240 : vector<8xf32> to vector<8x1xf32>
    %242 = vector.broadcast %241 : vector<8x1xf32> to vector<8x16xf32>
    %243 = arith.divf %239, %242 : vector<8x16xf32>
    %244 = vector.extract_strided_slice %187 {offsets = [0, 96], sizes = [16, 32], strides = [1, 1]} : vector<16x128xf32> to vector<16x32xf32>
    %cst_66 = arith.constant dense<0.000000e+00> : vector<8x32xf32>
    %245 = tpu.matmul %243, %244, %cst_66 {dimension_numbers = #tpu.dot_dimension_numbers<[1], [0], [0], [1], [0, 0, 1, 1], [], []>} : vector<8x16xf32>, vector<16x32xf32>, vector<8x32xf32> -> vector<8x32xf32>
    %246 = arith.addf %231, %245 : vector<8x32xf32>
    %247 = vector.extract_strided_slice %177 {offsets = [8, 0], sizes = [8, 32], strides = [1, 1]} : vector<16x32xf32> to vector<8x32xf32>
    %248 = vector.extract_strided_slice %182 {offsets = [16, 0], sizes = [16, 32], strides = [1, 1]} : vector<32x32xf32> to vector<16x32xf32>
    %249 = vector.extract_strided_slice %184 {offsets = [16, 0], sizes = [16, 128], strides = [1, 1]} : vector<32x128xf32> to vector<16x128xf32>
    %250 = vector.extract_strided_slice %247 {offsets = [0, 0], sizes = [8, 8], strides = [1, 1]} : vector<8x32xf32> to vector<8x8xf32>
    %251 = vector.extract_strided_slice %248 {offsets = [0, 0], sizes = [16, 8], strides = [1, 1]} : vector<16x32xf32> to vector<16x8xf32>
    %cst_67 = arith.constant dense<0.000000e+00> : vector<8x16xf32>
    %252 = tpu.matmul %250, %251, %cst_67 {dimension_numbers = #tpu.dot_dimension_numbers<[1], [1], [0], [0], [0, 0, 1, 0], [], []>} : vector<8x8xf32>, vector<16x8xf32>, vector<8x16xf32> -> vector<8x16xf32>
    %cst_68 = arith.constant dense<0xFF800000> : vector<8xf32>
    %253 = vector.multi_reduction <maximumf>, %252, %cst_68 [1] : vector<8x16xf32> to vector<8xf32>
    %254 = vector.shape_cast %253 : vector<8xf32> to vector<8x1xf32>
    %255 = vector.broadcast %254 : vector<8x1xf32> to vector<8x16xf32>
    %256 = arith.subf %252, %255 : vector<8x16xf32>
    %257 = math.exp %256 : vector<8x16xf32>
    %cst_69 = arith.constant dense<0.000000e+00> : vector<8xf32>
    %258 = vector.multi_reduction <add>, %257, %cst_69 [1] : vector<8x16xf32> to vector<8xf32>
    %259 = vector.shape_cast %258 : vector<8xf32> to vector<8x1xf32>
    %260 = vector.broadcast %259 : vector<8x1xf32> to vector<8x16xf32>
    %261 = arith.divf %257, %260 : vector<8x16xf32>
    %262 = vector.extract_strided_slice %249 {offsets = [0, 0], sizes = [16, 32], strides = [1, 1]} : vector<16x128xf32> to vector<16x32xf32>
    %cst_70 = arith.constant dense<0.000000e+00> : vector<8x32xf32>
    %263 = tpu.matmul %261, %262, %cst_70 {dimension_numbers = #tpu.dot_dimension_numbers<[1], [0], [0], [1], [0, 0, 1, 1], [], []>} : vector<8x16xf32>, vector<16x32xf32>, vector<8x32xf32> -> vector<8x32xf32>
    %264 = vector.extract_strided_slice %247 {offsets = [0, 8], sizes = [8, 8], strides = [1, 1]} : vector<8x32xf32> to vector<8x8xf32>
    %265 = vector.extract_strided_slice %248 {offsets = [0, 8], sizes = [16, 8], strides = [1, 1]} : vector<16x32xf32> to vector<16x8xf32>
    %cst_71 = arith.constant dense<0.000000e+00> : vector<8x16xf32>
    %266 = tpu.matmul %264, %265, %cst_71 {dimension_numbers = #tpu.dot_dimension_numbers<[1], [1], [0], [0], [0, 0, 1, 0], [], []>} : vector<8x8xf32>, vector<16x8xf32>, vector<8x16xf32> -> vector<8x16xf32>
    %cst_72 = arith.constant dense<0xFF800000> : vector<8xf32>
    %267 = vector.multi_reduction <maximumf>, %266, %cst_72 [1] : vector<8x16xf32> to vector<8xf32>
    %268 = vector.shape_cast %267 : vector<8xf32> to vector<8x1xf32>
    %269 = vector.broadcast %268 : vector<8x1xf32> to vector<8x16xf32>
    %270 = arith.subf %266, %269 : vector<8x16xf32>
    %271 = math.exp %270 : vector<8x16xf32>
    %cst_73 = arith.constant dense<0.000000e+00> : vector<8xf32>
    %272 = vector.multi_reduction <add>, %271, %cst_73 [1] : vector<8x16xf32> to vector<8xf32>
    %273 = vector.shape_cast %272 : vector<8xf32> to vector<8x1xf32>
    %274 = vector.broadcast %273 : vector<8x1xf32> to vector<8x16xf32>
    %275 = arith.divf %271, %274 : vector<8x16xf32>
    %276 = vector.extract_strided_slice %249 {offsets = [0, 32], sizes = [16, 32], strides = [1, 1]} : vector<16x128xf32> to vector<16x32xf32>
    %cst_74 = arith.constant dense<0.000000e+00> : vector<8x32xf32>
    %277 = tpu.matmul %275, %276, %cst_74 {dimension_numbers = #tpu.dot_dimension_numbers<[1], [0], [0], [1], [0, 0, 1, 1], [], []>} : vector<8x16xf32>, vector<16x32xf32>, vector<8x32xf32> -> vector<8x32xf32>
    %278 = arith.addf %263, %277 : vector<8x32xf32>
    %279 = vector.extract_strided_slice %247 {offsets = [0, 16], sizes = [8, 8], strides = [1, 1]} : vector<8x32xf32> to vector<8x8xf32>
    %280 = vector.extract_strided_slice %248 {offsets = [0, 16], sizes = [16, 8], strides = [1, 1]} : vector<16x32xf32> to vector<16x8xf32>
    %cst_75 = arith.constant dense<0.000000e+00> : vector<8x16xf32>
    %281 = tpu.matmul %279, %280, %cst_75 {dimension_numbers = #tpu.dot_dimension_numbers<[1], [1], [0], [0], [0, 0, 1, 0], [], []>} : vector<8x8xf32>, vector<16x8xf32>, vector<8x16xf32> -> vector<8x16xf32>
    %cst_76 = arith.constant dense<0xFF800000> : vector<8xf32>
    %282 = vector.multi_reduction <maximumf>, %281, %cst_76 [1] : vector<8x16xf32> to vector<8xf32>
    %283 = vector.shape_cast %282 : vector<8xf32> to vector<8x1xf32>
    %284 = vector.broadcast %283 : vector<8x1xf32> to vector<8x16xf32>
    %285 = arith.subf %281, %284 : vector<8x16xf32>
    %286 = math.exp %285 : vector<8x16xf32>
    %cst_77 = arith.constant dense<0.000000e+00> : vector<8xf32>
    %287 = vector.multi_reduction <add>, %286, %cst_77 [1] : vector<8x16xf32> to vector<8xf32>
    %288 = vector.shape_cast %287 : vector<8xf32> to vector<8x1xf32>
    %289 = vector.broadcast %288 : vector<8x1xf32> to vector<8x16xf32>
    %290 = arith.divf %286, %289 : vector<8x16xf32>
    %291 = vector.extract_strided_slice %249 {offsets = [0, 64], sizes = [16, 32], strides = [1, 1]} : vector<16x128xf32> to vector<16x32xf32>
    %cst_78 = arith.constant dense<0.000000e+00> : vector<8x32xf32>
    %292 = tpu.matmul %290, %291, %cst_78 {dimension_numbers = #tpu.dot_dimension_numbers<[1], [0], [0], [1], [0, 0, 1, 1], [], []>} : vector<8x16xf32>, vector<16x32xf32>, vector<8x32xf32> -> vector<8x32xf32>
    %293 = arith.addf %278, %292 : vector<8x32xf32>
    %294 = vector.extract_strided_slice %247 {offsets = [0, 24], sizes = [8, 8], strides = [1, 1]} : vector<8x32xf32> to vector<8x8xf32>
    %295 = vector.extract_strided_slice %248 {offsets = [0, 24], sizes = [16, 8], strides = [1, 1]} : vector<16x32xf32> to vector<16x8xf32>
    %cst_79 = arith.constant dense<0.000000e+00> : vector<8x16xf32>
    %296 = tpu.matmul %294, %295, %cst_79 {dimension_numbers = #tpu.dot_dimension_numbers<[1], [1], [0], [0], [0, 0, 1, 0], [], []>} : vector<8x8xf32>, vector<16x8xf32>, vector<8x16xf32> -> vector<8x16xf32>
    %cst_80 = arith.constant dense<0xFF800000> : vector<8xf32>
    %297 = vector.multi_reduction <maximumf>, %296, %cst_80 [1] : vector<8x16xf32> to vector<8xf32>
    %298 = vector.shape_cast %297 : vector<8xf32> to vector<8x1xf32>
    %299 = vector.broadcast %298 : vector<8x1xf32> to vector<8x16xf32>
    %300 = arith.subf %296, %299 : vector<8x16xf32>
    %301 = math.exp %300 : vector<8x16xf32>
    %cst_81 = arith.constant dense<0.000000e+00> : vector<8xf32>
    %302 = vector.multi_reduction <add>, %301, %cst_81 [1] : vector<8x16xf32> to vector<8xf32>
    %303 = vector.shape_cast %302 : vector<8xf32> to vector<8x1xf32>
    %304 = vector.broadcast %303 : vector<8x1xf32> to vector<8x16xf32>
    %305 = arith.divf %301, %304 : vector<8x16xf32>
    %306 = vector.extract_strided_slice %249 {offsets = [0, 96], sizes = [16, 32], strides = [1, 1]} : vector<16x128xf32> to vector<16x32xf32>
    %cst_82 = arith.constant dense<0.000000e+00> : vector<8x32xf32>
    %307 = tpu.matmul %305, %306, %cst_82 {dimension_numbers = #tpu.dot_dimension_numbers<[1], [0], [0], [1], [0, 0, 1, 1], [], []>} : vector<8x16xf32>, vector<16x32xf32>, vector<8x32xf32> -> vector<8x32xf32>
    %308 = arith.addf %293, %307 : vector<8x32xf32>
    %309 = tpu.concatenate %246, %308 in 0 : vector<8x32xf32>, vector<8x32xf32> -> vector<16x32xf32>
    %310 = vector.extract_strided_slice %8 {offsets = [1, 96], sizes = [1, 32], strides = [1, 1]} : vector<4x128xf32> to vector<1x32xf32>
    %311 = vector.broadcast %310 : vector<1x32xf32> to vector<16x32xf32>
    %312 = arith.addf %309, %311 : vector<16x32xf32>
    %313 = arith.addf %171, %312 : vector<16x32xf32>
    %314 = vector.extract_strided_slice %8 {offsets = [2, 64], sizes = [1, 32], strides = [1, 1]} : vector<4x128xf32> to vector<1x32xf32>
    %315 = vector.extract_strided_slice %8 {offsets = [3, 32], sizes = [1, 32], strides = [1, 1]} : vector<4x128xf32> to vector<1x32xf32>
    %cst_83 = arith.constant dense<0.000000e+00> : vector<16xf32>
    %316 = vector.multi_reduction <add>, %313, %cst_83 [1] : vector<16x32xf32> to vector<16xf32>
    %317 = vector.shape_cast %316 : vector<16xf32> to vector<16x1xf32>
    %cst_84 = arith.constant 3.200000e+01 : f32
    %318 = vector.broadcast %cst_84 : f32 to vector<16x1xf32>
    %319 = arith.divf %317, %318 : vector<16x1xf32>
    %320 = arith.mulf %313, %313 : vector<16x32xf32>
    %cst_85 = arith.constant dense<0.000000e+00> : vector<16xf32>
    %321 = vector.multi_reduction <add>, %320, %cst_85 [1] : vector<16x32xf32> to vector<16xf32>
    %322 = vector.shape_cast %321 : vector<16xf32> to vector<16x1xf32>
    %cst_86 = arith.constant 3.200000e+01 : f32
    %323 = vector.broadcast %cst_86 : f32 to vector<16x1xf32>
    %324 = arith.divf %322, %323 : vector<16x1xf32>
    %325 = arith.mulf %319, %319 : vector<16x1xf32>
    %326 = arith.subf %324, %325 : vector<16x1xf32>
    %327 = vector.broadcast %319 : vector<16x1xf32> to vector<16x32xf32>
    %328 = arith.subf %313, %327 : vector<16x32xf32>
    %cst_87 = arith.constant 9.99999974E-6 : f32
    %329 = vector.broadcast %cst_87 : f32 to vector<16x1xf32>
    %330 = arith.addf %326, %329 : vector<16x1xf32>
    %331 = math.rsqrt %330 : vector<16x1xf32>
    %332 = vector.broadcast %331 : vector<16x1xf32> to vector<16x32xf32>
    %333 = arith.mulf %328, %332 : vector<16x32xf32>
    %334 = vector.broadcast %314 : vector<1x32xf32> to vector<16x32xf32>
    %335 = arith.mulf %333, %334 : vector<16x32xf32>
    %336 = vector.broadcast %315 : vector<1x32xf32> to vector<16x32xf32>
    %337 = arith.addf %335, %336 : vector<16x32xf32>
    %338 = vector.extract_strided_slice %6 {offsets = [0, 384], sizes = [32, 64], strides = [1, 1]} : vector<32x512xf32> to vector<32x64xf32>
    %cst_88 = arith.constant dense<0.000000e+00> : vector<16x64xf32>
    %339 = tpu.matmul %337, %338, %cst_88 {dimension_numbers = #tpu.dot_dimension_numbers<[1], [0], [0], [1], [0, 0, 1, 1], [], []>} : vector<16x32xf32>, vector<32x64xf32>, vector<16x64xf32> -> vector<16x64xf32>
    %340 = vector.extract_strided_slice %8 {offsets = [1, 0], sizes = [1, 64], strides = [1, 1]} : vector<4x128xf32> to vector<1x64xf32>
    %341 = vector.broadcast %340 : vector<1x64xf32> to vector<16x64xf32>
    %342 = arith.addf %339, %341 : vector<16x64xf32>
    %cst_89 = arith.constant 0.000000e+00 : f32
    %343 = vector.broadcast %cst_89 : f32 to vector<16x64xf32>
    %344 = arith.maximumf %342, %343 : vector<16x64xf32>
    %345 = vector.extract_strided_slice %6 {offsets = [0, 448], sizes = [32, 64], strides = [1, 1]} : vector<32x512xf32> to vector<32x64xf32>
    %cst_90 = arith.constant dense<0.000000e+00> : vector<16x32xf32>
    %346 = tpu.matmul %344, %345, %cst_90 {dimension_numbers = #tpu.dot_dimension_numbers<[1], [1], [0], [0], [0, 0, 1, 0], [], []>} : vector<16x64xf32>, vector<32x64xf32>, vector<16x32xf32> -> vector<16x32xf32>
    %347 = vector.extract_strided_slice %8 {offsets = [2, 0], sizes = [1, 32], strides = [1, 1]} : vector<4x128xf32> to vector<1x32xf32>
    %348 = vector.broadcast %347 : vector<1x32xf32> to vector<16x32xf32>
    %349 = arith.addf %346, %348 : vector<16x32xf32>
    %350 = arith.addf %337, %349 : vector<16x32xf32>
    %351 = vector.extract_strided_slice %8 {offsets = [2, 96], sizes = [1, 32], strides = [1, 1]} : vector<4x128xf32> to vector<1x32xf32>
    %352 = vector.extract_strided_slice %8 {offsets = [3, 64], sizes = [1, 32], strides = [1, 1]} : vector<4x128xf32> to vector<1x32xf32>
    %cst_91 = arith.constant dense<0.000000e+00> : vector<16xf32>
    %353 = vector.multi_reduction <add>, %350, %cst_91 [1] : vector<16x32xf32> to vector<16xf32>
    %354 = vector.shape_cast %353 : vector<16xf32> to vector<16x1xf32>
    %cst_92 = arith.constant 3.200000e+01 : f32
    %355 = vector.broadcast %cst_92 : f32 to vector<16x1xf32>
    %356 = arith.divf %354, %355 : vector<16x1xf32>
    %357 = arith.mulf %350, %350 : vector<16x32xf32>
    %cst_93 = arith.constant dense<0.000000e+00> : vector<16xf32>
    %358 = vector.multi_reduction <add>, %357, %cst_93 [1] : vector<16x32xf32> to vector<16xf32>
    %359 = vector.shape_cast %358 : vector<16xf32> to vector<16x1xf32>
    %cst_94 = arith.constant 3.200000e+01 : f32
    %360 = vector.broadcast %cst_94 : f32 to vector<16x1xf32>
    %361 = arith.divf %359, %360 : vector<16x1xf32>
    %362 = arith.mulf %356, %356 : vector<16x1xf32>
    %363 = arith.subf %361, %362 : vector<16x1xf32>
    %364 = vector.broadcast %356 : vector<16x1xf32> to vector<16x32xf32>
    %365 = arith.subf %350, %364 : vector<16x32xf32>
    %cst_95 = arith.constant 9.99999974E-6 : f32
    %366 = vector.broadcast %cst_95 : f32 to vector<16x1xf32>
    %367 = arith.addf %363, %366 : vector<16x1xf32>
    %368 = math.rsqrt %367 : vector<16x1xf32>
    %369 = vector.broadcast %368 : vector<16x1xf32> to vector<16x32xf32>
    %370 = arith.mulf %365, %369 : vector<16x32xf32>
    %371 = vector.broadcast %351 : vector<1x32xf32> to vector<16x32xf32>
    %372 = arith.mulf %370, %371 : vector<16x32xf32>
    %373 = vector.broadcast %352 : vector<1x32xf32> to vector<16x32xf32>
    %374 = arith.addf %372, %373 : vector<16x32xf32>
    %c1 = arith.constant 1 : index
    %c0_96 = arith.constant 0 : index
    %c0_97 = arith.constant 0 : index
    %375 = vector.load %arg1[%c1, %c0_96, %c0_97] : memref<2x32x512xf32, #tpu.memory_space<vmem>>, vector<1x32x512xf32>
    %376 = vector.shape_cast %375 : vector<1x32x512xf32> to vector<32x512xf32>
    %c1_98 = arith.constant 1 : index
    %c0_99 = arith.constant 0 : index
    %c0_100 = arith.constant 0 : index
    %377 = vector.load %arg2[%c1_98, %c0_99, %c0_100] : memref<3x4x128xf32, #tpu.memory_space<vmem>>, vector<1x4x128xf32>
    %378 = vector.shape_cast %377 : vector<1x4x128xf32> to vector<4x128xf32>
    %379 = arith.addf %374, %1 : vector<16x32xf32>
    %380 = vector.extract_strided_slice %376 {offsets = [0, 256], sizes = [32, 64], strides = [1, 1]} : vector<32x512xf32> to vector<32x64xf32>
    %cst_101 = arith.constant dense<0.000000e+00> : vector<16x64xf32>
    %381 = tpu.matmul %379, %380, %cst_101 {dimension_numbers = #tpu.dot_dimension_numbers<[1], [0], [0], [1], [0, 0, 1, 1], [], []>} : vector<16x32xf32>, vector<32x64xf32>, vector<16x64xf32> -> vector<16x64xf32>
    %382 = vector.extract_strided_slice %378 {offsets = [0, 0], sizes = [1, 64], strides = [1, 1]} : vector<4x128xf32> to vector<1x64xf32>
    %383 = vector.broadcast %382 : vector<1x64xf32> to vector<16x64xf32>
    %384 = arith.addf %381, %383 : vector<16x64xf32>
    %385 = vector.extract_strided_slice %376 {offsets = [0, 0], sizes = [32, 128], strides = [1, 1]} : vector<32x512xf32> to vector<32x128xf32>
    %cst_102 = arith.constant dense<0.000000e+00> : vector<16x128xf32>
    %386 = tpu.matmul %374, %385, %cst_102 {dimension_numbers = #tpu.dot_dimension_numbers<[1], [0], [0], [1], [0, 0, 1, 1], [], []>} : vector<16x32xf32>, vector<32x128xf32>, vector<16x128xf32> -> vector<16x128xf32>
    %387 = vector.extract_strided_slice %384 {offsets = [0, 0], sizes = [16, 32], strides = [1, 1]} : vector<16x64xf32> to vector<16x32xf32>
    %388 = vector.extract_strided_slice %384 {offsets = [0, 32], sizes = [16, 32], strides = [1, 1]} : vector<16x64xf32> to vector<16x32xf32>
    %389 = vector.extract_strided_slice %387 {offsets = [0, 0], sizes = [8, 32], strides = [1, 1]} : vector<16x32xf32> to vector<8x32xf32>
    %390 = vector.extract_strided_slice %388 {offsets = [0, 0], sizes = [8, 32], strides = [1, 1]} : vector<16x32xf32> to vector<8x32xf32>
    %391 = vector.extract_strided_slice %386 {offsets = [0, 0], sizes = [8, 128], strides = [1, 1]} : vector<16x128xf32> to vector<8x128xf32>
    %392 = vector.extract_strided_slice %389 {offsets = [0, 0], sizes = [8, 8], strides = [1, 1]} : vector<8x32xf32> to vector<8x8xf32>
    %393 = vector.extract_strided_slice %390 {offsets = [0, 0], sizes = [8, 8], strides = [1, 1]} : vector<8x32xf32> to vector<8x8xf32>
    %cst_103 = arith.constant dense<0.000000e+00> : vector<8x8xf32>
    %394 = tpu.matmul %392, %393, %cst_103 {dimension_numbers = #tpu.dot_dimension_numbers<[1], [1], [0], [0], [0, 0, 1, 0], [], []>} : vector<8x8xf32>, vector<8x8xf32>, vector<8x8xf32> -> vector<8x8xf32>
    %cst_104 = arith.constant dense<0xFF800000> : vector<8xf32>
    %395 = vector.multi_reduction <maximumf>, %394, %cst_104 [1] : vector<8x8xf32> to vector<8xf32>
    %396 = vector.shape_cast %395 : vector<8xf32> to vector<8x1xf32>
    %397 = vector.broadcast %396 : vector<8x1xf32> to vector<8x8xf32>
    %398 = arith.subf %394, %397 : vector<8x8xf32>
    %399 = math.exp %398 : vector<8x8xf32>
    %cst_105 = arith.constant dense<0.000000e+00> : vector<8xf32>
    %400 = vector.multi_reduction <add>, %399, %cst_105 [1] : vector<8x8xf32> to vector<8xf32>
    %401 = vector.shape_cast %400 : vector<8xf32> to vector<8x1xf32>
    %402 = vector.broadcast %401 : vector<8x1xf32> to vector<8x8xf32>
    %403 = arith.divf %399, %402 : vector<8x8xf32>
    %404 = vector.extract_strided_slice %391 {offsets = [0, 0], sizes = [8, 32], strides = [1, 1]} : vector<8x128xf32> to vector<8x32xf32>
    %cst_106 = arith.constant dense<0.000000e+00> : vector<8x32xf32>
    %405 = tpu.matmul %403, %404, %cst_106 {dimension_numbers = #tpu.dot_dimension_numbers<[1], [0], [0], [1], [0, 0, 1, 1], [], []>} : vector<8x8xf32>, vector<8x32xf32>, vector<8x32xf32> -> vector<8x32xf32>
    %406 = vector.extract_strided_slice %389 {offsets = [0, 8], sizes = [8, 8], strides = [1, 1]} : vector<8x32xf32> to vector<8x8xf32>
    %407 = vector.extract_strided_slice %390 {offsets = [0, 8], sizes = [8, 8], strides = [1, 1]} : vector<8x32xf32> to vector<8x8xf32>
    %cst_107 = arith.constant dense<0.000000e+00> : vector<8x8xf32>
    %408 = tpu.matmul %406, %407, %cst_107 {dimension_numbers = #tpu.dot_dimension_numbers<[1], [1], [0], [0], [0, 0, 1, 0], [], []>} : vector<8x8xf32>, vector<8x8xf32>, vector<8x8xf32> -> vector<8x8xf32>
    %cst_108 = arith.constant dense<0xFF800000> : vector<8xf32>
    %409 = vector.multi_reduction <maximumf>, %408, %cst_108 [1] : vector<8x8xf32> to vector<8xf32>
    %410 = vector.shape_cast %409 : vector<8xf32> to vector<8x1xf32>
    %411 = vector.broadcast %410 : vector<8x1xf32> to vector<8x8xf32>
    %412 = arith.subf %408, %411 : vector<8x8xf32>
    %413 = math.exp %412 : vector<8x8xf32>
    %cst_109 = arith.constant dense<0.000000e+00> : vector<8xf32>
    %414 = vector.multi_reduction <add>, %413, %cst_109 [1] : vector<8x8xf32> to vector<8xf32>
    %415 = vector.shape_cast %414 : vector<8xf32> to vector<8x1xf32>
    %416 = vector.broadcast %415 : vector<8x1xf32> to vector<8x8xf32>
    %417 = arith.divf %413, %416 : vector<8x8xf32>
    %418 = vector.extract_strided_slice %391 {offsets = [0, 32], sizes = [8, 32], strides = [1, 1]} : vector<8x128xf32> to vector<8x32xf32>
    %cst_110 = arith.constant dense<0.000000e+00> : vector<8x32xf32>
    %419 = tpu.matmul %417, %418, %cst_110 {dimension_numbers = #tpu.dot_dimension_numbers<[1], [0], [0], [1], [0, 0, 1, 1], [], []>} : vector<8x8xf32>, vector<8x32xf32>, vector<8x32xf32> -> vector<8x32xf32>
    %420 = arith.addf %405, %419 : vector<8x32xf32>
    %421 = vector.extract_strided_slice %389 {offsets = [0, 16], sizes = [8, 8], strides = [1, 1]} : vector<8x32xf32> to vector<8x8xf32>
    %422 = vector.extract_strided_slice %390 {offsets = [0, 16], sizes = [8, 8], strides = [1, 1]} : vector<8x32xf32> to vector<8x8xf32>
    %cst_111 = arith.constant dense<0.000000e+00> : vector<8x8xf32>
    %423 = tpu.matmul %421, %422, %cst_111 {dimension_numbers = #tpu.dot_dimension_numbers<[1], [1], [0], [0], [0, 0, 1, 0], [], []>} : vector<8x8xf32>, vector<8x8xf32>, vector<8x8xf32> -> vector<8x8xf32>
    %cst_112 = arith.constant dense<0xFF800000> : vector<8xf32>
    %424 = vector.multi_reduction <maximumf>, %423, %cst_112 [1] : vector<8x8xf32> to vector<8xf32>
    %425 = vector.shape_cast %424 : vector<8xf32> to vector<8x1xf32>
    %426 = vector.broadcast %425 : vector<8x1xf32> to vector<8x8xf32>
    %427 = arith.subf %423, %426 : vector<8x8xf32>
    %428 = math.exp %427 : vector<8x8xf32>
    %cst_113 = arith.constant dense<0.000000e+00> : vector<8xf32>
    %429 = vector.multi_reduction <add>, %428, %cst_113 [1] : vector<8x8xf32> to vector<8xf32>
    %430 = vector.shape_cast %429 : vector<8xf32> to vector<8x1xf32>
    %431 = vector.broadcast %430 : vector<8x1xf32> to vector<8x8xf32>
    %432 = arith.divf %428, %431 : vector<8x8xf32>
    %433 = vector.extract_strided_slice %391 {offsets = [0, 64], sizes = [8, 32], strides = [1, 1]} : vector<8x128xf32> to vector<8x32xf32>
    %cst_114 = arith.constant dense<0.000000e+00> : vector<8x32xf32>
    %434 = tpu.matmul %432, %433, %cst_114 {dimension_numbers = #tpu.dot_dimension_numbers<[1], [0], [0], [1], [0, 0, 1, 1], [], []>} : vector<8x8xf32>, vector<8x32xf32>, vector<8x32xf32> -> vector<8x32xf32>
    %435 = arith.addf %420, %434 : vector<8x32xf32>
    %436 = vector.extract_strided_slice %389 {offsets = [0, 24], sizes = [8, 8], strides = [1, 1]} : vector<8x32xf32> to vector<8x8xf32>
    %437 = vector.extract_strided_slice %390 {offsets = [0, 24], sizes = [8, 8], strides = [1, 1]} : vector<8x32xf32> to vector<8x8xf32>
    %cst_115 = arith.constant dense<0.000000e+00> : vector<8x8xf32>
    %438 = tpu.matmul %436, %437, %cst_115 {dimension_numbers = #tpu.dot_dimension_numbers<[1], [1], [0], [0], [0, 0, 1, 0], [], []>} : vector<8x8xf32>, vector<8x8xf32>, vector<8x8xf32> -> vector<8x8xf32>
    %cst_116 = arith.constant dense<0xFF800000> : vector<8xf32>
    %439 = vector.multi_reduction <maximumf>, %438, %cst_116 [1] : vector<8x8xf32> to vector<8xf32>
    %440 = vector.shape_cast %439 : vector<8xf32> to vector<8x1xf32>
    %441 = vector.broadcast %440 : vector<8x1xf32> to vector<8x8xf32>
    %442 = arith.subf %438, %441 : vector<8x8xf32>
    %443 = math.exp %442 : vector<8x8xf32>
    %cst_117 = arith.constant dense<0.000000e+00> : vector<8xf32>
    %444 = vector.multi_reduction <add>, %443, %cst_117 [1] : vector<8x8xf32> to vector<8xf32>
    %445 = vector.shape_cast %444 : vector<8xf32> to vector<8x1xf32>
    %446 = vector.broadcast %445 : vector<8x1xf32> to vector<8x8xf32>
    %447 = arith.divf %443, %446 : vector<8x8xf32>
    %448 = vector.extract_strided_slice %391 {offsets = [0, 96], sizes = [8, 32], strides = [1, 1]} : vector<8x128xf32> to vector<8x32xf32>
    %cst_118 = arith.constant dense<0.000000e+00> : vector<8x32xf32>
    %449 = tpu.matmul %447, %448, %cst_118 {dimension_numbers = #tpu.dot_dimension_numbers<[1], [0], [0], [1], [0, 0, 1, 1], [], []>} : vector<8x8xf32>, vector<8x32xf32>, vector<8x32xf32> -> vector<8x32xf32>
    %450 = arith.addf %435, %449 : vector<8x32xf32>
    %451 = vector.extract_strided_slice %387 {offsets = [8, 0], sizes = [8, 32], strides = [1, 1]} : vector<16x32xf32> to vector<8x32xf32>
    %452 = vector.extract_strided_slice %388 {offsets = [8, 0], sizes = [8, 32], strides = [1, 1]} : vector<16x32xf32> to vector<8x32xf32>
    %453 = vector.extract_strided_slice %386 {offsets = [8, 0], sizes = [8, 128], strides = [1, 1]} : vector<16x128xf32> to vector<8x128xf32>
    %454 = vector.extract_strided_slice %451 {offsets = [0, 0], sizes = [8, 8], strides = [1, 1]} : vector<8x32xf32> to vector<8x8xf32>
    %455 = vector.extract_strided_slice %452 {offsets = [0, 0], sizes = [8, 8], strides = [1, 1]} : vector<8x32xf32> to vector<8x8xf32>
    %cst_119 = arith.constant dense<0.000000e+00> : vector<8x8xf32>
    %456 = tpu.matmul %454, %455, %cst_119 {dimension_numbers = #tpu.dot_dimension_numbers<[1], [1], [0], [0], [0, 0, 1, 0], [], []>} : vector<8x8xf32>, vector<8x8xf32>, vector<8x8xf32> -> vector<8x8xf32>
    %cst_120 = arith.constant dense<0xFF800000> : vector<8xf32>
    %457 = vector.multi_reduction <maximumf>, %456, %cst_120 [1] : vector<8x8xf32> to vector<8xf32>
    %458 = vector.shape_cast %457 : vector<8xf32> to vector<8x1xf32>
    %459 = vector.broadcast %458 : vector<8x1xf32> to vector<8x8xf32>
    %460 = arith.subf %456, %459 : vector<8x8xf32>
    %461 = math.exp %460 : vector<8x8xf32>
    %cst_121 = arith.constant dense<0.000000e+00> : vector<8xf32>
    %462 = vector.multi_reduction <add>, %461, %cst_121 [1] : vector<8x8xf32> to vector<8xf32>
    %463 = vector.shape_cast %462 : vector<8xf32> to vector<8x1xf32>
    %464 = vector.broadcast %463 : vector<8x1xf32> to vector<8x8xf32>
    %465 = arith.divf %461, %464 : vector<8x8xf32>
    %466 = vector.extract_strided_slice %453 {offsets = [0, 0], sizes = [8, 32], strides = [1, 1]} : vector<8x128xf32> to vector<8x32xf32>
    %cst_122 = arith.constant dense<0.000000e+00> : vector<8x32xf32>
    %467 = tpu.matmul %465, %466, %cst_122 {dimension_numbers = #tpu.dot_dimension_numbers<[1], [0], [0], [1], [0, 0, 1, 1], [], []>} : vector<8x8xf32>, vector<8x32xf32>, vector<8x32xf32> -> vector<8x32xf32>
    %468 = vector.extract_strided_slice %451 {offsets = [0, 8], sizes = [8, 8], strides = [1, 1]} : vector<8x32xf32> to vector<8x8xf32>
    %469 = vector.extract_strided_slice %452 {offsets = [0, 8], sizes = [8, 8], strides = [1, 1]} : vector<8x32xf32> to vector<8x8xf32>
    %cst_123 = arith.constant dense<0.000000e+00> : vector<8x8xf32>
    %470 = tpu.matmul %468, %469, %cst_123 {dimension_numbers = #tpu.dot_dimension_numbers<[1], [1], [0], [0], [0, 0, 1, 0], [], []>} : vector<8x8xf32>, vector<8x8xf32>, vector<8x8xf32> -> vector<8x8xf32>
    %cst_124 = arith.constant dense<0xFF800000> : vector<8xf32>
    %471 = vector.multi_reduction <maximumf>, %470, %cst_124 [1] : vector<8x8xf32> to vector<8xf32>
    %472 = vector.shape_cast %471 : vector<8xf32> to vector<8x1xf32>
    %473 = vector.broadcast %472 : vector<8x1xf32> to vector<8x8xf32>
    %474 = arith.subf %470, %473 : vector<8x8xf32>
    %475 = math.exp %474 : vector<8x8xf32>
    %cst_125 = arith.constant dense<0.000000e+00> : vector<8xf32>
    %476 = vector.multi_reduction <add>, %475, %cst_125 [1] : vector<8x8xf32> to vector<8xf32>
    %477 = vector.shape_cast %476 : vector<8xf32> to vector<8x1xf32>
    %478 = vector.broadcast %477 : vector<8x1xf32> to vector<8x8xf32>
    %479 = arith.divf %475, %478 : vector<8x8xf32>
    %480 = vector.extract_strided_slice %453 {offsets = [0, 32], sizes = [8, 32], strides = [1, 1]} : vector<8x128xf32> to vector<8x32xf32>
    %cst_126 = arith.constant dense<0.000000e+00> : vector<8x32xf32>
    %481 = tpu.matmul %479, %480, %cst_126 {dimension_numbers = #tpu.dot_dimension_numbers<[1], [0], [0], [1], [0, 0, 1, 1], [], []>} : vector<8x8xf32>, vector<8x32xf32>, vector<8x32xf32> -> vector<8x32xf32>
    %482 = arith.addf %467, %481 : vector<8x32xf32>
    %483 = vector.extract_strided_slice %451 {offsets = [0, 16], sizes = [8, 8], strides = [1, 1]} : vector<8x32xf32> to vector<8x8xf32>
    %484 = vector.extract_strided_slice %452 {offsets = [0, 16], sizes = [8, 8], strides = [1, 1]} : vector<8x32xf32> to vector<8x8xf32>
    %cst_127 = arith.constant dense<0.000000e+00> : vector<8x8xf32>
    %485 = tpu.matmul %483, %484, %cst_127 {dimension_numbers = #tpu.dot_dimension_numbers<[1], [1], [0], [0], [0, 0, 1, 0], [], []>} : vector<8x8xf32>, vector<8x8xf32>, vector<8x8xf32> -> vector<8x8xf32>
    %cst_128 = arith.constant dense<0xFF800000> : vector<8xf32>
    %486 = vector.multi_reduction <maximumf>, %485, %cst_128 [1] : vector<8x8xf32> to vector<8xf32>
    %487 = vector.shape_cast %486 : vector<8xf32> to vector<8x1xf32>
    %488 = vector.broadcast %487 : vector<8x1xf32> to vector<8x8xf32>
    %489 = arith.subf %485, %488 : vector<8x8xf32>
    %490 = math.exp %489 : vector<8x8xf32>
    %cst_129 = arith.constant dense<0.000000e+00> : vector<8xf32>
    %491 = vector.multi_reduction <add>, %490, %cst_129 [1] : vector<8x8xf32> to vector<8xf32>
    %492 = vector.shape_cast %491 : vector<8xf32> to vector<8x1xf32>
    %493 = vector.broadcast %492 : vector<8x1xf32> to vector<8x8xf32>
    %494 = arith.divf %490, %493 : vector<8x8xf32>
    %495 = vector.extract_strided_slice %453 {offsets = [0, 64], sizes = [8, 32], strides = [1, 1]} : vector<8x128xf32> to vector<8x32xf32>
    %cst_130 = arith.constant dense<0.000000e+00> : vector<8x32xf32>
    %496 = tpu.matmul %494, %495, %cst_130 {dimension_numbers = #tpu.dot_dimension_numbers<[1], [0], [0], [1], [0, 0, 1, 1], [], []>} : vector<8x8xf32>, vector<8x32xf32>, vector<8x32xf32> -> vector<8x32xf32>
    %497 = arith.addf %482, %496 : vector<8x32xf32>
    %498 = vector.extract_strided_slice %451 {offsets = [0, 24], sizes = [8, 8], strides = [1, 1]} : vector<8x32xf32> to vector<8x8xf32>
    %499 = vector.extract_strided_slice %452 {offsets = [0, 24], sizes = [8, 8], strides = [1, 1]} : vector<8x32xf32> to vector<8x8xf32>
    %cst_131 = arith.constant dense<0.000000e+00> : vector<8x8xf32>
    %500 = tpu.matmul %498, %499, %cst_131 {dimension_numbers = #tpu.dot_dimension_numbers<[1], [1], [0], [0], [0, 0, 1, 0], [], []>} : vector<8x8xf32>, vector<8x8xf32>, vector<8x8xf32> -> vector<8x8xf32>
    %cst_132 = arith.constant dense<0xFF800000> : vector<8xf32>
    %501 = vector.multi_reduction <maximumf>, %500, %cst_132 [1] : vector<8x8xf32> to vector<8xf32>
    %502 = vector.shape_cast %501 : vector<8xf32> to vector<8x1xf32>
    %503 = vector.broadcast %502 : vector<8x1xf32> to vector<8x8xf32>
    %504 = arith.subf %500, %503 : vector<8x8xf32>
    %505 = math.exp %504 : vector<8x8xf32>
    %cst_133 = arith.constant dense<0.000000e+00> : vector<8xf32>
    %506 = vector.multi_reduction <add>, %505, %cst_133 [1] : vector<8x8xf32> to vector<8xf32>
    %507 = vector.shape_cast %506 : vector<8xf32> to vector<8x1xf32>
    %508 = vector.broadcast %507 : vector<8x1xf32> to vector<8x8xf32>
    %509 = arith.divf %505, %508 : vector<8x8xf32>
    %510 = vector.extract_strided_slice %453 {offsets = [0, 96], sizes = [8, 32], strides = [1, 1]} : vector<8x128xf32> to vector<8x32xf32>
    %cst_134 = arith.constant dense<0.000000e+00> : vector<8x32xf32>
    %511 = tpu.matmul %509, %510, %cst_134 {dimension_numbers = #tpu.dot_dimension_numbers<[1], [0], [0], [1], [0, 0, 1, 1], [], []>} : vector<8x8xf32>, vector<8x32xf32>, vector<8x32xf32> -> vector<8x32xf32>
    %512 = arith.addf %497, %511 : vector<8x32xf32>
    %513 = tpu.concatenate %450, %512 in 0 : vector<8x32xf32>, vector<8x32xf32> -> vector<16x32xf32>
    %514 = vector.extract_strided_slice %378 {offsets = [1, 64], sizes = [1, 32], strides = [1, 1]} : vector<4x128xf32> to vector<1x32xf32>
    %515 = vector.broadcast %514 : vector<1x32xf32> to vector<16x32xf32>
    %516 = arith.addf %513, %515 : vector<16x32xf32>
    %517 = arith.addf %374, %516 : vector<16x32xf32>
    %518 = vector.extract_strided_slice %378 {offsets = [2, 32], sizes = [1, 32], strides = [1, 1]} : vector<4x128xf32> to vector<1x32xf32>
    %519 = vector.extract_strided_slice %378 {offsets = [3, 0], sizes = [1, 32], strides = [1, 1]} : vector<4x128xf32> to vector<1x32xf32>
    %cst_135 = arith.constant dense<0.000000e+00> : vector<16xf32>
    %520 = vector.multi_reduction <add>, %517, %cst_135 [1] : vector<16x32xf32> to vector<16xf32>
    %521 = vector.shape_cast %520 : vector<16xf32> to vector<16x1xf32>
    %cst_136 = arith.constant 3.200000e+01 : f32
    %522 = vector.broadcast %cst_136 : f32 to vector<16x1xf32>
    %523 = arith.divf %521, %522 : vector<16x1xf32>
    %524 = arith.mulf %517, %517 : vector<16x32xf32>
    %cst_137 = arith.constant dense<0.000000e+00> : vector<16xf32>
    %525 = vector.multi_reduction <add>, %524, %cst_137 [1] : vector<16x32xf32> to vector<16xf32>
    %526 = vector.shape_cast %525 : vector<16xf32> to vector<16x1xf32>
    %cst_138 = arith.constant 3.200000e+01 : f32
    %527 = vector.broadcast %cst_138 : f32 to vector<16x1xf32>
    %528 = arith.divf %526, %527 : vector<16x1xf32>
    %529 = arith.mulf %523, %523 : vector<16x1xf32>
    %530 = arith.subf %528, %529 : vector<16x1xf32>
    %531 = vector.broadcast %523 : vector<16x1xf32> to vector<16x32xf32>
    %532 = arith.subf %517, %531 : vector<16x32xf32>
    %cst_139 = arith.constant 9.99999974E-6 : f32
    %533 = vector.broadcast %cst_139 : f32 to vector<16x1xf32>
    %534 = arith.addf %530, %533 : vector<16x1xf32>
    %535 = math.rsqrt %534 : vector<16x1xf32>
    %536 = vector.broadcast %535 : vector<16x1xf32> to vector<16x32xf32>
    %537 = arith.mulf %532, %536 : vector<16x32xf32>
    %538 = vector.broadcast %518 : vector<1x32xf32> to vector<16x32xf32>
    %539 = arith.mulf %537, %538 : vector<16x32xf32>
    %540 = vector.broadcast %519 : vector<1x32xf32> to vector<16x32xf32>
    %541 = arith.addf %539, %540 : vector<16x32xf32>
    %542 = arith.addf %541, %1 : vector<16x32xf32>
    %543 = vector.extract_strided_slice %376 {offsets = [0, 320], sizes = [32, 32], strides = [1, 1]} : vector<32x512xf32> to vector<32x32xf32>
    %cst_140 = arith.constant dense<0.000000e+00> : vector<16x32xf32>
    %544 = tpu.matmul %542, %543, %cst_140 {dimension_numbers = #tpu.dot_dimension_numbers<[1], [0], [0], [1], [0, 0, 1, 1], [], []>} : vector<16x32xf32>, vector<32x32xf32>, vector<16x32xf32> -> vector<16x32xf32>
    %545 = vector.extract_strided_slice %378 {offsets = [0, 64], sizes = [1, 32], strides = [1, 1]} : vector<4x128xf32> to vector<1x32xf32>
    %546 = vector.broadcast %545 : vector<1x32xf32> to vector<16x32xf32>
    %547 = arith.addf %544, %546 : vector<16x32xf32>
    %548 = vector.extract_strided_slice %376 {offsets = [0, 352], sizes = [32, 32], strides = [1, 1]} : vector<32x512xf32> to vector<32x32xf32>
    %cst_141 = arith.constant dense<0.000000e+00> : vector<32x32xf32>
    %549 = tpu.matmul %4, %548, %cst_141 {dimension_numbers = #tpu.dot_dimension_numbers<[1], [0], [0], [1], [0, 0, 1, 1], [], []>} : vector<32x32xf32>, vector<32x32xf32>, vector<32x32xf32> -> vector<32x32xf32>
    %550 = vector.extract_strided_slice %378 {offsets = [0, 96], sizes = [1, 32], strides = [1, 1]} : vector<4x128xf32> to vector<1x32xf32>
    %551 = vector.broadcast %550 : vector<1x32xf32> to vector<32x32xf32>
    %552 = arith.addf %549, %551 : vector<32x32xf32>
    %553 = vector.extract_strided_slice %376 {offsets = [0, 128], sizes = [32, 128], strides = [1, 1]} : vector<32x512xf32> to vector<32x128xf32>
    %cst_142 = arith.constant dense<0.000000e+00> : vector<32x128xf32>
    %554 = tpu.matmul %2, %553, %cst_142 {dimension_numbers = #tpu.dot_dimension_numbers<[1], [0], [0], [1], [0, 0, 1, 1], [], []>} : vector<32x32xf32>, vector<32x128xf32>, vector<32x128xf32> -> vector<32x128xf32>
    %555 = vector.extract_strided_slice %547 {offsets = [0, 0], sizes = [8, 32], strides = [1, 1]} : vector<16x32xf32> to vector<8x32xf32>
    %556 = vector.extract_strided_slice %552 {offsets = [0, 0], sizes = [16, 32], strides = [1, 1]} : vector<32x32xf32> to vector<16x32xf32>
    %557 = vector.extract_strided_slice %554 {offsets = [0, 0], sizes = [16, 128], strides = [1, 1]} : vector<32x128xf32> to vector<16x128xf32>
    %558 = vector.extract_strided_slice %555 {offsets = [0, 0], sizes = [8, 8], strides = [1, 1]} : vector<8x32xf32> to vector<8x8xf32>
    %559 = vector.extract_strided_slice %556 {offsets = [0, 0], sizes = [16, 8], strides = [1, 1]} : vector<16x32xf32> to vector<16x8xf32>
    %cst_143 = arith.constant dense<0.000000e+00> : vector<8x16xf32>
    %560 = tpu.matmul %558, %559, %cst_143 {dimension_numbers = #tpu.dot_dimension_numbers<[1], [1], [0], [0], [0, 0, 1, 0], [], []>} : vector<8x8xf32>, vector<16x8xf32>, vector<8x16xf32> -> vector<8x16xf32>
    %cst_144 = arith.constant dense<0xFF800000> : vector<8xf32>
    %561 = vector.multi_reduction <maximumf>, %560, %cst_144 [1] : vector<8x16xf32> to vector<8xf32>
    %562 = vector.shape_cast %561 : vector<8xf32> to vector<8x1xf32>
    %563 = vector.broadcast %562 : vector<8x1xf32> to vector<8x16xf32>
    %564 = arith.subf %560, %563 : vector<8x16xf32>
    %565 = math.exp %564 : vector<8x16xf32>
    %cst_145 = arith.constant dense<0.000000e+00> : vector<8xf32>
    %566 = vector.multi_reduction <add>, %565, %cst_145 [1] : vector<8x16xf32> to vector<8xf32>
    %567 = vector.shape_cast %566 : vector<8xf32> to vector<8x1xf32>
    %568 = vector.broadcast %567 : vector<8x1xf32> to vector<8x16xf32>
    %569 = arith.divf %565, %568 : vector<8x16xf32>
    %570 = vector.extract_strided_slice %557 {offsets = [0, 0], sizes = [16, 32], strides = [1, 1]} : vector<16x128xf32> to vector<16x32xf32>
    %cst_146 = arith.constant dense<0.000000e+00> : vector<8x32xf32>
    %571 = tpu.matmul %569, %570, %cst_146 {dimension_numbers = #tpu.dot_dimension_numbers<[1], [0], [0], [1], [0, 0, 1, 1], [], []>} : vector<8x16xf32>, vector<16x32xf32>, vector<8x32xf32> -> vector<8x32xf32>
    %572 = vector.extract_strided_slice %555 {offsets = [0, 8], sizes = [8, 8], strides = [1, 1]} : vector<8x32xf32> to vector<8x8xf32>
    %573 = vector.extract_strided_slice %556 {offsets = [0, 8], sizes = [16, 8], strides = [1, 1]} : vector<16x32xf32> to vector<16x8xf32>
    %cst_147 = arith.constant dense<0.000000e+00> : vector<8x16xf32>
    %574 = tpu.matmul %572, %573, %cst_147 {dimension_numbers = #tpu.dot_dimension_numbers<[1], [1], [0], [0], [0, 0, 1, 0], [], []>} : vector<8x8xf32>, vector<16x8xf32>, vector<8x16xf32> -> vector<8x16xf32>
    %cst_148 = arith.constant dense<0xFF800000> : vector<8xf32>
    %575 = vector.multi_reduction <maximumf>, %574, %cst_148 [1] : vector<8x16xf32> to vector<8xf32>
    %576 = vector.shape_cast %575 : vector<8xf32> to vector<8x1xf32>
    %577 = vector.broadcast %576 : vector<8x1xf32> to vector<8x16xf32>
    %578 = arith.subf %574, %577 : vector<8x16xf32>
    %579 = math.exp %578 : vector<8x16xf32>
    %cst_149 = arith.constant dense<0.000000e+00> : vector<8xf32>
    %580 = vector.multi_reduction <add>, %579, %cst_149 [1] : vector<8x16xf32> to vector<8xf32>
    %581 = vector.shape_cast %580 : vector<8xf32> to vector<8x1xf32>
    %582 = vector.broadcast %581 : vector<8x1xf32> to vector<8x16xf32>
    %583 = arith.divf %579, %582 : vector<8x16xf32>
    %584 = vector.extract_strided_slice %557 {offsets = [0, 32], sizes = [16, 32], strides = [1, 1]} : vector<16x128xf32> to vector<16x32xf32>
    %cst_150 = arith.constant dense<0.000000e+00> : vector<8x32xf32>
    %585 = tpu.matmul %583, %584, %cst_150 {dimension_numbers = #tpu.dot_dimension_numbers<[1], [0], [0], [1], [0, 0, 1, 1], [], []>} : vector<8x16xf32>, vector<16x32xf32>, vector<8x32xf32> -> vector<8x32xf32>
    %586 = arith.addf %571, %585 : vector<8x32xf32>
    %587 = vector.extract_strided_slice %555 {offsets = [0, 16], sizes = [8, 8], strides = [1, 1]} : vector<8x32xf32> to vector<8x8xf32>
    %588 = vector.extract_strided_slice %556 {offsets = [0, 16], sizes = [16, 8], strides = [1, 1]} : vector<16x32xf32> to vector<16x8xf32>
    %cst_151 = arith.constant dense<0.000000e+00> : vector<8x16xf32>
    %589 = tpu.matmul %587, %588, %cst_151 {dimension_numbers = #tpu.dot_dimension_numbers<[1], [1], [0], [0], [0, 0, 1, 0], [], []>} : vector<8x8xf32>, vector<16x8xf32>, vector<8x16xf32> -> vector<8x16xf32>
    %cst_152 = arith.constant dense<0xFF800000> : vector<8xf32>
    %590 = vector.multi_reduction <maximumf>, %589, %cst_152 [1] : vector<8x16xf32> to vector<8xf32>
    %591 = vector.shape_cast %590 : vector<8xf32> to vector<8x1xf32>
    %592 = vector.broadcast %591 : vector<8x1xf32> to vector<8x16xf32>
    %593 = arith.subf %589, %592 : vector<8x16xf32>
    %594 = math.exp %593 : vector<8x16xf32>
    %cst_153 = arith.constant dense<0.000000e+00> : vector<8xf32>
    %595 = vector.multi_reduction <add>, %594, %cst_153 [1] : vector<8x16xf32> to vector<8xf32>
    %596 = vector.shape_cast %595 : vector<8xf32> to vector<8x1xf32>
    %597 = vector.broadcast %596 : vector<8x1xf32> to vector<8x16xf32>
    %598 = arith.divf %594, %597 : vector<8x16xf32>
    %599 = vector.extract_strided_slice %557 {offsets = [0, 64], sizes = [16, 32], strides = [1, 1]} : vector<16x128xf32> to vector<16x32xf32>
    %cst_154 = arith.constant dense<0.000000e+00> : vector<8x32xf32>
    %600 = tpu.matmul %598, %599, %cst_154 {dimension_numbers = #tpu.dot_dimension_numbers<[1], [0], [0], [1], [0, 0, 1, 1], [], []>} : vector<8x16xf32>, vector<16x32xf32>, vector<8x32xf32> -> vector<8x32xf32>
    %601 = arith.addf %586, %600 : vector<8x32xf32>
    %602 = vector.extract_strided_slice %555 {offsets = [0, 24], sizes = [8, 8], strides = [1, 1]} : vector<8x32xf32> to vector<8x8xf32>
    %603 = vector.extract_strided_slice %556 {offsets = [0, 24], sizes = [16, 8], strides = [1, 1]} : vector<16x32xf32> to vector<16x8xf32>
    %cst_155 = arith.constant dense<0.000000e+00> : vector<8x16xf32>
    %604 = tpu.matmul %602, %603, %cst_155 {dimension_numbers = #tpu.dot_dimension_numbers<[1], [1], [0], [0], [0, 0, 1, 0], [], []>} : vector<8x8xf32>, vector<16x8xf32>, vector<8x16xf32> -> vector<8x16xf32>
    %cst_156 = arith.constant dense<0xFF800000> : vector<8xf32>
    %605 = vector.multi_reduction <maximumf>, %604, %cst_156 [1] : vector<8x16xf32> to vector<8xf32>
    %606 = vector.shape_cast %605 : vector<8xf32> to vector<8x1xf32>
    %607 = vector.broadcast %606 : vector<8x1xf32> to vector<8x16xf32>
    %608 = arith.subf %604, %607 : vector<8x16xf32>
    %609 = math.exp %608 : vector<8x16xf32>
    %cst_157 = arith.constant dense<0.000000e+00> : vector<8xf32>
    %610 = vector.multi_reduction <add>, %609, %cst_157 [1] : vector<8x16xf32> to vector<8xf32>
    %611 = vector.shape_cast %610 : vector<8xf32> to vector<8x1xf32>
    %612 = vector.broadcast %611 : vector<8x1xf32> to vector<8x16xf32>
    %613 = arith.divf %609, %612 : vector<8x16xf32>
    %614 = vector.extract_strided_slice %557 {offsets = [0, 96], sizes = [16, 32], strides = [1, 1]} : vector<16x128xf32> to vector<16x32xf32>
    %cst_158 = arith.constant dense<0.000000e+00> : vector<8x32xf32>
    %615 = tpu.matmul %613, %614, %cst_158 {dimension_numbers = #tpu.dot_dimension_numbers<[1], [0], [0], [1], [0, 0, 1, 1], [], []>} : vector<8x16xf32>, vector<16x32xf32>, vector<8x32xf32> -> vector<8x32xf32>
    %616 = arith.addf %601, %615 : vector<8x32xf32>
    %617 = vector.extract_strided_slice %547 {offsets = [8, 0], sizes = [8, 32], strides = [1, 1]} : vector<16x32xf32> to vector<8x32xf32>
    %618 = vector.extract_strided_slice %552 {offsets = [16, 0], sizes = [16, 32], strides = [1, 1]} : vector<32x32xf32> to vector<16x32xf32>
    %619 = vector.extract_strided_slice %554 {offsets = [16, 0], sizes = [16, 128], strides = [1, 1]} : vector<32x128xf32> to vector<16x128xf32>
    %620 = vector.extract_strided_slice %617 {offsets = [0, 0], sizes = [8, 8], strides = [1, 1]} : vector<8x32xf32> to vector<8x8xf32>
    %621 = vector.extract_strided_slice %618 {offsets = [0, 0], sizes = [16, 8], strides = [1, 1]} : vector<16x32xf32> to vector<16x8xf32>
    %cst_159 = arith.constant dense<0.000000e+00> : vector<8x16xf32>
    %622 = tpu.matmul %620, %621, %cst_159 {dimension_numbers = #tpu.dot_dimension_numbers<[1], [1], [0], [0], [0, 0, 1, 0], [], []>} : vector<8x8xf32>, vector<16x8xf32>, vector<8x16xf32> -> vector<8x16xf32>
    %cst_160 = arith.constant dense<0xFF800000> : vector<8xf32>
    %623 = vector.multi_reduction <maximumf>, %622, %cst_160 [1] : vector<8x16xf32> to vector<8xf32>
    %624 = vector.shape_cast %623 : vector<8xf32> to vector<8x1xf32>
    %625 = vector.broadcast %624 : vector<8x1xf32> to vector<8x16xf32>
    %626 = arith.subf %622, %625 : vector<8x16xf32>
    %627 = math.exp %626 : vector<8x16xf32>
    %cst_161 = arith.constant dense<0.000000e+00> : vector<8xf32>
    %628 = vector.multi_reduction <add>, %627, %cst_161 [1] : vector<8x16xf32> to vector<8xf32>
    %629 = vector.shape_cast %628 : vector<8xf32> to vector<8x1xf32>
    %630 = vector.broadcast %629 : vector<8x1xf32> to vector<8x16xf32>
    %631 = arith.divf %627, %630 : vector<8x16xf32>
    %632 = vector.extract_strided_slice %619 {offsets = [0, 0], sizes = [16, 32], strides = [1, 1]} : vector<16x128xf32> to vector<16x32xf32>
    %cst_162 = arith.constant dense<0.000000e+00> : vector<8x32xf32>
    %633 = tpu.matmul %631, %632, %cst_162 {dimension_numbers = #tpu.dot_dimension_numbers<[1], [0], [0], [1], [0, 0, 1, 1], [], []>} : vector<8x16xf32>, vector<16x32xf32>, vector<8x32xf32> -> vector<8x32xf32>
    %634 = vector.extract_strided_slice %617 {offsets = [0, 8], sizes = [8, 8], strides = [1, 1]} : vector<8x32xf32> to vector<8x8xf32>
    %635 = vector.extract_strided_slice %618 {offsets = [0, 8], sizes = [16, 8], strides = [1, 1]} : vector<16x32xf32> to vector<16x8xf32>
    %cst_163 = arith.constant dense<0.000000e+00> : vector<8x16xf32>
    %636 = tpu.matmul %634, %635, %cst_163 {dimension_numbers = #tpu.dot_dimension_numbers<[1], [1], [0], [0], [0, 0, 1, 0], [], []>} : vector<8x8xf32>, vector<16x8xf32>, vector<8x16xf32> -> vector<8x16xf32>
    %cst_164 = arith.constant dense<0xFF800000> : vector<8xf32>
    %637 = vector.multi_reduction <maximumf>, %636, %cst_164 [1] : vector<8x16xf32> to vector<8xf32>
    %638 = vector.shape_cast %637 : vector<8xf32> to vector<8x1xf32>
    %639 = vector.broadcast %638 : vector<8x1xf32> to vector<8x16xf32>
    %640 = arith.subf %636, %639 : vector<8x16xf32>
    %641 = math.exp %640 : vector<8x16xf32>
    %cst_165 = arith.constant dense<0.000000e+00> : vector<8xf32>
    %642 = vector.multi_reduction <add>, %641, %cst_165 [1] : vector<8x16xf32> to vector<8xf32>
    %643 = vector.shape_cast %642 : vector<8xf32> to vector<8x1xf32>
    %644 = vector.broadcast %643 : vector<8x1xf32> to vector<8x16xf32>
    %645 = arith.divf %641, %644 : vector<8x16xf32>
    %646 = vector.extract_strided_slice %619 {offsets = [0, 32], sizes = [16, 32], strides = [1, 1]} : vector<16x128xf32> to vector<16x32xf32>
    %cst_166 = arith.constant dense<0.000000e+00> : vector<8x32xf32>
    %647 = tpu.matmul %645, %646, %cst_166 {dimension_numbers = #tpu.dot_dimension_numbers<[1], [0], [0], [1], [0, 0, 1, 1], [], []>} : vector<8x16xf32>, vector<16x32xf32>, vector<8x32xf32> -> vector<8x32xf32>
    %648 = arith.addf %633, %647 : vector<8x32xf32>
    %649 = vector.extract_strided_slice %617 {offsets = [0, 16], sizes = [8, 8], strides = [1, 1]} : vector<8x32xf32> to vector<8x8xf32>
    %650 = vector.extract_strided_slice %618 {offsets = [0, 16], sizes = [16, 8], strides = [1, 1]} : vector<16x32xf32> to vector<16x8xf32>
    %cst_167 = arith.constant dense<0.000000e+00> : vector<8x16xf32>
    %651 = tpu.matmul %649, %650, %cst_167 {dimension_numbers = #tpu.dot_dimension_numbers<[1], [1], [0], [0], [0, 0, 1, 0], [], []>} : vector<8x8xf32>, vector<16x8xf32>, vector<8x16xf32> -> vector<8x16xf32>
    %cst_168 = arith.constant dense<0xFF800000> : vector<8xf32>
    %652 = vector.multi_reduction <maximumf>, %651, %cst_168 [1] : vector<8x16xf32> to vector<8xf32>
    %653 = vector.shape_cast %652 : vector<8xf32> to vector<8x1xf32>
    %654 = vector.broadcast %653 : vector<8x1xf32> to vector<8x16xf32>
    %655 = arith.subf %651, %654 : vector<8x16xf32>
    %656 = math.exp %655 : vector<8x16xf32>
    %cst_169 = arith.constant dense<0.000000e+00> : vector<8xf32>
    %657 = vector.multi_reduction <add>, %656, %cst_169 [1] : vector<8x16xf32> to vector<8xf32>
    %658 = vector.shape_cast %657 : vector<8xf32> to vector<8x1xf32>
    %659 = vector.broadcast %658 : vector<8x1xf32> to vector<8x16xf32>
    %660 = arith.divf %656, %659 : vector<8x16xf32>
    %661 = vector.extract_strided_slice %619 {offsets = [0, 64], sizes = [16, 32], strides = [1, 1]} : vector<16x128xf32> to vector<16x32xf32>
    %cst_170 = arith.constant dense<0.000000e+00> : vector<8x32xf32>
    %662 = tpu.matmul %660, %661, %cst_170 {dimension_numbers = #tpu.dot_dimension_numbers<[1], [0], [0], [1], [0, 0, 1, 1], [], []>} : vector<8x16xf32>, vector<16x32xf32>, vector<8x32xf32> -> vector<8x32xf32>
    %663 = arith.addf %648, %662 : vector<8x32xf32>
    %664 = vector.extract_strided_slice %617 {offsets = [0, 24], sizes = [8, 8], strides = [1, 1]} : vector<8x32xf32> to vector<8x8xf32>
    %665 = vector.extract_strided_slice %618 {offsets = [0, 24], sizes = [16, 8], strides = [1, 1]} : vector<16x32xf32> to vector<16x8xf32>
    %cst_171 = arith.constant dense<0.000000e+00> : vector<8x16xf32>
    %666 = tpu.matmul %664, %665, %cst_171 {dimension_numbers = #tpu.dot_dimension_numbers<[1], [1], [0], [0], [0, 0, 1, 0], [], []>} : vector<8x8xf32>, vector<16x8xf32>, vector<8x16xf32> -> vector<8x16xf32>
    %cst_172 = arith.constant dense<0xFF800000> : vector<8xf32>
    %667 = vector.multi_reduction <maximumf>, %666, %cst_172 [1] : vector<8x16xf32> to vector<8xf32>
    %668 = vector.shape_cast %667 : vector<8xf32> to vector<8x1xf32>
    %669 = vector.broadcast %668 : vector<8x1xf32> to vector<8x16xf32>
    %670 = arith.subf %666, %669 : vector<8x16xf32>
    %671 = math.exp %670 : vector<8x16xf32>
    %cst_173 = arith.constant dense<0.000000e+00> : vector<8xf32>
    %672 = vector.multi_reduction <add>, %671, %cst_173 [1] : vector<8x16xf32> to vector<8xf32>
    %673 = vector.shape_cast %672 : vector<8xf32> to vector<8x1xf32>
    %674 = vector.broadcast %673 : vector<8x1xf32> to vector<8x16xf32>
    %675 = arith.divf %671, %674 : vector<8x16xf32>
    %676 = vector.extract_strided_slice %619 {offsets = [0, 96], sizes = [16, 32], strides = [1, 1]} : vector<16x128xf32> to vector<16x32xf32>
    %cst_174 = arith.constant dense<0.000000e+00> : vector<8x32xf32>
    %677 = tpu.matmul %675, %676, %cst_174 {dimension_numbers = #tpu.dot_dimension_numbers<[1], [0], [0], [1], [0, 0, 1, 1], [], []>} : vector<8x16xf32>, vector<16x32xf32>, vector<8x32xf32> -> vector<8x32xf32>
    %678 = arith.addf %663, %677 : vector<8x32xf32>
    %679 = tpu.concatenate %616, %678 in 0 : vector<8x32xf32>, vector<8x32xf32> -> vector<16x32xf32>
    %680 = vector.extract_strided_slice %378 {offsets = [1, 96], sizes = [1, 32], strides = [1, 1]} : vector<4x128xf32> to vector<1x32xf32>
    %681 = vector.broadcast %680 : vector<1x32xf32> to vector<16x32xf32>
    %682 = arith.addf %679, %681 : vector<16x32xf32>
    %683 = arith.addf %541, %682 : vector<16x32xf32>
    %684 = vector.extract_strided_slice %378 {offsets = [2, 64], sizes = [1, 32], strides = [1, 1]} : vector<4x128xf32> to vector<1x32xf32>
    %685 = vector.extract_strided_slice %378 {offsets = [3, 32], sizes = [1, 32], strides = [1, 1]} : vector<4x128xf32> to vector<1x32xf32>
    %cst_175 = arith.constant dense<0.000000e+00> : vector<16xf32>
    %686 = vector.multi_reduction <add>, %683, %cst_175 [1] : vector<16x32xf32> to vector<16xf32>
    %687 = vector.shape_cast %686 : vector<16xf32> to vector<16x1xf32>
    %cst_176 = arith.constant 3.200000e+01 : f32
    %688 = vector.broadcast %cst_176 : f32 to vector<16x1xf32>
    %689 = arith.divf %687, %688 : vector<16x1xf32>
    %690 = arith.mulf %683, %683 : vector<16x32xf32>
    %cst_177 = arith.constant dense<0.000000e+00> : vector<16xf32>
    %691 = vector.multi_reduction <add>, %690, %cst_177 [1] : vector<16x32xf32> to vector<16xf32>
    %692 = vector.shape_cast %691 : vector<16xf32> to vector<16x1xf32>
    %cst_178 = arith.constant 3.200000e+01 : f32
    %693 = vector.broadcast %cst_178 : f32 to vector<16x1xf32>
    %694 = arith.divf %692, %693 : vector<16x1xf32>
    %695 = arith.mulf %689, %689 : vector<16x1xf32>
    %696 = arith.subf %694, %695 : vector<16x1xf32>
    %697 = vector.broadcast %689 : vector<16x1xf32> to vector<16x32xf32>
    %698 = arith.subf %683, %697 : vector<16x32xf32>
    %cst_179 = arith.constant 9.99999974E-6 : f32
    %699 = vector.broadcast %cst_179 : f32 to vector<16x1xf32>
    %700 = arith.addf %696, %699 : vector<16x1xf32>
    %701 = math.rsqrt %700 : vector<16x1xf32>
    %702 = vector.broadcast %701 : vector<16x1xf32> to vector<16x32xf32>
    %703 = arith.mulf %698, %702 : vector<16x32xf32>
    %704 = vector.broadcast %684 : vector<1x32xf32> to vector<16x32xf32>
    %705 = arith.mulf %703, %704 : vector<16x32xf32>
    %706 = vector.broadcast %685 : vector<1x32xf32> to vector<16x32xf32>
    %707 = arith.addf %705, %706 : vector<16x32xf32>
    %708 = vector.extract_strided_slice %376 {offsets = [0, 384], sizes = [32, 64], strides = [1, 1]} : vector<32x512xf32> to vector<32x64xf32>
    %cst_180 = arith.constant dense<0.000000e+00> : vector<16x64xf32>
    %709 = tpu.matmul %707, %708, %cst_180 {dimension_numbers = #tpu.dot_dimension_numbers<[1], [0], [0], [1], [0, 0, 1, 1], [], []>} : vector<16x32xf32>, vector<32x64xf32>, vector<16x64xf32> -> vector<16x64xf32>
    %710 = vector.extract_strided_slice %378 {offsets = [1, 0], sizes = [1, 64], strides = [1, 1]} : vector<4x128xf32> to vector<1x64xf32>
    %711 = vector.broadcast %710 : vector<1x64xf32> to vector<16x64xf32>
    %712 = arith.addf %709, %711 : vector<16x64xf32>
    %cst_181 = arith.constant 0.000000e+00 : f32
    %713 = vector.broadcast %cst_181 : f32 to vector<16x64xf32>
    %714 = arith.maximumf %712, %713 : vector<16x64xf32>
    %715 = vector.extract_strided_slice %376 {offsets = [0, 448], sizes = [32, 64], strides = [1, 1]} : vector<32x512xf32> to vector<32x64xf32>
    %cst_182 = arith.constant dense<0.000000e+00> : vector<16x32xf32>
    %716 = tpu.matmul %714, %715, %cst_182 {dimension_numbers = #tpu.dot_dimension_numbers<[1], [1], [0], [0], [0, 0, 1, 0], [], []>} : vector<16x64xf32>, vector<32x64xf32>, vector<16x32xf32> -> vector<16x32xf32>
    %717 = vector.extract_strided_slice %378 {offsets = [2, 0], sizes = [1, 32], strides = [1, 1]} : vector<4x128xf32> to vector<1x32xf32>
    %718 = vector.broadcast %717 : vector<1x32xf32> to vector<16x32xf32>
    %719 = arith.addf %716, %718 : vector<16x32xf32>
    %720 = arith.addf %707, %719 : vector<16x32xf32>
    %721 = vector.extract_strided_slice %378 {offsets = [2, 96], sizes = [1, 32], strides = [1, 1]} : vector<4x128xf32> to vector<1x32xf32>
    %722 = vector.extract_strided_slice %378 {offsets = [3, 64], sizes = [1, 32], strides = [1, 1]} : vector<4x128xf32> to vector<1x32xf32>
    %cst_183 = arith.constant dense<0.000000e+00> : vector<16xf32>
    %723 = vector.multi_reduction <add>, %720, %cst_183 [1] : vector<16x32xf32> to vector<16xf32>
    %724 = vector.shape_cast %723 : vector<16xf32> to vector<16x1xf32>
    %cst_184 = arith.constant 3.200000e+01 : f32
    %725 = vector.broadcast %cst_184 : f32 to vector<16x1xf32>
    %726 = arith.divf %724, %725 : vector<16x1xf32>
    %727 = arith.mulf %720, %720 : vector<16x32xf32>
    %cst_185 = arith.constant dense<0.000000e+00> : vector<16xf32>
    %728 = vector.multi_reduction <add>, %727, %cst_185 [1] : vector<16x32xf32> to vector<16xf32>
    %729 = vector.shape_cast %728 : vector<16xf32> to vector<16x1xf32>
    %cst_186 = arith.constant 3.200000e+01 : f32
    %730 = vector.broadcast %cst_186 : f32 to vector<16x1xf32>
    %731 = arith.divf %729, %730 : vector<16x1xf32>
    %732 = arith.mulf %726, %726 : vector<16x1xf32>
    %733 = arith.subf %731, %732 : vector<16x1xf32>
    %734 = vector.broadcast %726 : vector<16x1xf32> to vector<16x32xf32>
    %735 = arith.subf %720, %734 : vector<16x32xf32>
    %cst_187 = arith.constant 9.99999974E-6 : f32
    %736 = vector.broadcast %cst_187 : f32 to vector<16x1xf32>
    %737 = arith.addf %733, %736 : vector<16x1xf32>
    %738 = math.rsqrt %737 : vector<16x1xf32>
    %739 = vector.broadcast %738 : vector<16x1xf32> to vector<16x32xf32>
    %740 = arith.mulf %735, %739 : vector<16x32xf32>
    %741 = vector.broadcast %721 : vector<1x32xf32> to vector<16x32xf32>
    %742 = arith.mulf %740, %741 : vector<16x32xf32>
    %743 = vector.broadcast %722 : vector<1x32xf32> to vector<16x32xf32>
    %744 = arith.addf %742, %743 : vector<16x32xf32>
    %c2 = arith.constant 2 : index
    %c0_188 = arith.constant 0 : index
    %c0_189 = arith.constant 0 : index
    %745 = vector.load %arg2[%c2, %c0_188, %c0_189] : memref<3x4x128xf32, #tpu.memory_space<vmem>>, vector<1x4x128xf32>
    %746 = vector.shape_cast %745 : vector<1x4x128xf32> to vector<4x128xf32>
    %747 = vector.extract_strided_slice %746 {offsets = [0, 0], sizes = [1, 32], strides = [1, 1]} : vector<4x128xf32> to vector<1x32xf32>
    %748 = vector.extract_strided_slice %746 {offsets = [0, 32], sizes = [1, 32], strides = [1, 1]} : vector<4x128xf32> to vector<1x32xf32>
    %cst_190 = arith.constant dense<0.000000e+00> : vector<16xf32>
    %749 = vector.multi_reduction <add>, %744, %cst_190 [1] : vector<16x32xf32> to vector<16xf32>
    %750 = vector.shape_cast %749 : vector<16xf32> to vector<16x1xf32>
    %cst_191 = arith.constant 3.200000e+01 : f32
    %751 = vector.broadcast %cst_191 : f32 to vector<16x1xf32>
    %752 = arith.divf %750, %751 : vector<16x1xf32>
    %753 = arith.mulf %744, %744 : vector<16x32xf32>
    %cst_192 = arith.constant dense<0.000000e+00> : vector<16xf32>
    %754 = vector.multi_reduction <add>, %753, %cst_192 [1] : vector<16x32xf32> to vector<16xf32>
    %755 = vector.shape_cast %754 : vector<16xf32> to vector<16x1xf32>
    %cst_193 = arith.constant 3.200000e+01 : f32
    %756 = vector.broadcast %cst_193 : f32 to vector<16x1xf32>
    %757 = arith.divf %755, %756 : vector<16x1xf32>
    %758 = arith.mulf %752, %752 : vector<16x1xf32>
    %759 = arith.subf %757, %758 : vector<16x1xf32>
    %760 = vector.broadcast %752 : vector<16x1xf32> to vector<16x32xf32>
    %761 = arith.subf %744, %760 : vector<16x32xf32>
    %cst_194 = arith.constant 9.99999974E-6 : f32
    %762 = vector.broadcast %cst_194 : f32 to vector<16x1xf32>
    %763 = arith.addf %759, %762 : vector<16x1xf32>
    %764 = math.rsqrt %763 : vector<16x1xf32>
    %765 = vector.broadcast %764 : vector<16x1xf32> to vector<16x32xf32>
    %766 = arith.mulf %761, %765 : vector<16x32xf32>
    %767 = vector.broadcast %747 : vector<1x32xf32> to vector<16x32xf32>
    %768 = arith.mulf %766, %767 : vector<16x32xf32>
    %769 = vector.broadcast %748 : vector<1x32xf32> to vector<16x32xf32>
    %770 = arith.addf %768, %769 : vector<16x32xf32>
    %c0_195 = arith.constant 0 : index
    %c0_196 = arith.constant 0 : index
    %771 = vector.load %arg3[%c0_195, %c0_196] : memref<16x32xf32, #tpu.memory_space<vmem>>, vector<16x32xf32>
    tpu.vector_store %arg3[%c0_195, %c0_196], %770 {strides = array<i32>} : memref<16x32xf32, #tpu.memory_space<vmem>>, vector<16x32xf32>,
    return
  }
}

</mosaic_0001>

<bundles_post_ra>
// kernel: transformer_decoder_forward.1
= control target key start
LH: loop header
LB: loop body
LE: loop exit
PB: predicated region body
PF: predicated region fallthrough
CT: control target
= control target key end

     0   :  { %vm50_vm0 = vcmask 261120   ;;  %s4114_s7 = smov 96   ;;  %s4115_s8 = smov 88   ;;  %vm112_vm1 = vcmask 64512   ;;  %s5161_s1 = inlined_call_operand.vmem [shape: f32[2,32,512], index: 1, kind: input, shape index: {}]   ;;  %s5162_s0 = inlined_call_operand.vmem [shape: f32[96,32], index: 0, kind: input, shape index: {}]   ;;  %s5163_s2 = inlined_call_operand.vmem [shape: f32[3,4,128], index: 2, kind: input, shape index: {}]   ;;  %s5164_s3 = inlined_call_operand.vmem [shape: f32[16,32], index: 3, kind: output, shape index: {}]  }
   0x1   :  { %v4147_v0 = vld [vmem:[%s5161_s1 + $0x70] sm:$0xff]  ;;  %v4158_v2 = vld [vmem:[%s5162_s0] sm:$0xff]  ;;  %s4116_s9 = smov 120   ;;  %s4117_s10 = smov 72   ;;  %v4219_v17 = vld [vmem:[%s5162_s0 + $0x8] sm:$0xff] }
   0x2   :  { %v4152_v1 = vld [vmem:[%s5161_s1 + $0x50] sm:$0xff]  ;;  %69 = vmatpush.msra.mxu0 %v4147_v0  ;;  %v42_v5 = vld [vmem:[%s5161_s1 + $0x60] sm:$0xff]  ;;  %s4118_s11 = smov 80   ;;  %s4119_s12 = smov 104   ;;  %v4224_v18 = vld [vmem:[%s5162_s0 + $0x18] sm:$0xff] }
   0x3   :  { %v4163_v3 = vld [vmem:[%s5162_s0 + $0x10] sm:$0xff]  ;;  %v38_v6 = vld [vmem:[%s5161_s1 + $0x40] sm:$0xff]  ;;  %98 = vmatpush.msra.mxu1 %v42_v5  ;;  %v48_v19 = vadd.f32 %v4224_v18, %v4219_v17  ;;  %s4120_s17 = smov 112   ;;  %s4121_s18 = smov 32  }
   0x4   :  { %v4168_v4 = vld [vmem:[%s5161_s1 + $0x30] sm:$0xff]  ;;  %70 = vmatpush.msra.mxu0 %v4152_v1  ;;  %v47_v8 = vadd.f32 %v4163_v3, %v4158_v2  ;;  %v34_v9 = vld [vmem:[%s5161_s1 + $0x20] sm:$0xff]  ;;  %s4122_s19 = smov 64  }
   0x5   :  { %v4180_v7 = vld [vmem:[%s5161_s1 + $0x10] sm:$0xff]  ;;  %99 = vmatpush.msra.mxu1 %v38_v6  ;;  %v30_v10 = vld [vmem:[%s5161_s1] sm:$0xff] }
   0x6   :  { %71 = vmatpush.msra.mxu0 %v4168_v4  ;;  %v4198_v11 = vld [vmem:[%s5163_s2] sm:$0xf] }
   0x7   :  { %100 = vmatpush.msra.mxu1 %v34_v9  ;;  %v4201_v12 = vperm.slane %v4198_v11, 0 }
   0x8   :  { %72 = vmatpush.msra.mxu0 %v4180_v7 }
   0x9   :  { %3666 = vmatmul.msk.f32.vlgmr.msra.gmra.mxu0 %vm50_vm0, %v47_v8  ;;  %101 = vmatpush.msra.mxu1 %v30_v10 }
   0xa   :  { %3668 = vmatmul.msk.f32.vlgmr.msra.gmra.mxu1 %vm50_vm0, %v4158_v2 }
  0x11   :  { %3667 = vmatmul.msk.f32.gmra.mxu0 %vm50_vm0, %v48_v19 }
  0x12   :  { %3669 = vmatmul.msk.f32.gmra.mxu1 %vm50_vm0, %v4219_v17 }
  0x86   :  { %v74_v13 = vpop.f32.mrf.mxu0 }
  0x87   :  { %v75_v14 = vadd.f32 %v74_v13, %v4201_v12  ;;  %v4206_v15 = vpop.f32.mrf.mxu1 }
  0x89   :  { %110 = vrot.lane.b32.xlu2 %v75_v14, %s4114_s7  ;;  %163 = vrot.lane.b32.xlu0 %v75_v14, %s4115_s8 }
  0x8e   :  { %v77_v40 = vpop.f32.mrf.mxu0 }
  0x8f   :  { %v4243_v41 = vadd.f32 %v77_v40, %v4201_v12 }
  0x91   :  { %214 = vrot.lane.b32.xlu2 %v4206_v15, %s4114_s7  ;;  %161 = vrot.lane.b32.xlu0 %v75_v14, %s4116_s9 }
  0x99   :  { %344 = vrot.lane.b32.xlu2 %v75_v14, %s4117_s10  ;;  %265 = vrot.lane.b32.xlu0 %v75_v14, %s4118_s11 }
  0xa1   :  { %342 = vrot.lane.b32.xlu0 %v75_v14, %s4119_s12 }
  0xe3   :  { %v111_v16 = vpop.permute.xlu2 %110 }
  0xe4   :  { %3670 = vmatpush.xpose.msk.msra.mxu2 %vm112_vm1, %v111_v16 }
  0xe7   :  { %3671 = vmatmul.msk.f32.vlgmr.msra.gmra.mxu2 %vm112_vm1, %v75_v14 }
  0xeb   :  { %v215_v20 = vpop.permute.xlu2 %214 }
  0xec   :  { %235 = vmatpush.msrb.mxu2 %v215_v20 }
  0xf3   :  { %v345_v21 = vpop.permute.xlu2 %344 }
  0xf4   :  { %3679 = vmatpush.xpose.msk.msrb.mxu0 %vm112_vm1, %v345_v21 }
  0xfb   :  { %v164_v22 = vpop.permute.xlu0 %163 }
  0xfc   :  { %3672 = vmatpush.xpose.msk.msra.mxu3 %vm112_vm1, %v164_v22 }
 0x100   :  { %258 = vmatpush.msrb.mxu3 %v4206_v15 }
 0x103   :  { %v162_v23 = vpop.permute.xlu0 %161 }
 0x104   :  { %3673 = vmatmul.msk.f32.vlgmr.msra.gmra.mxu3 %vm112_vm1, %v162_v23 }
 0x10b   :  { %v266_v24 = vpop.permute.xlu0 %265 }
 0x10c   :  { %3676 = vmatpush.xpose.msk.msra.mxu2 %vm112_vm1, %v266_v24 }
 0x113   :  { %v343_v25 = vpop.permute.xlu0 %342 }
 0x114   :  { %3680 = vmatmul.msk.f32.vlgmr.msrb.gmra.mxu0 %vm112_vm1, %v343_v25 }
 0x16a   :  { %v134_v26 = vpop.f32.mrf.mxu2 }
 0x16b   :  { %v137_v27 = vsel %vm112_vm1, %v134_v26, -inf }
 0x16c   :  { %138 = vmax.xlane.f32.xlu2 %v137_v27 }
 0x187   :  { %v186_v28 = vpop.f32.mrf.mxu3 }
 0x188   :  { %v189_v29 = vsel %vm112_vm1, %v186_v28, -inf }
 0x189   :  { %190 = vmax.xlane.f32.xlu1 %v189_v29 }
 0x191   :  { %v367_v20 = vpop.f32.mrf.mxu0 }
 0x192   :  { %v370_v21 = vsel %vm112_vm1, %v367_v20, -inf }
 0x1df   :  { %v139_v35 = vpop.xlane.xlu2 %138 }
 0x1e0   :  { %v140_v36 = vsub.f32 %v134_v26, %v139_v35 }
 0x1e2   :  { %v141_v37 = vmul.f32 1.442695, %v140_v36 }
 0x1fc   :  { %v191_v30 = vpop.xlane.xlu1 %190 }
 0x1fd   :  { %v192_v31 = vsub.f32 %v186_v28, %v191_v30 }
 0x1ff   :  { %v193_v32 = vmul.f32 1.442695, %v192_v31 }
 0x201   :  { %3950 = vpow2.f32 %v193_v32 }
 0x202   :  { %3952 = vpow2.f32 %v141_v37 }
 0x207   :  { %v3951_v33 = vpop.eup %3950 }
 0x208   :  { %v195_v34 = vsel %vm112_vm1, %v3951_v33, 0.0  ;;  %v3953_v38 = vpop.eup %3952 }
 0x209   :  { %196 = vadd.xlane.f32.xlu1 %v195_v34  ;;  %v143_v39 = vsel %vm112_vm1, %v3953_v38, 0.0 }
 0x222   :  { %263 = vrot.lane.b32.xlu1 %v75_v14, %s4120_s17 }
 0x24c   :  { %144 = vadd.xlane.f32.xlu1 %v143_v39 }
 0x265   :  { %472 = vrot.lane.b32.xlu1 %v4243_v41, %s4116_s9 }
 0x26d   :  { %574 = vrot.lane.b32.xlu1 %v4243_v41, %s4120_s17 }
 0x275   :  { %394 = vrot.lane.b32.xlu1 %v4206_v15, %s4121_s18 }
 0x27c   :  { %v197_v42 = vpop.xlane.xlu1 %196 }
 0x27d   :  { %3954 = vrcp.f32 %v197_v42  ;;  %v209_v46 = vand.u32 2147483648, %v197_v42  ;;  %v207_v48 = vand.u32 2147483647, %v197_v42  ;;  %vm203_vm3 = vweird.f32 %v197_v42 }
 0x27f   :  { %v210_v50 = vor.u32 1.1754944e-38, %v209_v46  ;;  %vm208_vm5 = vcmp.eq.f32.partialorder %v207_v48, 8.507059e+37 }
 0x283   :  { %v3955_v43 = vpop.eup %3954 }
 0x284   :  { %v199_v44 = vmul.f32 %v3955_v43, %v197_v42  ;;  %vm204_vm2 = vweird.f32 %v3955_v43 }
 0x285   :  { %vm205_vm4 = vmor %vm203_vm3, %vm204_vm2 }
 0x286   :  { %v200_v45 = vsub.f32 1.0, %v199_v44 }
 0x288   :  { %v201_v47 = vmul.f32 %v3955_v43, %v200_v45 }
 0x28a   :  { %v202_v49 = vadd.f32 %v3955_v43, %v201_v47 }
 0x28c   :  { %v206_v51 = vsel %vm205_vm4, %v3955_v43, %v202_v49 }
 0x28d   :  { %v211_v52 = vsel %vm208_vm5, %v210_v50, %v206_v51 }
 0x28e   :  { %v212_v53 = vmul.f32 %v3951_v33, %v211_v52 }
 0x290   :  { %3674 = vmatmul.msk.f32.vlgmr.msrb.gmra.mxu2 %vm112_vm1, %v212_v53 }
 0x294   :  { %v264_v54 = vpop.permute.xlu1 %263 }
 0x298   :  { %3677 = vmatmul.msk.f32.vlgmr.msra.gmra.mxu2 %vm112_vm1, %v264_v54 }
 0x2bf   :  { %v145_v55 = vpop.xlane.xlu1 %144 }
 0x2c0   :  { %3956 = vrcp.f32 %v145_v55  ;;  %v157_v59 = vand.u32 2147483648, %v145_v55  ;;  %v155_v61 = vand.u32 2147483647, %v145_v55  ;;  %vm151_vm7 = vweird.f32 %v145_v55 }
 0x2c2   :  { %v158_v63 = vor.u32 1.1754944e-38, %v157_v59  ;;  %vm156_vm9 = vcmp.eq.f32.partialorder %v155_v61, 8.507059e+37 }
 0x2c6   :  { %v3957_v56 = vpop.eup %3956 }
 0x2c7   :  { %v147_v57 = vmul.f32 %v3957_v56, %v145_v55  ;;  %vm152_vm6 = vweird.f32 %v3957_v56 }
 0x2c8   :  { %vm153_vm8 = vmor %vm151_vm7, %vm152_vm6 }
 0x2c9   :  { %v148_v58 = vsub.f32 1.0, %v147_v57 }
 0x2cb   :  { %v149_v60 = vmul.f32 %v3957_v56, %v148_v58 }
 0x2cd   :  { %v150_v62 = vadd.f32 %v3957_v56, %v149_v60  ;;  %v4279_v60 = vpop.f32.mrf.mxu1 }
 0x2cf   :  { %v154_v5 = vsel %vm153_vm8, %v3957_v56, %v150_v62 }
 0x2d0   :  { %v159_v6 = vsel %vm156_vm9, %v158_v63, %v154_v5 }
 0x2d1   :  { %v160_v8 = vmul.f32 %v3953_v38, %v159_v6 }
 0x2d3   :  { %3675 = vmatmul.msk.f32.vlgmr.msrb.gmra.mxu3 %vm112_vm1, %v160_v8 }
 0x2d7   :  { %v473_v9 = vpop.permute.xlu1 %472 }
 0x2df   :  { %v575_v10 = vpop.permute.xlu1 %574 }
 0x2e7   :  { %v395_v13 = vpop.permute.xlu1 %394 }
 0x2e8   :  { %415 = vmatpush.msrb.mxu1 %v395_v13 }
 0x2ea   :  { %569 = vmatpush.msra.mxu1 %v4279_v60 }
 0x313   :  { %v4254_v14 = vpop.f32.mrf.mxu2 }
 0x31b   :  { %v288_v16 = vpop.f32.mrf.mxu2 }
 0x31c   :  { %v291_v19 = vsel %vm112_vm1, %v288_v16, -inf }
 0x31d   :  { %292 = vmax.xlane.f32.xlu0 %v291_v19 }
 0x331   :  { %474 = vrot.lane.b32.xlu0 %v4243_v41, %s4115_s8 }
 0x356   :  { %v260_v61 = vpop.f32.mrf.mxu3 }
 0x357   :  { %v261_v62 = vadd.f32 %v260_v61, %v4254_v14 }
 0x35b   :  { %371 = vmax.xlane.f32.xlu0 %v370_v21 }
 0x390   :  { %v293_v22 = vpop.xlane.xlu0 %292 }
 0x391   :  { %v294_v23 = vsub.f32 %v288_v16, %v293_v22 }
 0x393   :  { %v295_v24 = vmul.f32 1.442695, %v294_v23 }
 0x395   :  { %3958 = vpow2.f32 %v295_v24 }
 0x39b   :  { %v3959_v25 = vpop.eup %3958 }
 0x39c   :  { %v297_v26 = vsel %vm112_vm1, %v3959_v25, 0.0 }
 0x39d   :  { %298 = vadd.xlane.f32.xlu2 %v297_v26 }
 0x3a3   :  { %v475_v27 = vpop.permute.xlu0 %474 }
 0x3b5   :  { %315 = vrot.lane.b32.xlu2 %v4206_v15, %s4122_s19 }
 0x3bd   :  { %422 = vrot.lane.b32.xlu2 %v4243_v41, %s4114_s7 }
 0x3c5   :  { %576 = vrot.lane.b32.xlu2 %v4243_v41, %s4118_s11 }
 0x3ce   :  { %v372_v28 = vpop.xlane.xlu0 %371 }
 0x3cf   :  { %v373_v29 = vsub.f32 %v367_v20, %v372_v28 }
 0x3d1   :  { %v374_v30 = vmul.f32 1.442695, %v373_v29  ;;  %v4304_v29 = vperm.slane %v4198_v11, 2 }
 0x3d3   :  { %3960 = vpow2.f32 %v374_v30 }
 0x3d9   :  { %v3961_v31 = vpop.eup %3960 }
 0x3da   :  { %v376_v32 = vsel %vm112_vm1, %v3961_v31, 0.0 }
 0x3ee   :  { %377 = vadd.xlane.f32.xlu2 %v376_v32 }
 0x406   :  { %655 = vrot.lane.b32.xlu2 %v4243_v41, %s4117_s10 }
 0x410   :  { %v299_v33 = vpop.xlane.xlu2 %298 }
 0x411   :  { %3962 = vrcp.f32 %v299_v33  ;;  %v311_v37 = vand.u32 2147483648, %v299_v33  ;;  %v309_v39 = vand.u32 2147483647, %v299_v33  ;;  %vm305_vm11 = vweird.f32 %v299_v33 }
 0x413   :  { %v312_v42 = vor.u32 1.1754944e-38, %v311_v37  ;;  %vm310_vm13 = vcmp.eq.f32.partialorder %v309_v39, 8.507059e+37 }
 0x417   :  { %v3963_v15 = vpop.eup %3962 }
 0x418   :  { %v301_v34 = vmul.f32 %v3963_v15, %v299_v33  ;;  %v316_v35 = vpop.permute.xlu2 %315  ;;  %vm306_vm10 = vweird.f32 %v3963_v15 }
 0x419   :  { %336 = vmatpush.msra.mxu3 %v316_v35  ;;  %vm307_vm12 = vmor %vm305_vm11, %vm306_vm10 }
 0x41a   :  { %v302_v36 = vsub.f32 1.0, %v301_v34 }
 0x41b   :  { %3684 = vmatpush.xpose.msk.msrb.mxu3 %vm112_vm1, %v475_v27 }
 0x41c   :  { %v303_v38 = vmul.f32 %v3963_v15, %v302_v36 }
 0x41e   :  { %v304_v40 = vadd.f32 %v3963_v15, %v303_v38 }
 0x420   :  { %v308_v43 = vsel %vm307_vm12, %v3963_v15, %v304_v40  ;;  %v423_v44 = vpop.permute.xlu2 %422 }
 0x421   :  { %3682 = vmatpush.xpose.msk.msrb.mxu2 %vm112_vm1, %v423_v44  ;;  %v313_v45 = vsel %vm310_vm13, %v312_v42, %v308_v43 }
 0x422   :  { %v314_v46 = vmul.f32 %v3959_v25, %v313_v45 }
 0x424   :  { %3678 = vmatmul.msk.f32.vlgmr.msra.gmra.mxu3 %vm112_vm1, %v314_v46  ;;  %3683 = vmatmul.msk.f32.vlgmr.msrb.gmra.mxu2 %vm112_vm1, %v4243_v41 }
 0x428   :  { %v577_v47 = vpop.permute.xlu2 %576 }
 0x429   :  { %3688 = vmatpush.xpose.msk.msra.mxu2 %vm112_vm1, %v577_v47 }
 0x42c   :  { %3685 = vmatmul.msk.f32.vlgmr.msrb.gmra.mxu3 %vm112_vm1, %v473_v9  ;;  %3689 = vmatmul.msk.f32.vlgmr.msra.gmra.mxu2 %vm112_vm1, %v575_v10 }
 0x461   :  { %v378_v48 = vpop.xlane.xlu2 %377 }
 0x462   :  { %3964 = vrcp.f32 %v378_v48  ;;  %v390_v52 = vand.u32 2147483648, %v378_v48  ;;  %v388_v54 = vand.u32 2147483647, %v378_v48  ;;  %vm384_vm15 = vweird.f32 %v378_v48 }
 0x464   :  { %v391_v56 = vor.u32 1.1754944e-38, %v390_v52  ;;  %vm389_vm3 = vcmp.eq.f32.partialorder %v388_v54, 8.507059e+37 }
 0x468   :  { %v3965_v49 = vpop.eup %3964 }
 0x469   :  { %v380_v50 = vmul.f32 %v3965_v49, %v378_v48  ;;  %vm385_vm14 = vweird.f32 %v3965_v49  ;;  %v656_v28 = vpop.permute.xlu2 %655 }
 0x46a   :  { %vm386_vm2 = vmor %vm384_vm15, %vm385_vm14 }
 0x46b   :  { %v381_v51 = vsub.f32 1.0, %v380_v50 }
 0x46d   :  { %v382_v53 = vmul.f32 %v3965_v49, %v381_v51 }
 0x46f   :  { %v383_v55 = vadd.f32 %v3965_v49, %v382_v53 }
 0x471   :  { %v387_v57 = vsel %vm386_vm2, %v3965_v49, %v383_v55 }
 0x472   :  { %v392_v58 = vsel %vm389_vm3, %v391_v56, %v387_v57 }
 0x473   :  { %v393_v59 = vmul.f32 %v3961_v31, %v392_v58 }
 0x475   :  { %3681 = vmatmul.msk.f32.vlgmr.msrb.gmra.mxu1 %vm112_vm1, %v393_v59 }
 0x4a7   :  { %v338_v63 = vpop.f32.mrf.mxu3  ;;  %v4283_v5 = vpop.f32.mrf.mxu2 }
 0x4a8   :  { %v4285_v6 = vadd.f32 %v338_v63, %v261_v62  ;;  %v448_v30 = vsel %vm112_vm1, %v4283_v5, -inf }
 0x4af   :  { %v497_v8 = vpop.f32.mrf.mxu3  ;;  %v599_v9 = vpop.f32.mrf.mxu2 }
 0x4b0   :  { %v602_v10 = vsel %vm112_vm1, %v599_v9, -inf  ;;  %v500_v13 = vsel %vm112_vm1, %v497_v8, -inf }
 0x4b1   :  { %603 = vmax.xlane.f32.xlu0 %v602_v10  ;;  %501 = vmax.xlane.f32.xlu1 %v500_v13 }
 0x4c5   :  { %525 = vrot.lane.b32.xlu0 %v4279_v60, %s4114_s7 }
 0x4ca   :  { %653 = vrot.lane.b32.xlu1 %v4243_v41, %s4119_s12  ;;  %v4297_v41 = vperm.slane %v4198_v11, 1 }
 0x4f2   :  { %v417_v47 = vpop.f32.mrf.mxu1 }
 0x4f3   :  { %v420_v54 = vadd.f32 %v417_v47, %v4285_v6 }
 0x524   :  { %v502_v14 = vpop.xlane.xlu1 %501  ;;  %v604_v16 = vpop.xlane.xlu0 %603 }
 0x525   :  { %v503_v19 = vsub.f32 %v497_v8, %v502_v14  ;;  %v605_v20 = vsub.f32 %v599_v9, %v604_v16  ;;  %v3850_v9 = vpack.i.bf16 %v4152_v1, %v4147_v0 }
 0x527   :  { %v504_v21 = vmul.f32 1.442695, %v503_v19  ;;  %v606_v22 = vmul.f32 1.442695, %v605_v20 }
 0x529   :  { %3966 = vpow2.f32 %v504_v21 }
 0x52a   :  { %3968 = vpow2.f32 %v606_v22 }
 0x52f   :  { %v3967_v23 = vpop.eup %3966 }
 0x530   :  { %v3969_v24 = vpop.eup %3968  ;;  %v506_v25 = vsel %vm112_vm1, %v3967_v23, 0.0 }
 0x531   :  { %507 = vadd.xlane.f32.xlu0 %v506_v25  ;;  %v608_v26 = vsel %vm112_vm1, %v3969_v24, 0.0 }
 0x532   :  { %609 = vadd.xlane.f32.xlu2 %v608_v26 }
 0x537   :  { %v526_v27 = vpop.permute.xlu0 %525 }
 0x538   :  { %546 = vmatpush.msra.mxu0 %v526_v27 }
 0x53a   :  { %3691 = vmatpush.xpose.msk.msrb.mxu0 %vm112_vm1, %v656_v28 }
 0x53c   :  { %v654_v8 = vpop.permute.xlu1 %653 }
 0x545   :  { %734 = vrot.lane.b32.xlu0 %v4297_v41, %s4122_s19 }
 0x54a   :  { %626 = vrot.lane.b32.xlu2 %v4279_v60, %s4122_s19 }
 0x552   :  { %798 = vrot.lane.b32.xlu2 %v4304_v29, %s4114_s7 }
 0x57b   :  { %449 = vmax.xlane.f32.xlu2 %v448_v30 }
 0x593   :  { %825 = vrot.lane.b32.xlu2 %v4201_v12, %s4122_s19 }
 0x5a4   :  { %v508_v31 = vpop.xlane.xlu0 %507 }
 0x5a5   :  { %v610_v32 = vpop.xlane.xlu2 %609  ;;  %3970 = vrcp.f32 %v508_v31  ;;  %v520_v39 = vand.u32 2147483648, %v508_v31  ;;  %v518_v43 = vand.u32 2147483647, %v508_v31  ;;  %vm514_vm6 = vweird.f32 %v508_v31 }
 0x5a6   :  { %3972 = vrcp.f32 %v610_v32  ;;  %v622_v40 = vand.u32 2147483648, %v610_v32  ;;  %v620_v45 = vand.u32 2147483647, %v610_v32  ;;  %vm616_vm7 = vweird.f32 %v610_v32 }
 0x5a7   :  { %v521_v49 = vor.u32 1.1754944e-38, %v520_v39  ;;  %vm519_vm10 = vcmp.eq.f32.partialorder %v518_v43, 8.507059e+37  ;;  %v4358_v43 = vld [vmem:[%s5162_s0 + $0x20] sm:$0xff] }
 0x5a8   :  { %v623_v50 = vor.u32 1.1754944e-38, %v622_v40  ;;  %vm621_vm11 = vcmp.eq.f32.partialorder %v620_v45, 8.507059e+37 }
 0x5ab   :  { %v3971_v33 = vpop.eup %3970 }
 0x5ac   :  { %v3973_v15 = vpop.eup %3972  ;;  %v510_v34 = vmul.f32 %v3971_v33, %v508_v31  ;;  %vm515_vm4 = vweird.f32 %v3971_v33 }
 0x5ad   :  { %v612_v35 = vmul.f32 %v3973_v15, %v610_v32  ;;  %v627_v36 = vpop.permute.xlu2 %626  ;;  %vm617_vm5 = vweird.f32 %v3973_v15  ;;  %vm516_vm8 = vmor %vm514_vm6, %vm515_vm4 }
 0x5ae   :  { %v511_v37 = vsub.f32 1.0, %v510_v34  ;;  %647 = vmatpush.msra.mxu3 %v627_v36  ;;  %vm618_vm9 = vmor %vm616_vm7, %vm617_vm5 }
 0x5af   :  { %v613_v38 = vsub.f32 1.0, %v612_v35 }
 0x5b0   :  { %v512_v42 = vmul.f32 %v3971_v33, %v511_v37 }
 0x5b1   :  { %v614_v44 = vmul.f32 %v3973_v15, %v613_v38 }
 0x5b2   :  { %v513_v46 = vadd.f32 %v3971_v33, %v512_v42 }
 0x5b3   :  { %v615_v48 = vadd.f32 %v3973_v15, %v614_v44  ;;  %v22_v44 = vld [vmem:[%s5162_s0 + $0x40] sm:$0xff] }
 0x5b4   :  { %v517_v51 = vsel %vm516_vm8, %v3971_v33, %v513_v46 }
 0x5b5   :  { %v619_v52 = vsel %vm618_vm9, %v3973_v15, %v615_v48  ;;  %v522_v53 = vsel %vm519_vm10, %v521_v49, %v517_v51  ;;  %v4337_v10 = vpop.permute.xlu2 %798  ;;  %vm983_vm10 = vcmask 130048  }
 0x5b6   :  { %v523_v55 = vmul.f32 %v3967_v23, %v522_v53  ;;  %v624_v56 = vsel %vm621_vm11, %v623_v50, %v619_v52  ;;  %v4364_v52 = vadd.f32 %v22_v44, %v4358_v43 }
 0x5b7   :  { %v4313_v57 = vpop.permute.xlu0 %734  ;;  %v625_v58 = vmul.f32 %v3969_v24, %v624_v56  ;;  %v19_v56 = vld [vmem:[%s5162_s0 + $0x28] sm:$0xff] }
 0x5b8   :  { %v737_v59 = vadd.f32 %v4313_v57, %v420_v54  ;;  %3686 = vmatmul.msk.f32.vlgmr.msra.gmra.mxu0 %vm112_vm1, %v523_v55  ;;  %v4367_v54 = vperm.slane %v4198_v11, 3 }
 0x5b9   :  { %3690 = vmatmul.msk.f32.vlgmr.msra.gmra.mxu3 %vm112_vm1, %v625_v58  ;;  %v23_v58 = vld [vmem:[%s5162_s0 + $0x48] sm:$0xff] }
 0x5ba   :  { %v4319_v61 = vadd.f32 %v737_v59, %v4158_v2  ;;  %v3855_v2 = vpack.i.bf16 %v4180_v7, %v4168_v4  ;;  %v4123_v7 = vmov 32.0  }
 0x5bc   :  { %v741_v62 = vsel %vm50_vm0, %v4319_v61, 0.0  ;;  %v756_v63 = vmul.f32 %v4319_v61, %v4319_v61 }
 0x5bd   :  { %742 = vadd.xlane.f32.xlu0 %v741_v62 }
 0x5be   :  { %v758_v6 = vsel %vm50_vm0, %v756_v63, 0.0  ;;  %v4381_v63 = vadd.f32 %v23_v58, %v19_v56 }
 0x5bf   :  { %759 = vadd.xlane.f32.xlu1 %v758_v6 }
 0x5c0   :  { %3692 = vmatmul.msk.f32.vlgmr.msrb.gmra.mxu0 %vm112_vm1, %v654_v8  ;;  %v20_v8 = vld [vmem:[%s5162_s0 + $0x30] sm:$0xff] }
 0x5d1   :  { %3851 = vrot.lane.b32.xlu0 %v3850_v9, %s4121_s18 }
 0x5d8   :  { %3856 = vrot.lane.b32.xlu1 %v3855_v2, %s4121_s18 }
 0x5d9   :  { %3861 = vrot.lane.b32.xlu0 %v3850_v9, %s4122_s19  ;;  %v24_v9 = vld [vmem:[%s5162_s0 + $0x50] sm:$0xff] }
 0x5e0   :  { %869 = vrot.lane.b32.xlu1 %v4201_v12, %s4121_s18 }
 0x5e1   :  { %3866 = vrot.lane.b32.xlu0 %v3855_v2, %s4122_s19  ;;  %v4394_v2 = vadd.f32 %v24_v9, %v20_v8 }
 0x5ee   :  { %v450_v13 = vpop.xlane.xlu2 %449 }
 0x5ef   :  { %v451_v14 = vsub.f32 %v4283_v5, %v450_v13  ;;  %v25_v13 = vld [vmem:[%s5162_s0 + $0x58] sm:$0xff] }
 0x5f1   :  { %v452_v0 = vmul.f32 1.442695, %v451_v14 }
 0x5f3   :  { %3974 = vpow2.f32 %v452_v0 }
 0x5f4   :  { %3976 = vrcp.f32 %v4123_v7 }
 0x5f9   :  { %v4340_v1 = vpop.eup %3974 }
 0x5fa   :  { %v454_v4 = vsel %vm112_vm1, %v4340_v1, 0.0  ;;  %v3977_v16 = vpop.eup %3976 }
 0x5fb   :  { %v748_v19 = vmul.f32 32.0, %v3977_v16  ;;  %vm752_vm12 = vweird.f32 %v3977_v16 }
 0x5fd   :  { %v749_v12 = vsub.f32 1.0, %v748_v19 }
 0x5ff   :  { %v750_v20 = vmul.f32 %v3977_v16, %v749_v12 }
 0x601   :  { %v751_v21 = vadd.f32 %v3977_v16, %v750_v20 }
 0x603   :  { %v4344_v22 = vsel %vm752_vm12, %v3977_v16, %v751_v21 }
 0x60a   :  { %455 = vadd.xlane.f32.xlu1 %v454_v4 }
 0x630   :  { %v743_v23 = vpop.xlane.xlu0 %742 }
 0x631   :  { %v754_v5 = vmul.f32 %v4344_v22, %v743_v23 }
 0x632   :  { %v760_v24 = vpop.xlane.xlu1 %759 }
 0x633   :  { %v766_v25 = vmul.f32 %v754_v5, %v754_v5  ;;  %v764_v26 = vmul.f32 %v760_v24, %v4344_v22  ;;  %v770_v42 = vsub.f32 %v4319_v61, %v754_v5 }
 0x635   :  { %v768_v27 = vsub.f32 %v764_v26, %v766_v25  ;;  %v4348_v28 = vpop.f32.mrf.mxu0 }
 0x637   :  { %v772_v30 = vadd.f32 1e-05, %v768_v27 }
 0x639   :  { %3978 = vrsqrt.f32 %v772_v30  ;;  %vm780_vm14 = vweird.f32 %v772_v30 }
 0x63d   :  { %v4350_v31 = vpop.f32.mrf.mxu0 }
 0x63e   :  { %v681_v32 = vsel %vm112_vm1, %v4350_v31, -inf }
 0x63f   :  { %v3979_v33 = vpop.eup %3978  ;;  %682 = vmax.xlane.f32.xlu0 %v681_v32 }
 0x640   :  { %v775_v15 = vmul.f32 %v3979_v33, %v772_v30  ;;  %vm781_vm13 = vweird.f32 %v3979_v33 }
 0x641   :  { %vm782_vm15 = vmor %vm780_vm14, %vm781_vm13 }
 0x642   :  { %v776_v34 = vmul.f32 %v3979_v33, %v775_v15 }
 0x643   :  { %v3852_v35 = vpop.permute.xlu0 %3851 }
 0x644   :  { %v777_v36 = vmul.f32 0.5, %v776_v34  ;;  %v3854_v37 = vunpack.i.h.bf16 %v3852_v35  ;;  %v3853_v38 = vunpack.i.l.bf16 %v3852_v35  ;;  %v43_v34 = vld [vmem:[%s5161_s1 + $0x68] sm:$0xff] }
 0x645   :  { %v39_v35 = vld [vmem:[%s5161_s1 + $0x48] sm:$0xff]  ;;  %937 = vmatpush.msra.mxu0 %v43_v34 }
 0x646   :  { %v778_v39 = vsub.f32 1.5, %v777_v36  ;;  %896 = vmatpush.msrb.mxu3 %v3853_v38  ;;  %v31_v36 = vld [vmem:[%s5161_s1 + $0x8] sm:$0xff] }
 0x647   :  { %938 = vmatpush.msra.mxu0 %v39_v35 }
 0x648   :  { %v779_v40 = vmul.f32 %v3979_v33, %v778_v39  ;;  %897 = vmatpush.msrb.mxu3 %v3854_v37  ;;  %v4433_v39 = vpop.permute.xlu2 %825 }
 0x64a   :  { %v783_v45 = vsel %vm782_vm15, %v3979_v33, %v779_v40  ;;  %v3857_v46 = vpop.permute.xlu1 %3856 }
 0x64b   :  { %v794_v47 = vmul.f32 %v783_v45, %v770_v42  ;;  %v3858_v48 = vunpack.i.l.bf16 %v3857_v46  ;;  %v3862_v49 = vpop.permute.xlu0 %3861  ;;  %v3859_v53 = vunpack.i.h.bf16 %v3857_v46 }
 0x64c   :  { %v3864_v50 = vunpack.i.h.bf16 %v3862_v49  ;;  %v3863_v51 = vunpack.i.l.bf16 %v3862_v49 }
 0x64d   :  { %898 = vmatpush.msrb.mxu3 %v3858_v48  ;;  %v801_v55 = vmul.f32 %v4337_v10, %v794_v47 }
 0x64e   :  { %846 = vmatpush.msrb.mxu2 %v3863_v51 }
 0x64f   :  { %899 = vmatpush.msrb.mxu3 %v3859_v53  ;;  %v4379_v61 = vadd.f32 %v4367_v54, %v801_v55 }
 0x650   :  { %3696 = vmatmul.msk.f32.vlgmr.msrb.gmra.mxu3 %vm50_vm0, %v4364_v52  ;;  %847 = vmatpush.msrb.mxu2 %v3864_v50 }
 0x651   :  { %v806_v6 = vadd.f32 %v4379_v61, %v4163_v3  ;;  %v21_v3 = vld [vmem:[%s5162_s0 + $0x38] sm:$0xff] }
 0x652   :  { %v4404_v14 = vadd.f32 %v25_v13, %v21_v3  ;;  %v870_v0 = vpop.permute.xlu1 %869 }
 0x653   :  { %v3867_v59 = vpop.permute.xlu0 %3866 }
 0x654   :  { %v3869_v11 = vunpack.i.h.bf16 %v3867_v59  ;;  %v3868_v62 = vunpack.i.l.bf16 %v3867_v59 }
 0x656   :  { %848 = vmatpush.msrb.mxu2 %v3868_v62 }
 0x658   :  { %849 = vmatpush.msrb.mxu2 %v3869_v11  ;;  %3697 = vmatmul.msk.f32.gmra.mxu3 %vm50_vm0, %v4381_v63 }
 0x659   :  { %3694 = vmatmul.msk.f32.vlgmr.msrb.gmra.mxu2 %vm50_vm0, %v806_v6 }
 0x660   :  { %3698 = vmatmul.msk.f32.gmra.mxu3 %vm50_vm0, %v4394_v2 }
 0x668   :  { %3699 = vmatmul.msk.f32.gmra.mxu3 %vm50_vm0, %v4404_v14 }
 0x67d   :  { %v456_v4 = vpop.xlane.xlu1 %455 }
 0x67e   :  { %3980 = vrcp.f32 %v456_v4  ;;  %v468_v12 = vand.u32 2147483648, %v456_v4  ;;  %v466_v21 = vand.u32 2147483647, %v456_v4  ;;  %vm462_vm3 = vweird.f32 %v456_v4 }
 0x680   :  { %v469_v5 = vor.u32 1.1754944e-38, %v468_v12  ;;  %vm467_vm5 = vcmp.eq.f32.partialorder %v466_v21, 8.507059e+37 }
 0x684   :  { %v3981_v7 = vpop.eup %3980 }
 0x685   :  { %v458_v16 = vmul.f32 %v3981_v7, %v456_v4  ;;  %vm463_vm2 = vweird.f32 %v3981_v7 }
 0x686   :  { %vm464_vm4 = vmor %vm462_vm3, %vm463_vm2 }
 0x687   :  { %v459_v19 = vsub.f32 1.0, %v458_v16 }
 0x689   :  { %v460_v20 = vmul.f32 %v3981_v7, %v459_v19 }
 0x68b   :  { %v461_v23 = vadd.f32 %v3981_v7, %v460_v20 }
 0x68d   :  { %v465_v24 = vsel %vm464_vm4, %v3981_v7, %v461_v23 }
 0x68e   :  { %v470_v25 = vsel %vm467_vm5, %v469_v5, %v465_v24 }
 0x68f   :  { %v471_v26 = vmul.f32 %v4340_v1, %v470_v25  ;;  %v649_v1 = vpop.f32.mrf.mxu3 }
 0x691   :  { %3687 = vmatmul.msk.f32.vlgmr.msra.gmra.mxu1 %vm112_vm1, %v471_v26 }
 0x6b2   :  { %v683_v27 = vpop.xlane.xlu0 %682 }
 0x6b3   :  { %v684_v30 = vsub.f32 %v4350_v31, %v683_v27  ;;  %v35_v31 = vld [vmem:[%s5161_s1 + $0x28] sm:$0xff] }
 0x6b4   :  { %939 = vmatpush.msra.mxu0 %v35_v31 }
 0x6b5   :  { %v685_v32 = vmul.f32 1.442695, %v684_v30 }
 0x6b6   :  { %940 = vmatpush.msra.mxu0 %v31_v36 }
 0x6b7   :  { %3982 = vpow2.f32 %v685_v32  ;;  %3700 = vmatmul.msk.f32.vlgmr.msra.gmra.mxu0 %vm50_vm0, %v4358_v43 }
 0x6bd   :  { %v3983_v33 = vpop.eup %3982 }
 0x6be   :  { %v687_v15 = vsel %vm112_vm1, %v3983_v33, 0.0 }
 0x6bf   :  { %688 = vadd.xlane.f32.xlu0 %v687_v15  ;;  %3701 = vmatmul.msk.f32.gmra.mxu0 %vm50_vm0, %v19_v56 }
 0x6c7   :  { %3702 = vmatmul.msk.f32.gmra.mxu0 %vm50_vm0, %v20_v8 }
 0x6cf   :  { %3703 = vmatmul.msk.f32.gmra.mxu0 %vm50_vm0, %v21_v3 }
 0x6d3   :  { %705 = vrot.lane.b32.xlu0 %v4279_v60, %s4121_s18  ;;  %v901_v37 = vpop.f32.mrf.mxu3 }
 0x6d4   :  { %v4428_v38 = vadd.f32 %v901_v37, %v870_v0 }
 0x6d6   :  { %1010 = vrot.lane.b32.xlu2 %v4428_v38, %s4116_s9 }
 0x6db   :  { %v904_v40 = vpop.f32.mrf.mxu3 }
 0x6dc   :  { %v4435_v42 = vadd.f32 %v904_v40, %v870_v0  ;;  %v851_v44 = vpop.f32.mrf.mxu2 }
 0x6dd   :  { %v4438_v45 = vadd.f32 %v851_v44, %v4433_v39 }
 0x6de   :  { %1012 = vrot.lane.b32.xlu1 %v4435_v42, %s4116_s9 }
 0x6df   :  { %1008 = vrot.lane.b32.xlu2 %v4438_v45, %s4116_s9 }
 0x6e3   :  { %v907_v60 = vpop.f32.mrf.mxu3 }
 0x6e4   :  { %v4450_v47 = vadd.f32 %v907_v60, %v870_v0 }
 0x6eb   :  { %v910_v43 = vpop.f32.mrf.mxu3 }
 0x6ec   :  { %v4446_v46 = vadd.f32 %v910_v43, %v870_v0 }
 0x6ee   :  { %3720 = vmatpush.xpose.msk.msrb.mxu0 %vm112_vm1, %v4446_v46 }
 0x6f2   :  { %3721 = vmatpush.xpose.msk.msrb.mxu0 %vm112_vm1, %v4450_v47 }
 0x70e   :  { %v571_v4 = vpop.f32.mrf.mxu1 }
 0x70f   :  { %v572_v7 = vadd.f32 %v571_v4, %v4348_v28 }
 0x711   :  { %v652_v19 = vadd.f32 %v649_v1, %v572_v7 }
 0x730   :  { %v1011_v9 = vpop.permute.xlu2 %1010 }
 0x732   :  { %v689_v48 = vpop.xlane.xlu0 %688 }
 0x733   :  { %3984 = vrcp.f32 %v689_v48  ;;  %v701_v53 = vand.u32 2147483648, %v689_v48  ;;  %v699_v56 = vand.u32 2147483647, %v689_v48  ;;  %vm695_vm7 = vweird.f32 %v689_v48 }
 0x734   :  { %v942_v0 = vpop.f32.mrf.mxu0 }
 0x735   :  { %v702_v59 = vor.u32 1.1754944e-38, %v701_v53  ;;  %vm700_vm9 = vcmp.eq.f32.partialorder %v699_v56, 8.507059e+37 }
 0x739   :  { %v3985_v49 = vpop.eup %3984  ;;  %v1009_v13 = vpop.permute.xlu2 %1008 }
 0x73a   :  { %v691_v50 = vmul.f32 %v3985_v49, %v689_v48  ;;  %vm696_vm6 = vweird.f32 %v3985_v49 }
 0x73b   :  { %vm697_vm8 = vmor %vm695_vm7, %vm696_vm6 }
 0x73c   :  { %v692_v51 = vsub.f32 1.0, %v691_v50  ;;  %v945_v16 = vpop.f32.mrf.mxu0 }
 0x73d   :  { %v4472_v30 = vpack.i.bf16 %v942_v0, %v945_v16 }
 0x73e   :  { %v693_v55 = vmul.f32 %v3985_v49, %v692_v51 }
 0x740   :  { %v694_v58 = vadd.f32 %v3985_v49, %v693_v55 }
 0x742   :  { %v698_v11 = vsel %vm697_vm8, %v3985_v49, %v694_v58 }
 0x743   :  { %v703_v62 = vsel %vm700_vm9, %v702_v59, %v698_v11 }
 0x744   :  { %v704_v6 = vmul.f32 %v3983_v33, %v703_v62 }
 0x745   :  { %v706_v8 = vpop.permute.xlu0 %705 }
 0x746   :  { %726 = vmatpush.msrb.mxu1 %v706_v8 }
 0x747   :  { %3693 = vmatmul.msk.f32.vlgmr.msrb.gmra.mxu1 %vm112_vm1, %v704_v6 }
 0x748   :  { %3704 = vmatpush.xpose.msk.msra.mxu1 %vm112_vm1, %v4435_v42 }
 0x74c   :  { %3705 = vmatpush.xpose.msk.msra.mxu1 %vm112_vm1, %v4428_v38 }
 0x74f   :  { %3706 = vmatmul.msk.f32.vlgmr.msra.gmra.mxu1 %vm112_vm1, %v4438_v45 }
 0x750   :  { %v1013_v3 = vpop.permute.xlu1 %1012 }
 0x751   :  { %3707 = vmatpush.xpose.msk.msrb.mxu1 %vm112_vm1, %v1013_v3 }
 0x755   :  { %3708 = vmatpush.xpose.msk.msrb.mxu1 %vm112_vm1, %v1011_v9 }
 0x758   :  { %3709 = vmatmul.msk.f32.vlgmr.msrb.gmra.mxu1 %vm112_vm1, %v1009_v13 }
 0x759   :  { %1112 = vmatpush.msra.mxu1 %v945_v16 }
 0x75b   :  { %1113 = vmatpush.msra.mxu1 %v942_v0 }
 0x7c4   :  { %v728_v12 = vpop.f32.mrf.mxu1 }
 0x7c5   :  { %v731_v20 = vadd.f32 %v728_v12, %v652_v19 }
 0x7c7   :  { %v738_v21 = vadd.f32 %v4313_v57, %v731_v20 }
 0x7c9   :  { %v740_v23 = vadd.f32 %v738_v21, %v4219_v17 }
 0x7cb   :  { %v744_v5 = vsel %vm50_vm0, %v740_v23, 0.0  ;;  %v757_v24 = vmul.f32 %v740_v23, %v740_v23 }
 0x7cc   :  { %745 = vadd.xlane.f32.xlu2 %v744_v5  ;;  %v4468_v25 = vpop.f32.mrf.mxu1 }
 0x7cd   :  { %v761_v26 = vsel %vm50_vm0, %v757_v24, 0.0  ;;  %v984_v9 = vsel %vm983_vm10, %v4468_v25, -inf }
 0x7ce   :  { %762 = vadd.xlane.f32.xlu1 %v761_v26 }
 0x7d5   :  { %v1037_v28 = vpop.f32.mrf.mxu1 }
 0x7d6   :  { %v1040_v27 = vsel %vm983_vm10, %v1037_v28, -inf }
 0x7d7   :  { %1041 = vmax.xlane.f32.xlu0 %v1040_v27 }
 0x7e4   :  { %3871 = vrot.lane.b32.xlu2 %v4472_v30, %s4114_s7 }
 0x7e7   :  { %1122 = vrot.lane.b32.xlu1 %v4435_v42, %s4120_s17 }
 0x7ec   :  { %1118 = vrot.lane.b32.xlu2 %v4438_v45, %s4120_s17 }
 0x83f   :  { %v746_v17 = vpop.xlane.xlu2 %745 }
 0x840   :  { %v755_v57 = vmul.f32 %v4344_v22, %v746_v17 }
 0x841   :  { %v763_v32 = vpop.xlane.xlu1 %762 }
 0x842   :  { %v767_v33 = vmul.f32 %v755_v57, %v755_v57  ;;  %v765_v15 = vmul.f32 %v763_v32, %v4344_v22  ;;  %v771_v56 = vsub.f32 %v740_v23, %v755_v57 }
 0x844   :  { %v769_v34 = vsub.f32 %v765_v15, %v767_v33 }
 0x846   :  { %v773_v35 = vadd.f32 1e-05, %v769_v34  ;;  %v4516_v34 = vpop.f32.mrf.mxu0 }
 0x847   :  { %v3872_v1 = vpop.permute.xlu2 %3871 }
 0x848   :  { %3986 = vrsqrt.f32 %v773_v35  ;;  %v3874_v31 = vunpack.i.h.bf16 %v3872_v1  ;;  %v3873_v36 = vunpack.i.l.bf16 %v3872_v1  ;;  %vm790_vm12 = vweird.f32 %v773_v35 }
 0x84a   :  { %v1042_v37 = vpop.xlane.xlu0 %1041  ;;  %1089 = vmatpush.msra.mxu2 %v3873_v36 }
 0x84b   :  { %v1043_v40 = vsub.f32 %v1037_v28, %v1042_v37 }
 0x84c   :  { %1090 = vmatpush.msra.mxu2 %v3874_v31 }
 0x84d   :  { %v1044_v44 = vmul.f32 1.442695, %v1043_v40 }
 0x84e   :  { %v3987_v60 = vpop.eup %3986 }
 0x84f   :  { %v785_v43 = vmul.f32 %v3987_v60, %v773_v35  ;;  %3988 = vpow2.f32 %v1044_v44  ;;  %vm791_vm11 = vweird.f32 %v3987_v60  ;;  %v1119_v5 = vpop.permute.xlu2 %1118  ;;  %v4520_v44 = vpop.f32.mrf.mxu0 }
 0x850   :  { %vm792_vm13 = vmor %vm790_vm12, %vm791_vm11 }
 0x851   :  { %v786_v48 = vmul.f32 %v3987_v60, %v785_v43 }
 0x853   :  { %v787_v49 = vmul.f32 0.5, %v786_v48  ;;  %v4524_v48 = vpack.i.bf16 %v4516_v34, %v4520_v44 }
 0x855   :  { %v3989_v50 = vpop.eup %3988  ;;  %v788_v51 = vsub.f32 1.5, %v787_v49 }
 0x856   :  { %v1046_v53 = vsel %vm983_vm10, %v3989_v50, 0.0 }
 0x857   :  { %v789_v55 = vmul.f32 %v3987_v60, %v788_v51  ;;  %1047 = vadd.xlane.f32.xlu0 %v1046_v53 }
 0x859   :  { %v1123_v58 = vpop.permute.xlu1 %1122  ;;  %v793_v59 = vsel %vm792_vm13, %v3987_v60, %v789_v55 }
 0x85a   :  { %3712 = vmatpush.xpose.msk.msrb.mxu2 %vm112_vm1, %v1123_v58  ;;  %v795_v11 = vmul.f32 %v793_v59, %v771_v56 }
 0x85c   :  { %v802_v62 = vmul.f32 %v4337_v10, %v795_v11 }
 0x85e   :  { %v4486_v6 = vadd.f32 %v4367_v54, %v802_v62 }
 0x860   :  { %v807_v8 = vadd.f32 %v4486_v6, %v4224_v18 }
 0x862   :  { %3695 = vmatmul.msk.f32.gmra.mxu2 %vm50_vm0, %v807_v8 }
 0x86b   :  { %1120 = vrot.lane.b32.xlu0 %v4428_v38, %s4120_s17 }
 0x895   :  { %985 = vmax.xlane.f32.xlu0 %v984_v9 }
 0x8ca   :  { %v1048_v3 = vpop.xlane.xlu0 %1047 }
 0x8cb   :  { %3990 = vrcp.f32 %v1048_v3  ;;  %v1060_v4 = vand.u32 2147483648, %v1048_v3  ;;  %v1058_v16 = vand.u32 2147483647, %v1048_v3  ;;  %vm1054_vm15 = vweird.f32 %v1048_v3 }
 0x8cd   :  { %v1061_v18 = vor.u32 1.1754944e-38, %v1060_v4  ;;  %vm1059_vm3 = vcmp.eq.f32.partialorder %v1058_v16, 8.507059e+37 }
 0x8d1   :  { %v3991_v13 = vpop.eup %3990 }
 0x8d2   :  { %v1050_v0 = vmul.f32 %v3991_v13, %v1048_v3  ;;  %vm1055_vm14 = vweird.f32 %v3991_v13 }
 0x8d3   :  { %vm1056_vm2 = vmor %vm1054_vm15, %vm1055_vm14 }
 0x8d4   :  { %v1051_v10 = vsub.f32 1.0, %v1050_v0 }
 0x8d6   :  { %v1052_v7 = vmul.f32 %v3991_v13, %v1051_v10 }
 0x8d8   :  { %v1053_v19 = vadd.f32 %v3991_v13, %v1052_v7 }
 0x8da   :  { %v1057_v12 = vsel %vm1056_vm2, %v3991_v13, %v1053_v19 }
 0x8db   :  { %v1062_v20 = vsel %vm1059_vm3, %v1061_v18, %v1057_v12 }
 0x8dc   :  { %v1063_v21 = vmul.f32 %v3989_v50, %v1062_v20 }
 0x8dd   :  { %v1121_v23 = vpop.permute.xlu0 %1120 }
 0x8de   :  { %3710 = vmatmul.msk.f32.vlgmr.msra.gmra.mxu2 %vm983_vm10, %v1063_v21 }
 0x8df   :  { %3713 = vmatpush.xpose.msk.msrb.mxu2 %vm112_vm1, %v1121_v23 }
 0x8e5   :  { %v854_v24 = vpop.f32.mrf.mxu2 }
 0x8e6   :  { %v4498_v26 = vadd.f32 %v854_v24, %v4433_v39  ;;  %3714 = vmatmul.msk.f32.vlgmr.msrb.gmra.mxu2 %vm112_vm1, %v1119_v5 }
 0x8e8   :  { %3722 = vmatmul.msk.f32.vlgmr.msrb.gmra.mxu0 %vm112_vm1, %v4498_v26 }
 0x908   :  { %v986_v28 = vpop.xlane.xlu0 %985 }
 0x909   :  { %v987_v27 = vsub.f32 %v4468_v25, %v986_v28 }
 0x90b   :  { %v988_v17 = vmul.f32 1.442695, %v987_v27 }
 0x90d   :  { %3992 = vpow2.f32 %v988_v17 }
 0x913   :  { %v3993_v57 = vpop.eup %3992 }
 0x914   :  { %v990_v32 = vsel %vm983_vm10, %v3993_v57, 0.0 }
 0x915   :  { %991 = vadd.xlane.f32.xlu2 %v990_v32 }
 0x92d   :  { %1347 = vrot.lane.b32.xlu2 %v4446_v46, %s4116_s9 }
 0x935   :  { %1206 = vrot.lane.b32.xlu2 %v4428_v38, %s4119_s12 }
 0x961   :  { %v4509_v39 = vpop.f32.mrf.mxu2 }
 0x969   :  { %v1147_v33 = vpop.f32.mrf.mxu2 }
 0x96a   :  { %v1150_v15 = vsel %vm983_vm10, %v1147_v33, -inf }
 0x96b   :  { %1151 = vmax.xlane.f32.xlu1 %v1150_v15 }
 0x984   :  { %3876 = vrot.lane.b32.xlu1 %v4472_v30, %s4122_s19 }
 0x988   :  { %v992_v25 = vpop.xlane.xlu2 %991 }
 0x989   :  { %3994 = vrcp.f32 %v992_v25  ;;  %v1004_v38 = vand.u32 2147483648, %v992_v25  ;;  %v1002_v37 = vand.u32 2147483647, %v992_v25  ;;  %vm998_vm5 = vweird.f32 %v992_v25 }
 0x98b   :  { %v1005_v60 = vor.u32 1.1754944e-38, %v1004_v38  ;;  %vm1003_vm7 = vcmp.eq.f32.partialorder %v1002_v37, 8.507059e+37 }
 0x98c   :  { %1343 = vrot.lane.b32.xlu1 %v4498_v26, %s4116_s9 }
 0x98f   :  { %v3995_v35 = vpop.eup %3994 }
 0x990   :  { %v994_v1 = vmul.f32 %v3995_v35, %v992_v25  ;;  %vm999_vm4 = vweird.f32 %v3995_v35  ;;  %v1348_v62 = vpop.permute.xlu2 %1347 }
 0x991   :  { %vm1000_vm6 = vmor %vm998_vm5, %vm999_vm4 }
 0x992   :  { %v995_v31 = vsub.f32 1.0, %v994_v1 }
 0x994   :  { %v996_v36 = vmul.f32 %v3995_v35, %v995_v31  ;;  %1204 = vrot.lane.b32.xlu1 %v4438_v45, %s4119_s12 }
 0x996   :  { %v997_v40 = vadd.f32 %v3995_v35, %v996_v36 }
 0x998   :  { %v1001_v43 = vsel %vm1000_vm6, %v3995_v35, %v997_v40 }
 0x999   :  { %v1006_v49 = vsel %vm1003_vm7, %v1005_v60, %v1001_v43 }
 0x99a   :  { %v1007_v50 = vmul.f32 %v3993_v57, %v1006_v49  ;;  %v1207_v57 = vpop.permute.xlu2 %1206 }
 0x99c   :  { %3881 = vrot.lane.b32.xlu1 %v4524_v48, %s4114_s7  ;;  %3711 = vmatmul.msk.f32.vlgmr.msra.gmra.mxu1 %vm983_vm10, %v1007_v50 }
 0x9a4   :  { %1543 = vrot.lane.b32.xlu1 %v4446_v46, %s4119_s12 }
 0x9ac   :  { %1541 = vrot.lane.b32.xlu1 %v4450_v47, %s4119_s12 }
 0x9b4   :  { %1539 = vrot.lane.b32.xlu1 %v4498_v26, %s4119_s12 }
 0x9bc   :  { %1457 = vrot.lane.b32.xlu1 %v4446_v46, %s4120_s17 }
 0x9de   :  { %v1152_v45 = vpop.xlane.xlu1 %1151 }
 0x9df   :  { %v1153_v51 = vsub.f32 %v1147_v33, %v1152_v45 }
 0x9e1   :  { %v1154_v53 = vmul.f32 1.442695, %v1153_v51 }
 0x9e3   :  { %3996 = vpow2.f32 %v1154_v53 }
 0x9e9   :  { %v3997_v55 = vpop.eup %3996 }
 0x9ea   :  { %v1156_v56 = vsel %vm983_vm10, %v3997_v55, 0.0 }
 0x9eb   :  { %1157 = vadd.xlane.f32.xlu0 %v1156_v56 }
 0x9f6   :  { %v3877_v58 = vpop.permute.xlu1 %3876 }
 0x9f7   :  { %v3878_v59 = vunpack.i.l.bf16 %v3877_v58  ;;  %v3879_v11 = vunpack.i.h.bf16 %v3877_v58 }
 0x9f9   :  { %1197 = vmatpush.msrb.mxu1 %v3878_v59 }
 0x9fb   :  { %1198 = vmatpush.msrb.mxu1 %v3879_v11 }
 0x9fd   :  { %3723 = vmatpush.xpose.msk.msra.mxu1 %vm112_vm1, %v1348_v62 }
 0x9fe   :  { %v1344_v8 = vpop.permute.xlu1 %1343 }
 0x9ff   :  { %1345 = vrot.lane.b32.xlu0 %v4450_v47, %s4116_s9 }
 0xa06   :  { %v1205_v46 = vpop.permute.xlu1 %1204 }
 0xa07   :  { %1208 = vrot.lane.b32.xlu0 %v4435_v42, %s4119_s12 }
 0xa0e   :  { %v3882_v9 = vpop.permute.xlu1 %3881 }
 0xa0f   :  { %v3883_v17 = vunpack.i.l.bf16 %v3882_v9  ;;  %v3884_v32 = vunpack.i.h.bf16 %v3882_v9 }
 0xa16   :  { %v1544_v3 = vpop.permute.xlu1 %1543 }
 0xa19   :  { %v4554_v33 = vpop.f32.mrf.mxu1 }
 0xa1e   :  { %v1542_v13 = vpop.permute.xlu1 %1541 }
 0xa26   :  { %v4543_v0 = vpop.permute.xlu1 %1539 }
 0xa2e   :  { %v1458_v10 = vpop.permute.xlu1 %1457 }
 0xa2f   :  { %3728 = vmatpush.xpose.msk.msra.mxu0 %vm112_vm1, %v1458_v10 }
 0xa5e   :  { %v1158_v4 = vpop.xlane.xlu0 %1157 }
 0xa5f   :  { %3998 = vrcp.f32 %v1158_v4  ;;  %v1170_v18 = vand.u32 2147483648, %v1158_v4  ;;  %v1168_v20 = vand.u32 2147483647, %v1158_v4  ;;  %vm1164_vm9 = vweird.f32 %v1158_v4 }
 0xa61   :  { %v1171_v42 = vor.u32 1.1754944e-38, %v1170_v18  ;;  %vm1169_vm12 = vcmp.eq.f32.partialorder %v1168_v20, 8.507059e+37 }
 0xa65   :  { %v3999_v7 = vpop.eup %3998 }
 0xa66   :  { %v1160_v16 = vmul.f32 %v3999_v7, %v1158_v4  ;;  %vm1165_vm8 = vweird.f32 %v3999_v7 }
 0xa67   :  { %vm1166_vm11 = vmor %vm1164_vm9, %vm1165_vm8 }
 0xa68   :  { %v1161_v19 = vsub.f32 1.0, %v1160_v16 }
 0xa6a   :  { %v1162_v12 = vmul.f32 %v3999_v7, %v1161_v19 }
 0xa6c   :  { %v1163_v21 = vadd.f32 %v3999_v7, %v1162_v12 }
 0xa6e   :  { %v1167_v23 = vsel %vm1166_vm11, %v3999_v7, %v1163_v21 }
 0xa6f   :  { %v1172_v5 = vsel %vm1169_vm12, %v1171_v42, %v1167_v23 }
 0xa70   :  { %v1173_v24 = vmul.f32 %v3997_v55, %v1172_v5 }
 0xa71   :  { %v1346_v28 = vpop.permute.xlu0 %1345 }
 0xa72   :  { %3715 = vmatmul.msk.f32.vlgmr.msrb.gmra.mxu1 %vm983_vm10, %v1173_v24 }
 0xa73   :  { %3724 = vmatpush.xpose.msk.msra.mxu1 %vm112_vm1, %v1346_v28 }
 0xa79   :  { %v1209_v27 = vpop.permute.xlu0 %1208 }
 0xa7a   :  { %3716 = vmatpush.xpose.msk.msra.mxu2 %vm112_vm1, %v1209_v27  ;;  %3725 = vmatmul.msk.f32.vlgmr.msra.gmra.mxu1 %vm112_vm1, %v1344_v8 }
 0xa7e   :  { %3717 = vmatpush.xpose.msk.msra.mxu2 %vm112_vm1, %v1207_v57 }
 0xa81   :  { %3718 = vmatmul.msk.f32.vlgmr.msra.gmra.mxu2 %vm112_vm1, %v1205_v46 }
 0xa82   :  { %1424 = vmatpush.msrb.mxu2 %v3883_v17 }
 0xa84   :  { %1425 = vmatpush.msrb.mxu2 %v3884_v32 }
 0xa86   :  { %3732 = vmatpush.xpose.msk.msra.mxu2 %vm112_vm1, %v1544_v3 }
 0xa8a   :  { %3733 = vmatpush.xpose.msk.msra.mxu2 %vm112_vm1, %v1542_v13 }
 0xaef   :  { %v4556_v15 = vpop.f32.mrf.mxu1 }
 0xaf7   :  { %v1372_v25 = vpop.f32.mrf.mxu1 }
 0xaf8   :  { %v1375_v35 = vsel %vm983_vm10, %v1372_v25, -inf }
 0xaf9   :  { %1376 = vmax.xlane.f32.xlu0 %v1375_v35 }
 0xb04   :  { %v1233_v1 = vpop.f32.mrf.mxu2 }
 0xb05   :  { %v1236_v31 = vsel %vm983_vm10, %v1233_v1, -inf }
 0xb06   :  { %1237 = vmax.xlane.f32.xlu1 %v1236_v31 }
 0xb0d   :  { %1455 = vrot.lane.b32.xlu0 %v4450_v47, %s4120_s17  ;;  %v1316_v47 = vpop.f32.mrf.mxu0 }
 0xb0e   :  { %v1319_v55 = vsel %vm983_vm10, %v1316_v47, -inf }
 0xb6c   :  { %v1377_v38 = vpop.xlane.xlu0 %1376 }
 0xb6d   :  { %v1378_v36 = vsub.f32 %v1372_v25, %v1377_v38 }
 0xb6f   :  { %v1379_v37 = vmul.f32 1.442695, %v1378_v36 }
 0xb71   :  { %4000 = vpow2.f32 %v1379_v37 }
 0xb77   :  { %v4001_v40 = vpop.eup %4000 }
 0xb78   :  { %v1381_v60 = vsel %vm983_vm10, %v4001_v40, 0.0 }
 0xb79   :  { %v1238_v43 = vpop.xlane.xlu1 %1237  ;;  %1382 = vadd.xlane.f32.xlu2 %v1381_v60 }
 0xb7a   :  { %v1239_v49 = vsub.f32 %v1233_v1, %v1238_v43 }
 0xb7c   :  { %v1240_v50 = vmul.f32 1.442695, %v1239_v49 }
 0xb7e   :  { %4002 = vpow2.f32 %v1240_v50 }
 0xb7f   :  { %v1456_v45 = vpop.permute.xlu0 %1455 }
 0xb80   :  { %3729 = vmatpush.xpose.msk.msra.mxu0 %vm112_vm1, %v1456_v45 }
 0xb84   :  { %v4003_v51 = vpop.eup %4002 }
 0xb85   :  { %v1242_v53 = vsel %vm983_vm10, %v4003_v51, 0.0 }
 0xb86   :  { %1243 = vadd.xlane.f32.xlu0 %v1242_v53 }
 0xb91   :  { %1453 = vrot.lane.b32.xlu2 %v4498_v26, %s4120_s17 }
 0xb99   :  { %3886 = vrot.lane.b32.xlu2 %v4472_v30, %s4121_s18 }
 0xbc2   :  { %1320 = vmax.xlane.f32.xlu2 %v1319_v55 }
 0xbda   :  { %3896 = vrot.lane.b32.xlu2 %v4524_v48, %s4122_s19 }
 0xbe2   :  { %1680 = vrot.lane.b32.xlu2 %v4304_v29, %s4122_s19 }
 0xbea   :  { %1686 = vrot.lane.b32.xlu2 %v4367_v54, %s4114_s7 }
 0xbec   :  { %v1383_v56 = vpop.xlane.xlu2 %1382 }
 0xbed   :  { %4004 = vrcp.f32 %v1383_v56  ;;  %v1395_v11 = vand.u32 2147483648, %v1383_v56  ;;  %v1393_v8 = vand.u32 2147483647, %v1383_v56  ;;  %vm1389_vm14 = vweird.f32 %v1383_v56 }
 0xbef   :  { %v1396_v3 = vor.u32 1.1754944e-38, %v1395_v11  ;;  %vm1394_vm2 = vcmp.eq.f32.partialorder %v1393_v8, 8.507059e+37 }
 0xbf3   :  { %v4005_v58 = vpop.eup %4004 }
 0xbf4   :  { %v1385_v26 = vmul.f32 %v4005_v58, %v1383_v56  ;;  %v1454_v59 = vpop.permute.xlu2 %1453  ;;  %vm1390_vm13 = vweird.f32 %v4005_v58 }
 0xbf5   :  { %3730 = vmatmul.msk.f32.vlgmr.msra.gmra.mxu0 %vm112_vm1, %v1454_v59  ;;  %vm1391_vm15 = vmor %vm1389_vm14, %vm1390_vm13 }
 0xbf6   :  { %v1386_v30 = vsub.f32 1.0, %v1385_v26 }
 0xbf8   :  { %v1387_v62 = vmul.f32 %v4005_v58, %v1386_v30 }
 0xbf9   :  { %v1244_v46 = vpop.xlane.xlu0 %1243 }
 0xbfa   :  { %v1388_v9 = vadd.f32 %v4005_v58, %v1387_v62  ;;  %4006 = vrcp.f32 %v1244_v46  ;;  %v1256_v21 = vand.u32 2147483648, %v1244_v46  ;;  %v1254_v23 = vand.u32 2147483647, %v1244_v46 }
 0xbfb   :  { %vm1250_vm4 = vweird.f32 %v1244_v46 }
 0xbfc   :  { %v1392_v13 = vsel %vm1391_vm15, %v4005_v58, %v1388_v9  ;;  %v3887_v10 = vpop.permute.xlu2 %3886  ;;  %v1257_v24 = vor.u32 1.1754944e-38, %v1256_v21  ;;  %vm1255_vm6 = vcmp.eq.f32.partialorder %v1254_v23, 8.507059e+37 }
 0xbfd   :  { %v3888_v4 = vunpack.i.l.bf16 %v3887_v10  ;;  %v1397_v7 = vsel %vm1394_vm2, %v1396_v3, %v1392_v13  ;;  %v3889_v19 = vunpack.i.h.bf16 %v3887_v10 }
 0xbfe   :  { %v1398_v16 = vmul.f32 %v4001_v40, %v1397_v7 }
 0xbff   :  { %1283 = vmatpush.msra.mxu3 %v3888_v4 }
 0xc00   :  { %v4007_v18 = vpop.eup %4006  ;;  %3726 = vmatmul.msk.f32.vlgmr.msrb.gmra.mxu2 %vm983_vm10, %v1398_v16 }
 0xc01   :  { %v1246_v12 = vmul.f32 %v4007_v18, %v1244_v46  ;;  %1284 = vmatpush.msra.mxu3 %v3889_v19  ;;  %vm1251_vm3 = vweird.f32 %v4007_v18 }
 0xc02   :  { %vm1252_vm5 = vmor %vm1250_vm4, %vm1251_vm3 }
 0xc03   :  { %1447 = vmatpush.msrb.mxu3 %v4520_v44  ;;  %v1247_v20 = vsub.f32 1.0, %v1246_v12 }
 0xc05   :  { %1448 = vmatpush.msrb.mxu3 %v4516_v34  ;;  %v1248_v42 = vmul.f32 %v4007_v18, %v1247_v20 }
 0xc07   :  { %v1249_v5 = vadd.f32 %v4007_v18, %v1248_v42 }
 0xc08   :  { %3734 = vmatmul.msk.f32.vlgmr.msra.gmra.mxu2 %vm112_vm1, %v4543_v0 }
 0xc09   :  { %v1253_v28 = vsel %vm1252_vm5, %v4007_v18, %v1249_v5 }
 0xc0a   :  { %v1258_v27 = vsel %vm1255_vm6, %v1257_v24, %v1253_v28 }
 0xc0b   :  { %v1259_v17 = vmul.f32 %v4003_v51, %v1258_v27 }
 0xc0d   :  { %3719 = vmatmul.msk.f32.vlgmr.msra.gmra.mxu3 %vm983_vm10, %v1259_v17  ;;  %v1116_v17 = vadd.f32 %v4554_v33, %v4509_v39 }
 0xc35   :  { %v1321_v44 = vpop.xlane.xlu2 %1320 }
 0xc36   :  { %v1322_v57 = vsub.f32 %v1316_v47, %v1321_v44 }
 0xc38   :  { %v1323_v32 = vmul.f32 1.442695, %v1322_v57 }
 0xc3a   :  { %4008 = vpow2.f32 %v1323_v32 }
 0xc3d   :  { %v3897_v34 = vpop.permute.xlu2 %3896 }
 0xc3e   :  { %v3898_v25 = vunpack.i.l.bf16 %v3897_v34  ;;  %v3899_v1 = vunpack.i.h.bf16 %v3897_v34 }
 0xc40   :  { %v4009_v35 = vpop.eup %4008  ;;  %1532 = vmatpush.msrb.mxu1 %v3898_v25 }
 0xc41   :  { %v1325_v31 = vsel %vm983_vm10, %v4009_v35, 0.0 }
 0xc42   :  { %1326 = vadd.xlane.f32.xlu0 %v1325_v31  ;;  %1533 = vmatpush.msrb.mxu1 %v3899_v1 }
 0xc72   :  { %v1482_v37 = vpop.f32.mrf.mxu0 }
 0xc73   :  { %v1485_v40 = vsel %vm983_vm10, %v1482_v37, -inf }
 0xc83   :  { %v4584_v0 = vpop.f32.mrf.mxu2 }
 0xc8b   :  { %v1568_v38 = vpop.f32.mrf.mxu2 }
 0xc8c   :  { %v1571_v36 = vsel %vm983_vm10, %v1568_v38, -inf }
 0xc8d   :  { %1572 = vmax.xlane.f32.xlu1 %v1571_v36 }
 0xc90   :  { %v1286_v32 = vpop.f32.mrf.mxu3 }
 0xc95   :  { %1486 = vmax.xlane.f32.xlu1 %v1485_v40 }
 0xcb5   :  { %v1327_v60 = vpop.xlane.xlu0 %1326 }
 0xcb6   :  { %4010 = vrcp.f32 %v1327_v60  ;;  %v1339_v45 = vand.u32 2147483648, %v1327_v60  ;;  %v1337_v53 = vand.u32 2147483647, %v1327_v60  ;;  %vm1333_vm8 = vweird.f32 %v1327_v60 }
 0xcb8   :  { %v1340_v55 = vor.u32 1.1754944e-38, %v1339_v45  ;;  %vm1338_vm11 = vcmp.eq.f32.partialorder %v1337_v53, 8.507059e+37  ;;  %v45_v53 = vld [vmem:[%s5161_s1 + $0x78] sm:$0xff] }
 0xcb9   :  { %1709 = vmatpush.msra.mxu1 %v45_v53 }
 0xcbc   :  { %v4011_v43 = vpop.eup %4010 }
 0xcbd   :  { %v1329_v49 = vmul.f32 %v4011_v43, %v1327_v60  ;;  %vm1334_vm7 = vweird.f32 %v4011_v43 }
 0xcbe   :  { %vm1335_vm9 = vmor %vm1333_vm8, %vm1334_vm7 }
 0xcbf   :  { %v1330_v50 = vsub.f32 1.0, %v1329_v49 }
 0xcc1   :  { %v1331_v51 = vmul.f32 %v4011_v43, %v1330_v50 }
 0xcc3   :  { %v1332_v47 = vadd.f32 %v4011_v43, %v1331_v51 }
 0xcc5   :  { %v1336_v56 = vsel %vm1335_vm9, %v4011_v43, %v1332_v47  ;;  %v37_v47 = vld [vmem:[%s5161_s1 + $0x38] sm:$0xff]  ;;  %vm1734_vm9 = vcmask 523264  }
 0xcc6   :  { %v1341_v58 = vsel %vm1338_vm11, %v1340_v55, %v1336_v56  ;;  %v33_v55 = vld [vmem:[%s5161_s1 + $0x18] sm:$0xff] }
 0xcc7   :  { %v1342_v26 = vmul.f32 %v4009_v35, %v1341_v58  ;;  %v1203_v35 = vadd.f32 %v4556_v15, %v1116_v17 }
 0xcc9   :  { %3727 = vmatmul.msk.f32.vlgmr.msrb.gmra.mxu3 %vm983_vm10, %v1342_v26  ;;  %v1289_v40 = vadd.f32 %v1286_v32, %v1203_v35 }
 0xd00   :  { %v1573_v59 = vpop.xlane.xlu1 %1572 }
 0xd01   :  { %v1574_v30 = vsub.f32 %v1568_v38, %v1573_v59 }
 0xd03   :  { %v1575_v11 = vmul.f32 1.442695, %v1574_v30 }
 0xd05   :  { %4012 = vpow2.f32 %v1575_v11 }
 0xd08   :  { %v1487_v62 = vpop.xlane.xlu1 %1486 }
 0xd09   :  { %v1488_v8 = vsub.f32 %v1482_v37, %v1487_v62 }
 0xd0b   :  { %v4013_v46 = vpop.eup %4012  ;;  %v1489_v9 = vmul.f32 1.442695, %v1488_v8 }
 0xd0c   :  { %v1577_v3 = vsel %vm983_vm10, %v4013_v46, 0.0 }
 0xd0d   :  { %4014 = vpow2.f32 %v1489_v9  ;;  %1578 = vadd.xlane.f32.xlu1 %v1577_v3 }
 0xd13   :  { %v4015_v13 = vpop.eup %4014 }
 0xd14   :  { %v1491_v10 = vsel %vm983_vm10, %v4015_v13, 0.0 }
 0xd15   :  { %1492 = vadd.xlane.f32.xlu0 %v1491_v10 }
 0xd26   :  { %3891 = vrot.lane.b32.xlu1 %v4524_v48, %s4121_s18 }
 0xd29   :  { %1625 = vrot.lane.b32.xlu0 %v4297_v41, %s4121_s18 }
 0xd4c   :  { %v1450_v11 = vpop.f32.mrf.mxu3 }
 0xd4d   :  { %v1451_v9 = vadd.f32 %v1450_v11, %v4584_v0 }
 0xd80   :  { %v1579_v4 = vpop.xlane.xlu1 %1578 }
 0xd81   :  { %4016 = vrcp.f32 %v1579_v4  ;;  %vm1585_vm13 = vweird.f32 %v1579_v4  ;;  %v1591_v5 = vand.u32 2147483648, %v1579_v4  ;;  %v1589_v48 = vand.u32 2147483647, %v1579_v4 }
 0xd83   :  { %v1592_v34 = vor.u32 1.1754944e-38, %v1591_v5  ;;  %vm1590_vm4 = vcmp.eq.f32.partialorder %v1589_v48, 8.507059e+37 }
 0xd87   :  { %v4017_v7 = vpop.eup %4016 }
 0xd88   :  { %v1581_v16 = vmul.f32 %v4017_v7, %v1579_v4  ;;  %v1493_v19 = vpop.xlane.xlu0 %1492  ;;  %vm1586_vm12 = vweird.f32 %v4017_v7 }
 0xd89   :  { %4018 = vrcp.f32 %v1493_v19  ;;  %v1505_v24 = vand.u32 2147483648, %v1493_v19  ;;  %v1503_v27 = vand.u32 2147483647, %v1493_v19  ;;  %vm1587_vm15 = vmor %vm1585_vm13, %vm1586_vm12  ;;  %vm1499_vm2 = vweird.f32 %v1493_v19 }
 0xd8a   :  { %v1582_v18 = vsub.f32 1.0, %v1581_v16 }
 0xd8b   :  { %v1506_v25 = vor.u32 1.1754944e-38, %v1505_v24  ;;  %vm1504_vm5 = vcmp.eq.f32.partialorder %v1503_v27, 8.507059e+37 }
 0xd8c   :  { %v1583_v12 = vmul.f32 %v4017_v7, %v1582_v18 }
 0xd8e   :  { %v1584_v42 = vadd.f32 %v4017_v7, %v1583_v12  ;;  %v1681_v12 = vpop.permute.xlu2 %1680 }
 0xd8f   :  { %v4019_v20 = vpop.eup %4018 }
 0xd90   :  { %v1495_v21 = vmul.f32 %v4019_v20, %v1493_v19  ;;  %vm1500_vm14 = vweird.f32 %v4019_v20  ;;  %v1588_v44 = vsel %vm1587_vm15, %v4017_v7, %v1584_v42 }
 0xd91   :  { %vm1501_vm3 = vmor %vm1499_vm2, %vm1500_vm14  ;;  %v1593_v38 = vsel %vm1590_vm4, %v1592_v34, %v1588_v44 }
 0xd92   :  { %v1496_v23 = vsub.f32 1.0, %v1495_v21  ;;  %v1594_v49 = vmul.f32 %v4013_v46, %v1593_v38 }
 0xd94   :  { %v1497_v28 = vmul.f32 %v4019_v20, %v1496_v23 }
 0xd96   :  { %v1498_v57 = vadd.f32 %v4019_v20, %v1497_v28  ;;  %v1687_v27 = vpop.permute.xlu2 %1686 }
 0xd98   :  { %v1502_v1 = vsel %vm1501_vm3, %v4019_v20, %v1498_v57  ;;  %v3892_v31 = vpop.permute.xlu1 %3891 }
 0xd99   :  { %v1507_v36 = vsel %vm1504_vm5, %v1506_v25, %v1502_v1  ;;  %v3893_v37 = vunpack.i.l.bf16 %v3892_v31  ;;  %v3894_v43 = vunpack.i.h.bf16 %v3892_v31 }
 0xd9a   :  { %v1508_v60 = vmul.f32 %v4015_v13, %v1507_v36 }
 0xd9b   :  { %1618 = vmatpush.msra.mxu3 %v3893_v37  ;;  %v1626_v39 = vpop.permute.xlu0 %1625 }
 0xd9c   :  { %v1628_v33 = vadd.f32 %v1626_v39, %v1289_v40  ;;  %3731 = vmatmul.msk.f32.vlgmr.msrb.gmra.mxu1 %vm983_vm10, %v1508_v60 }
 0xd9d   :  { %1619 = vmatpush.msra.mxu3 %v3894_v43 }
 0xd9e   :  { %v1630_v50 = vadd.f32 %v1628_v33, %v4379_v61  ;;  %3735 = vmatmul.msk.f32.vlgmr.msra.gmra.mxu3 %vm983_vm10, %v1594_v49  ;;  %v41_v61 = vld [vmem:[%s5161_s1 + $0x58] sm:$0xff] }
 0xd9f   :  { %1710 = vmatpush.msra.mxu1 %v41_v61 }
 0xda0   :  { %v1632_v15 = vsel %vm50_vm0, %v1630_v50, 0.0  ;;  %v1640_v45 = vmul.f32 %v1630_v50, %v1630_v50 }
 0xda1   :  { %1633 = vadd.xlane.f32.xlu1 %v1632_v15  ;;  %1711 = vmatpush.msra.mxu1 %v37_v47 }
 0xda2   :  { %v1642_v51 = vsel %vm50_vm0, %v1640_v45, 0.0 }
 0xda3   :  { %1643 = vadd.xlane.f32.xlu0 %v1642_v51  ;;  %1712 = vmatpush.msra.mxu1 %v33_v55 }
 0xdb7   :  { %1732 = vrot.lane.b32.xlu0 %v45_v53, %s4122_s19 }
 0xdbf   :  { %1726 = vrot.lane.b32.xlu0 %v33_v55, %s4122_s19 }
 0xe14   :  { %v1634_v56 = vpop.xlane.xlu1 %1633 }
 0xe15   :  { %v1638_v58 = vmul.f32 %v1634_v56, %v4344_v22 }
 0xe16   :  { %v1644_v26 = vpop.xlane.xlu0 %1643 }
 0xe17   :  { %v1650_v59 = vmul.f32 %v1638_v58, %v1638_v58  ;;  %v1648_v30 = vmul.f32 %v1644_v26, %v4344_v22  ;;  %v1654_v24 = vsub.f32 %v1630_v50, %v1638_v58 }
 0xe19   :  { %v1652_v62 = vsub.f32 %v1648_v30, %v1650_v59  ;;  %v1535_v46 = vpop.f32.mrf.mxu1 }
 0xe1a   :  { %v1538_v3 = vadd.f32 %v1535_v46, %v1451_v9  ;;  %v3756_v46 = vld [vmem:[%s5161_s1 + $0xe0] sm:$0xff] }
 0xe1b   :  { %v1656_v8 = vadd.f32 1e-05, %v1652_v62  ;;  %1901 = vmatpush.msrb.mxu3 %v3756_v46  ;;  %v3752_v9 = vld [vmem:[%s5161_s1 + $0xc0] sm:$0xff] }
 0xe1d   :  { %4020 = vrsqrt.f32 %v1656_v8  ;;  %vm1664_vm7 = vweird.f32 %v1656_v8  ;;  %1902 = vmatpush.msrb.mxu3 %v3752_v9 }
 0xe21   :  { %v1621_v13 = vpop.f32.mrf.mxu3 }
 0xe22   :  { %v1624_v10 = vadd.f32 %v1621_v13, %v1538_v3  ;;  %v4659_v3 = vld [vmem:[%s5161_s1 + $0xd0] sm:$0xff]  ;;  %v3748_v13 = vld [vmem:[%s5161_s1 + $0xa0] sm:$0xff] }
 0xe23   :  { %v4021_v4 = vpop.eup %4020  ;;  %1903 = vmatpush.msrb.mxu3 %v3748_v13 }
 0xe24   :  { %v1659_v7 = vmul.f32 %v4021_v4, %v1656_v8  ;;  %v1629_v16 = vadd.f32 %v1626_v39, %v1624_v10  ;;  %vm1665_vm6 = vweird.f32 %v4021_v4 }
 0xe25   :  { %vm1666_vm8 = vmor %vm1664_vm7, %vm1665_vm6 }
 0xe26   :  { %v1660_v19 = vmul.f32 %v4021_v4, %v1659_v7  ;;  %v1631_v18 = vadd.f32 %v1629_v16, %v4486_v6  ;;  %v3744_v7 = vld [vmem:[%s5161_s1 + $0x80] sm:$0xff] }
 0xe27   :  { %1904 = vmatpush.msrb.mxu3 %v3744_v7 }
 0xe28   :  { %v1661_v20 = vmul.f32 0.5, %v1660_v19  ;;  %v1635_v21 = vsel %vm50_vm0, %v1631_v18, 0.0  ;;  %v1641_v42 = vmul.f32 %v1631_v18, %v1631_v18 }
 0xe29   :  { %1636 = vadd.xlane.f32.xlu2 %v1635_v21  ;;  %v1733_v44 = vpop.permute.xlu0 %1732 }
 0xe2a   :  { %v1662_v23 = vsub.f32 1.5, %v1661_v20  ;;  %v1645_v5 = vsel %vm50_vm0, %v1641_v42, 0.0  ;;  %3738 = vmatpush.xpose.msk.msrb.mxu1 %vm1734_vm9, %v1733_v44 }
 0xe2b   :  { %1646 = vadd.xlane.f32.xlu1 %v1645_v5 }
 0xe2c   :  { %v1663_v0 = vmul.f32 %v4021_v4, %v1662_v23 }
 0xe2e   :  { %v1667_v48 = vsel %vm1666_vm8, %v4021_v4, %v1663_v0  ;;  %v4668_v4 = vld [vmem:[%s5161_s1 + $0xb0] sm:$0xff] }
 0xe2f   :  { %v1678_v28 = vmul.f32 %v1667_v48, %v1654_v24 }
 0xe31   :  { %v1683_v17 = vmul.f32 %v1681_v12, %v1678_v28  ;;  %v1727_v53 = vpop.permute.xlu0 %1726 }
 0xe33   :  { %v1689_v6 = vadd.f32 %v1687_v27, %v1683_v17 }
 0xe35   :  { %3736 = vmatmul.msk.f32.vlgmr.msra.gmra.mxu1 %vm50_vm0, %v1689_v6 }
 0xe41   :  { %1728 = vrot.lane.b32.xlu2 %v37_v47, %s4122_s19 }
 0xe44   :  { %1730 = vrot.lane.b32.xlu1 %v41_v61, %s4122_s19 }
 0xe49   :  { %1822 = vrot.lane.b32.xlu2 %v4304_v29, %s4121_s18 }
 0xe51   :  { %1827 = vrot.lane.b32.xlu2 %v4367_v54, %s4122_s19 }
 0xe9c   :  { %v1637_v57 = vpop.xlane.xlu2 %1636 }
 0xe9d   :  { %v1639_v32 = vmul.f32 %v1637_v57, %v4344_v22 }
 0xe9e   :  { %v1647_v34 = vpop.xlane.xlu1 %1646 }
 0xe9f   :  { %v1651_v25 = vmul.f32 %v1639_v32, %v1639_v32  ;;  %v1649_v35 = vmul.f32 %v1647_v34, %v4344_v22  ;;  %v1655_v43 = vsub.f32 %v1631_v18, %v1639_v32  ;;  %v4678_v18 = vld [vmem:[%s5161_s1 + $0x90] sm:$0xff] }
 0xea1   :  { %v1653_v1 = vsub.f32 %v1649_v35, %v1651_v25 }
 0xea3   :  { %v1657_v31 = vadd.f32 1e-05, %v1653_v1 }
 0xea4   :  { %v1729_v50 = vpop.permute.xlu2 %1728 }
 0xea5   :  { %4022 = vrsqrt.f32 %v1657_v31  ;;  %vm1674_vm12 = vweird.f32 %v1657_v31 }
 0xeab   :  { %v4023_v38 = vpop.eup %4022 }
 0xeac   :  { %v1669_v36 = vmul.f32 %v4023_v38, %v1657_v31  ;;  %vm1675_vm11 = vweird.f32 %v4023_v38 }
 0xead   :  { %vm1676_vm13 = vmor %vm1674_vm12, %vm1675_vm11 }
 0xeae   :  { %v1670_v37 = vmul.f32 %v4023_v38, %v1669_v36  ;;  %v4690_v36 = vld [vmem:[%s5162_s0 + $0x10] sm:$0xff] }
 0xeb0   :  { %v1671_v40 = vmul.f32 0.5, %v1670_v37 }
 0xeb2   :  { %v1672_v60 = vsub.f32 1.5, %v1671_v40  ;;  %v1714_v51 = vpop.f32.mrf.mxu1 }
 0xeb3   :  { %v1715_v61 = vadd.f32 %v1714_v51, %v4297_v41 }
 0xeb4   :  { %v1673_v54 = vmul.f32 %v4023_v38, %v1672_v60 }
 0xeb5   :  { %v1720_v47 = vmax.f32 %v1715_v61, 0.0 }
 0xeb6   :  { %v1731_v39 = vpop.permute.xlu1 %1730  ;;  %v1677_v33 = vsel %vm1676_vm13, %v4023_v38, %v1673_v54 }
 0xeb7   :  { %3739 = vmatpush.xpose.msk.msrb.mxu1 %vm1734_vm9, %v1731_v39  ;;  %v1679_v49 = vmul.f32 %v1677_v33, %v1655_v43 }
 0xeb9   :  { %v1684_v15 = vmul.f32 %v1681_v12, %v1679_v49 }
 0xebb   :  { %v1690_v45 = vadd.f32 %v1687_v27, %v1684_v15  ;;  %3740 = vmatpush.xpose.msk.msrb.mxu1 %vm1734_vm9, %v1729_v50 }
 0xebd   :  { %3737 = vmatmul.msk.f32.gmra.mxu1 %vm50_vm0, %v1690_v45 }
 0xebf   :  { %3741 = vmatpush.xpose.msk.msrb.mxu1 %vm1734_vm9, %v1727_v53 }
 0xec5   :  { %3742 = vmatmul.msk.f32.vlgmr.msrb.gmra.mxu1 %vm1734_vm9, %v1720_v47 }
 0xf3a   :  { %v1717_v55 = vpop.f32.mrf.mxu1 }
 0xf3b   :  { %v1718_v56 = vadd.f32 %v1717_v55, %v4297_v41  ;;  %v4650_v41 = vld [vmem:[%s5161_s1 + $0xf0] sm:$0xff] }
 0xf3c   :  { %1872 = vmatpush.msrb.mxu2 %v4650_v41 }
 0xf3d   :  { %v1721_v58 = vmax.f32 %v1718_v56, 0.0 }
 0xf3e   :  { %1873 = vmatpush.msrb.mxu2 %v4659_v3 }
 0xf3f   :  { %3743 = vmatmul.msk.f32.gmra.mxu1 %vm1734_vm9, %v1721_v58 }
 0xf40   :  { %1874 = vmatpush.msrb.mxu2 %v4668_v4 }
 0xf42   :  { %v1766_v26 = vpop.f32.mrf.mxu1  ;;  %1875 = vmatpush.msrb.mxu2 %v4678_v18 }
 0xf43   :  { %v1767_v59 = vadd.f32 %v1766_v26, %v4304_v29 }
 0xf45   :  { %v1772_v30 = vadd.f32 %v1767_v59, %v1689_v6  ;;  %v1823_v6 = vpop.permute.xlu2 %1822  ;;  %v4706_v59 = vld [vmem:[%s5162_s0 + $0x18] sm:$0xff] }
 0xf47   :  { %v1774_v11 = vsel %vm50_vm0, %v1772_v30, 0.0  ;;  %v1782_v62 = vmul.f32 %v1772_v30, %v1772_v30 }
 0xf48   :  { %1775 = vadd.xlane.f32.xlu0 %v1774_v11  ;;  %v4714_v11 = vld [vmem:[%s5163_s2 + $0x4] sm:$0xf] }
 0xf49   :  { %v1784_v8 = vsel %vm50_vm0, %v1782_v62, 0.0  ;;  %v4717_v62 = vperm.slane %v4714_v11, 0 }
 0xf4a   :  { %1785 = vadd.xlane.f32.xlu1 %v1784_v8 }
 0xf4d   :  { %v1828_v1 = vpop.permute.xlu2 %1827 }
 0xfbb   :  { %v1776_v10 = vpop.xlane.xlu0 %1775 }
 0xfbc   :  { %v1780_v16 = vmul.f32 %v1776_v10, %v4344_v22  ;;  %v1769_v19 = vpop.f32.mrf.mxu1 }
 0xfbd   :  { %v1770_v12 = vadd.f32 %v1769_v19, %v4304_v29  ;;  %v1786_v20 = vpop.xlane.xlu1 %1785 }
 0xfbe   :  { %v1792_v21 = vmul.f32 %v1780_v16, %v1780_v16  ;;  %v1790_v42 = vmul.f32 %v1786_v20, %v4344_v22  ;;  %v1796_v34 = vsub.f32 %v1772_v30, %v1780_v16 }
 0xfbf   :  { %v1773_v23 = vadd.f32 %v1770_v12, %v1690_v45 }
 0xfc0   :  { %v1794_v5 = vsub.f32 %v1790_v42, %v1792_v21 }
 0xfc1   :  { %v1777_v0 = vsel %vm50_vm0, %v1773_v23, 0.0  ;;  %v1783_v24 = vmul.f32 %v1773_v23, %v1773_v23 }
 0xfc2   :  { %v1798_v48 = vadd.f32 1e-05, %v1794_v5  ;;  %1778 = vadd.xlane.f32.xlu2 %v1777_v0 }
 0xfc3   :  { %v1787_v28 = vsel %vm50_vm0, %v1783_v24, 0.0 }
 0xfc4   :  { %4024 = vrsqrt.f32 %v1798_v48  ;;  %1788 = vadd.xlane.f32.xlu0 %v1787_v28  ;;  %vm1806_vm15 = vweird.f32 %v1798_v48 }
 0xfca   :  { %v4025_v27 = vpop.eup %4024 }
 0xfcb   :  { %v1801_v17 = vmul.f32 %v4025_v27, %v1798_v48  ;;  %vm1807_vm14 = vweird.f32 %v4025_v27 }
 0xfcc   :  { %vm1808_vm2 = vmor %vm1806_vm15, %vm1807_vm14 }
 0xfcd   :  { %v1802_v29 = vmul.f32 %v4025_v27, %v1801_v17 }
 0xfcf   :  { %v1803_v44 = vmul.f32 0.5, %v1802_v29 }
 0xfd1   :  { %v1804_v57 = vsub.f32 1.5, %v1803_v44 }
 0xfd3   :  { %v1805_v32 = vmul.f32 %v4025_v27, %v1804_v57 }
 0xfd5   :  { %v1809_v25 = vsel %vm1808_vm2, %v4025_v27, %v1805_v32 }
 0xfd6   :  { %v1820_v35 = vmul.f32 %v1809_v25, %v1796_v34 }
 0xfd8   :  { %v1825_v31 = vmul.f32 %v1823_v6, %v1820_v35 }
 0xfda   :  { %v4685_v38 = vadd.f32 %v1828_v1, %v1825_v31 }
 0xfdc   :  { %v1851_v37 = vadd.f32 %v4690_v36, %v4685_v38  ;;  %3763 = vmatmul.msk.f32.vlgmr.msrb.gmra.mxu3 %vm50_vm0, %v4685_v38 }
 0xfde   :  { %3761 = vmatmul.msk.f32.vlgmr.msrb.gmra.mxu2 %vm50_vm0, %v1851_v37 }
0x1035   :  { %v1779_v40 = vpop.xlane.xlu2 %1778 }
0x1036   :  { %v1781_v60 = vmul.f32 %v1779_v40, %v4344_v22 }
0x1037   :  { %v1789_v54 = vpop.xlane.xlu0 %1788 }
0x1038   :  { %v1793_v43 = vmul.f32 %v1781_v60, %v1781_v60  ;;  %v1791_v39 = vmul.f32 %v1789_v54, %v4344_v22  ;;  %v1797_v47 = vsub.f32 %v1773_v23, %v1781_v60 }
0x103a   :  { %v1795_v33 = vsub.f32 %v1791_v39, %v1793_v43 }
0x103c   :  { %v1799_v49 = vadd.f32 1e-05, %v1795_v33 }
0x103e   :  { %4026 = vrsqrt.f32 %v1799_v49  ;;  %vm1816_vm4 = vweird.f32 %v1799_v49 }
0x1044   :  { %v4027_v50 = vpop.eup %4026 }
0x1045   :  { %v1811_v15 = vmul.f32 %v4027_v50, %v1799_v49  ;;  %vm1817_vm3 = vweird.f32 %v4027_v50 }
0x1046   :  { %vm1818_vm5 = vmor %vm1816_vm4, %vm1817_vm3 }
0x1047   :  { %v1812_v45 = vmul.f32 %v4027_v50, %v1811_v15 }
0x1049   :  { %v1813_v51 = vmul.f32 0.5, %v1812_v45 }
0x104b   :  { %v1814_v53 = vsub.f32 1.5, %v1813_v51 }
0x104d   :  { %v1815_v61 = vmul.f32 %v4027_v50, %v1814_v53 }
0x104f   :  { %v1819_v55 = vsel %vm1818_vm5, %v4027_v50, %v1815_v61 }
0x1050   :  { %v1821_v56 = vmul.f32 %v1819_v55, %v1797_v47 }
0x1052   :  { %v1826_v58 = vmul.f32 %v1823_v6, %v1821_v56 }
0x1054   :  { %v4699_v26 = vadd.f32 %v1828_v1, %v1826_v58 }
0x1056   :  { %3764 = vmatmul.msk.f32.gmra.mxu3 %vm50_vm0, %v4699_v26  ;;  %v1852_v30 = vadd.f32 %v4706_v59, %v4699_v26 }
0x1058   :  { %3762 = vmatmul.msk.f32.gmra.mxu2 %vm50_vm0, %v1852_v30 }
0x105f   :  { %v1906_v9 = vpop.f32.mrf.mxu3 }
0x1061   :  { %v1877_v8 = vpop.f32.mrf.mxu2 }
0x1062   :  { %v1878_v46 = vadd.f32 %v1877_v8, %v4717_v62 }
0x1064   :  { %2067 = vrot.lane.b32.xlu2 %v1878_v46, %s4118_s11  ;;  %1963 = vrot.lane.b32.xlu0 %v1878_v46, %s4116_s9 }
0x1065   :  { %1965 = vrot.lane.b32.xlu1 %v1878_v46, %s4115_s8 }
0x106c   :  { %2016 = vrot.lane.b32.xlu2 %v1906_v9, %s4114_s7  ;;  %2065 = vrot.lane.b32.xlu0 %v1878_v46, %s4120_s17 }
0x1074   :  { %1913 = vrot.lane.b32.xlu2 %v1878_v46, %s4114_s7 }
0x107c   :  { %2146 = vrot.lane.b32.xlu2 %v1878_v46, %s4117_s10 }
0x10be   :  { %v2068_v13 = vpop.permute.xlu2 %2067 }
0x10bf   :  { %3771 = vmatpush.xpose.msk.msra.mxu1 %vm112_vm1, %v2068_v13 }
0x10c6   :  { %v2017_v10 = vpop.permute.xlu2 %2016 }
0x10c7   :  { %2037 = vmatpush.msra.mxu3 %v2017_v10 }
0x10ce   :  { %v1914_v7 = vpop.permute.xlu2 %1913 }
0x10cf   :  { %3765 = vmatpush.xpose.msk.msrb.mxu0 %vm112_vm1, %v1914_v7 }
0x10d2   :  { %3766 = vmatmul.msk.f32.vlgmr.msrb.gmra.mxu0 %vm112_vm1, %v1878_v46 }
0x10d3   :  { %2060 = vmatpush.msra.mxu0 %v1906_v9 }
0x10d6   :  { %v2147_v16 = vpop.permute.xlu2 %2146  ;;  %v1964_v19 = vpop.permute.xlu0 %1963 }
0x10d7   :  { %v1966_v12 = vpop.permute.xlu1 %1965  ;;  %3774 = vmatpush.xpose.msk.msrb.mxu3 %vm112_vm1, %v2147_v16 }
0x10d8   :  { %3767 = vmatpush.xpose.msk.msra.mxu2 %vm112_vm1, %v1966_v12 }
0x10d9   :  { %v4751_v48 = vpop.f32.mrf.mxu3 }
0x10db   :  { %3768 = vmatmul.msk.f32.vlgmr.msra.gmra.mxu2 %vm112_vm1, %v1964_v19  ;;  %v1880_v21 = vpop.f32.mrf.mxu2 }
0x10dc   :  { %v4737_v24 = vadd.f32 %v1880_v21, %v4717_v62 }
0x10de   :  { %v2066_v20 = vpop.permute.xlu0 %2065 }
0x10df   :  { %3772 = vmatmul.msk.f32.vlgmr.msra.gmra.mxu1 %vm112_vm1, %v2066_v20 }
0x114f   :  { %v1936_v40 = vpop.f32.mrf.mxu0 }
0x1150   :  { %v1939_v60 = vsel %vm112_vm1, %v1936_v40, -inf }
0x115c   :  { %v2090_v42 = vpop.f32.mrf.mxu1 }
0x115d   :  { %v2093_v23 = vsel %vm112_vm1, %v2090_v42, -inf }
0x115e   :  { %v1988_v5 = vpop.f32.mrf.mxu2  ;;  %2094 = vmax.xlane.f32.xlu2 %v2093_v23 }
0x115f   :  { %v1991_v0 = vsel %vm112_vm1, %v1988_v5, -inf }
0x1160   :  { %1992 = vmax.xlane.f32.xlu1 %v1991_v0 }
0x1176   :  { %2224 = vrot.lane.b32.xlu2 %v4737_v24, %s4114_s7 }
0x1179   :  { %2144 = vrot.lane.b32.xlu1 %v1878_v46, %s4119_s12 }
0x117e   :  { %2378 = vrot.lane.b32.xlu2 %v4737_v24, %s4118_s11 }
0x1181   :  { %2276 = vrot.lane.b32.xlu1 %v4737_v24, %s4115_s8 }
0x1186   :  { %2376 = vrot.lane.b32.xlu2 %v4737_v24, %s4120_s17 }
0x1189   :  { %2274 = vrot.lane.b32.xlu1 %v4737_v24, %s4116_s9 }
0x118e   :  { %2196 = vrot.lane.b32.xlu2 %v1906_v9, %s4121_s18 }
0x1196   :  { %2327 = vrot.lane.b32.xlu2 %v4751_v48, %s4114_s7 }
0x119e   :  { %2455 = vrot.lane.b32.xlu2 %v4737_v24, %s4119_s12 }
0x11d1   :  { %v2095_v28 = vpop.xlane.xlu2 %2094 }
0x11d2   :  { %v2096_v29 = vsub.f32 %v2090_v42, %v2095_v28 }
0x11d3   :  { %v1993_v27 = vpop.xlane.xlu1 %1992 }
0x11d4   :  { %v1994_v17 = vsub.f32 %v1988_v5, %v1993_v27  ;;  %v2097_v57 = vmul.f32 1.442695, %v2096_v29 }
0x11d6   :  { %v1995_v6 = vmul.f32 1.442695, %v1994_v17 }
0x11d8   :  { %4028 = vpow2.f32 %v1995_v6 }
0x11d9   :  { %v2225_v44 = vpop.permute.xlu2 %2224  ;;  %4030 = vpow2.f32 %v2097_v57 }
0x11da   :  { %3777 = vmatpush.xpose.msk.msrb.mxu1 %vm112_vm1, %v2225_v44 }
0x11dd   :  { %3778 = vmatmul.msk.f32.vlgmr.msrb.gmra.mxu1 %vm112_vm1, %v4737_v24 }
0x11de   :  { %v4029_v32 = vpop.eup %4028 }
0x11df   :  { %v1997_v34 = vsel %vm112_vm1, %v4029_v32, 0.0  ;;  %v4031_v35 = vpop.eup %4030 }
0x11e0   :  { %1998 = vadd.xlane.f32.xlu0 %v1997_v34  ;;  %v2099_v1 = vsel %vm112_vm1, %v4031_v35, 0.0 }
0x11e1   :  { %v2379_v25 = vpop.permute.xlu2 %2378 }
0x11e2   :  { %3783 = vmatpush.xpose.msk.msra.mxu1 %vm112_vm1, %v2379_v25 }
0x11e8   :  { %2100 = vadd.xlane.f32.xlu0 %v2099_v1 }
0x11e9   :  { %v2377_v31 = vpop.permute.xlu2 %2376 }
0x11ea   :  { %3784 = vmatmul.msk.f32.vlgmr.msra.gmra.mxu1 %vm112_vm1, %v2377_v31 }
0x11eb   :  { %v2145_v47 = vpop.permute.xlu1 %2144 }
0x11f1   :  { %v2197_v37 = vpop.permute.xlu2 %2196 }
0x11f2   :  { %2217 = vmatpush.msrb.mxu0 %v2197_v37 }
0x11f3   :  { %v2277_v20 = vpop.permute.xlu1 %2276 }
0x11fb   :  { %v2275_v23 = vpop.permute.xlu1 %2274 }
0x11fc   :  { %2117 = vrot.lane.b32.xlu0 %v1906_v9, %s4122_s19  ;;  %v2328_v9 = vpop.permute.xlu2 %2327 }
0x1226   :  { %1940 = vmax.xlane.f32.xlu0 %v1939_v60 }
0x1253   :  { %v1999_v54 = vpop.xlane.xlu0 %1998 }
0x1254   :  { %4032 = vrcp.f32 %v1999_v54  ;;  %v2011_v50 = vand.u32 2147483648, %v1999_v54  ;;  %v2009_v45 = vand.u32 2147483647, %v1999_v54  ;;  %vm2005_vm7 = vweird.f32 %v1999_v54 }
0x1256   :  { %v2012_v61 = vor.u32 1.1754944e-38, %v2011_v50  ;;  %vm2010_vm11 = vcmp.eq.f32.partialorder %v2009_v45, 8.507059e+37 }
0x125a   :  { %v4033_v43 = vpop.eup %4032 }
0x125b   :  { %v2001_v39 = vmul.f32 %v4033_v43, %v1999_v54  ;;  %v2101_v33 = vpop.xlane.xlu0 %2100  ;;  %vm2006_vm6 = vweird.f32 %v4033_v43 }
0x125c   :  { %4034 = vrcp.f32 %v2101_v33  ;;  %vm2007_vm8 = vmor %vm2005_vm7, %vm2006_vm6  ;;  %v2113_v46 = vand.u32 2147483648, %v2101_v33  ;;  %v2111_v10 = vand.u32 2147483647, %v2101_v33  ;;  %vm2107_vm13 = vweird.f32 %v2101_v33 }
0x125d   :  { %v2002_v49 = vsub.f32 1.0, %v2001_v39 }
0x125e   :  { %v2114_v16 = vor.u32 1.1754944e-38, %v2113_v46  ;;  %vm2112_vm15 = vcmp.eq.f32.partialorder %v2111_v10, 8.507059e+37 }
0x125f   :  { %v2003_v15 = vmul.f32 %v4033_v43, %v2002_v49 }
0x1261   :  { %v2004_v51 = vadd.f32 %v4033_v43, %v2003_v15 }
0x1262   :  { %v4035_v53 = vpop.eup %4034 }
0x1263   :  { %v2008_v55 = vsel %vm2007_vm8, %v4033_v43, %v2004_v51  ;;  %v2103_v56 = vmul.f32 %v4035_v53, %v2101_v33  ;;  %vm2108_vm12 = vweird.f32 %v4035_v53 }
0x1264   :  { %v2013_v58 = vsel %vm2010_vm11, %v2012_v61, %v2008_v55  ;;  %vm2109_vm14 = vmor %vm2107_vm13, %vm2108_vm12 }
0x1265   :  { %v2104_v30 = vsub.f32 1.0, %v2103_v56  ;;  %v2014_v8 = vmul.f32 %v4029_v32, %v2013_v58  ;;  %v4777_v32 = vpop.f32.mrf.mxu1 }
0x1267   :  { %v2105_v13 = vmul.f32 %v4035_v53, %v2104_v30  ;;  %3769 = vmatmul.msk.f32.vlgmr.msra.gmra.mxu3 %vm112_vm1, %v2014_v8 }
0x1268   :  { %2348 = vmatpush.msra.mxu3 %v2328_v9 }
0x1269   :  { %v2106_v7 = vadd.f32 %v4035_v53, %v2105_v13 }
0x126b   :  { %v2110_v19 = vsel %vm2109_vm14, %v4035_v53, %v2106_v7 }
0x126c   :  { %v2115_v12 = vsel %vm2112_vm15, %v2114_v16, %v2110_v19  ;;  %v4795_v19 = vpack.i.bf16 %v4659_v3, %v4650_v41 }
0x126d   :  { %v2116_v21 = vmul.f32 %v4031_v35, %v2115_v12  ;;  %v2401_v35 = vpop.f32.mrf.mxu1  ;;  %v4800_v12 = vperm.slane %v4714_v11, 2 }
0x126e   :  { %v2118_v42 = vpop.permute.xlu0 %2117  ;;  %v2404_v1 = vsel %vm112_vm1, %v2401_v35, -inf }
0x126f   :  { %2138 = vmatpush.msrb.mxu2 %v2118_v42  ;;  %3775 = vmatmul.msk.f32.vlgmr.msrb.gmra.mxu3 %vm112_vm1, %v2145_v47  ;;  %v2456_v42 = vpop.permute.xlu2 %2455 }
0x1270   :  { %3773 = vmatmul.msk.f32.vlgmr.msrb.gmra.mxu2 %vm112_vm1, %v2116_v21  ;;  %v4807_v21 = vperm.slane %v4714_v11, 1 }
0x1271   :  { %3779 = vmatpush.xpose.msk.msra.mxu2 %vm112_vm1, %v2277_v20  ;;  %v2250_v20 = vsel %vm112_vm1, %v4777_v32, -inf }
0x1278   :  { %3780 = vmatmul.msk.f32.vlgmr.msra.gmra.mxu2 %vm112_vm1, %v2275_v23 }
0x1299   :  { %v1941_v5 = vpop.xlane.xlu0 %1940 }
0x129a   :  { %v1942_v0 = vsub.f32 %v1936_v40, %v1941_v5 }
0x129c   :  { %v1943_v28 = vmul.f32 1.442695, %v1942_v0 }
0x129e   :  { %4036 = vpow2.f32 %v1943_v28 }
0x12a4   :  { %v4037_v27 = vpop.eup %4036 }
0x12a5   :  { %v1945_v17 = vsel %vm112_vm1, %v4037_v27, 0.0 }
0x12a6   :  { %1946 = vadd.xlane.f32.xlu0 %v1945_v17 }
0x12ea   :  { %v4772_v29 = vpop.f32.mrf.mxu3 }
0x12f2   :  { %v2169_v6 = vpop.f32.mrf.mxu3 }
0x12f3   :  { %v4774_v44 = vpop.f32.mrf.mxu2  ;;  %v2172_v57 = vsel %vm112_vm1, %v2169_v6, -inf }
0x12f4   :  { %2173 = vmax.xlane.f32.xlu1 %v2172_v57 }
0x12fb   :  { %v2299_v34 = vpop.f32.mrf.mxu2 }
0x12fc   :  { %v2302_v25 = vsel %vm112_vm1, %v2299_v34, -inf }
0x12fd   :  { %2303 = vmax.xlane.f32.xlu0 %v2302_v25 }
0x1305   :  { %2405 = vmax.xlane.f32.xlu0 %v2404_v1 }
0x1319   :  { %v1947_v31 = vpop.xlane.xlu0 %1946  ;;  %2536 = vrot.lane.b32.xlu0 %v4807_v21, %s4122_s19 }
0x131a   :  { %4038 = vrcp.f32 %v1947_v31  ;;  %v1959_v54 = vand.u32 2147483648, %v1947_v31  ;;  %v1957_v39 = vand.u32 2147483647, %v1947_v31  ;;  %vm1953_vm3 = vweird.f32 %v1947_v31 }
0x131c   :  { %v1960_v49 = vor.u32 1.1754944e-38, %v1959_v54  ;;  %vm1958_vm5 = vcmp.eq.f32.partialorder %v1957_v39, 8.507059e+37 }
0x1320   :  { %v4039_v37 = vpop.eup %4038 }
0x1321   :  { %v1949_v40 = vmul.f32 %v4039_v37, %v1947_v31  ;;  %vm1954_vm2 = vweird.f32 %v4039_v37  ;;  %3901 = vrot.lane.b32.xlu0 %v4795_v19, %s4121_s18 }
0x1322   :  { %vm1955_vm4 = vmor %vm1953_vm3, %vm1954_vm2 }
0x1323   :  { %v1950_v60 = vsub.f32 1.0, %v1949_v40 }
0x1325   :  { %v1951_v43 = vmul.f32 %v4039_v37, %v1950_v60 }
0x1327   :  { %v1952_v33 = vadd.f32 %v4039_v37, %v1951_v43 }
0x1329   :  { %v1956_v50 = vsel %vm1955_vm4, %v4039_v37, %v1952_v33 }
0x132a   :  { %v1961_v15 = vsel %vm1958_vm5, %v1960_v49, %v1956_v50 }
0x132b   :  { %v1962_v45 = vmul.f32 %v4037_v27, %v1961_v15 }
0x132d   :  { %3770 = vmatmul.msk.f32.vlgmr.msra.gmra.mxu0 %vm112_vm1, %v1962_v45 }
0x132e   :  { %2371 = vmatpush.msra.mxu0 %v4751_v48 }
0x1367   :  { %v2174_v51 = vpop.xlane.xlu1 %2173 }
0x1368   :  { %v2175_v53 = vsub.f32 %v2169_v6, %v2174_v51 }
0x136a   :  { %v2176_v61 = vmul.f32 1.442695, %v2175_v53 }
0x136c   :  { %4040 = vpow2.f32 %v2176_v61 }
0x1370   :  { %v2304_v47 = vpop.xlane.xlu0 %2303 }
0x1371   :  { %v2305_v55 = vsub.f32 %v2299_v34, %v2304_v47 }
0x1372   :  { %v4041_v56 = vpop.eup %4040 }
0x1373   :  { %v2306_v58 = vmul.f32 1.442695, %v2305_v55  ;;  %v2178_v30 = vsel %vm112_vm1, %v4041_v56, 0.0 }
0x1374   :  { %2179 = vadd.xlane.f32.xlu1 %v2178_v30 }
0x1375   :  { %4042 = vpow2.f32 %v2306_v58 }
0x1378   :  { %v2406_v8 = vpop.xlane.xlu0 %2405 }
0x1379   :  { %v2407_v46 = vsub.f32 %v2401_v35, %v2406_v8 }
0x137b   :  { %v4043_v9 = vpop.eup %4042  ;;  %v2408_v13 = vmul.f32 1.442695, %v2407_v46 }
0x137c   :  { %v2308_v10 = vsel %vm112_vm1, %v4043_v9, 0.0 }
0x137d   :  { %4044 = vpow2.f32 %v2408_v13  ;;  %2309 = vadd.xlane.f32.xlu1 %v2308_v10 }
0x1383   :  { %v4785_v7 = vpop.eup %4044 }
0x1384   :  { %v2410_v16 = vsel %vm112_vm1, %v4785_v7, 0.0 }
0x1385   :  { %2411 = vadd.xlane.f32.xlu2 %v2410_v16 }
0x1396   :  { %2457 = vrot.lane.b32.xlu1 %v4737_v24, %s4117_s10 }
0x139d   :  { %2428 = vrot.lane.b32.xlu2 %v4751_v48, %s4122_s19 }
0x13a5   :  { %3911 = vrot.lane.b32.xlu2 %v4795_v19, %s4122_s19 }
0x13ad   :  { %2593 = vrot.lane.b32.xlu2 %v4800_v12, %s4114_s7 }
0x13d6   :  { %2251 = vmax.xlane.f32.xlu2 %v2250_v20  ;;  %v2062_v20 = vpop.f32.mrf.mxu0 }
0x13e7   :  { %v2180_v24 = vpop.xlane.xlu1 %2179 }
0x13e8   :  { %4046 = vrcp.f32 %v2180_v24  ;;  %v2192_v0 = vand.u32 2147483648, %v2180_v24  ;;  %v2190_v27 = vand.u32 2147483647, %v2180_v24  ;;  %vm2186_vm7 = vweird.f32 %v2180_v24 }
0x13ea   :  { %v2193_v6 = vor.u32 1.1754944e-38, %v2192_v0  ;;  %vm2191_vm11 = vcmp.eq.f32.partialorder %v2190_v27, 8.507059e+37 }
0x13ee   :  { %v4047_v41 = vpop.eup %4046  ;;  %2620 = vrot.lane.b32.xlu2 %v4717_v62, %s4122_s19 }
0x13ef   :  { %v2182_v3 = vmul.f32 %v4047_v41, %v2180_v24  ;;  %vm2187_vm6 = vweird.f32 %v4047_v41  ;;  %v2063_v24 = vadd.f32 %v2062_v20, %v4772_v29  ;;  %v3915_v29 = vpack.i.bf16 %v4678_v18, %v4668_v4 }
0x13f0   :  { %v2310_v23 = vpop.xlane.xlu1 %2309  ;;  %vm2188_vm8 = vmor %vm2186_vm7, %vm2187_vm6 }
0x13f1   :  { %v2183_v5 = vsub.f32 1.0, %v2182_v3  ;;  %4048 = vrcp.f32 %v2310_v23  ;;  %v2322_v40 = vand.u32 2147483648, %v2310_v23  ;;  %v2320_v54 = vand.u32 2147483647, %v2310_v23 }
0x13f2   :  { %vm2316_vm13 = vweird.f32 %v2310_v23 }
0x13f3   :  { %v2184_v28 = vmul.f32 %v4047_v41, %v2183_v5  ;;  %v2323_v33 = vor.u32 1.1754944e-38, %v2322_v40  ;;  %vm2321_vm15 = vcmp.eq.f32.partialorder %v2320_v54, 8.507059e+37 }
0x13f5   :  { %v2185_v17 = vadd.f32 %v4047_v41, %v2184_v28 }
0x13f7   :  { %v4049_v57 = vpop.eup %4048  ;;  %v2189_v34 = vsel %vm2188_vm8, %v4047_v41, %v2185_v17  ;;  %v2143_v41 = vadd.f32 %v4774_v44, %v2063_v24 }
0x13f8   :  { %v2194_v25 = vsel %vm2191_vm11, %v2193_v6, %v2189_v34  ;;  %v2312_v35 = vmul.f32 %v4049_v57, %v2310_v23  ;;  %v2412_v1 = vpop.xlane.xlu2 %2411  ;;  %vm2317_vm12 = vweird.f32 %v4049_v57  ;;  %v4823_v23 = vpop.permute.xlu0 %2536 }
0x13f9   :  { %4050 = vrcp.f32 %v2412_v1  ;;  %v2195_v37 = vmul.f32 %v4041_v56, %v2194_v25  ;;  %vm2318_vm14 = vmor %vm2316_vm13, %vm2317_vm12  ;;  %v2424_v61 = vand.u32 2147483648, %v2412_v1  ;;  %v2422_v55 = vand.u32 2147483647, %v2412_v1 }
0x13fa   :  { %v2313_v31 = vsub.f32 1.0, %v2312_v35  ;;  %vm2418_vm3 = vweird.f32 %v2412_v1 }
0x13fb   :  { %3776 = vmatmul.msk.f32.vlgmr.msrb.gmra.mxu0 %vm112_vm1, %v2195_v37  ;;  %v2425_v58 = vor.u32 1.1754944e-38, %v2424_v61  ;;  %vm2423_vm5 = vcmp.eq.f32.partialorder %v2422_v55, 8.507059e+37 }
0x13fc   :  { %v2314_v60 = vmul.f32 %v4049_v57, %v2313_v31 }
0x13fe   :  { %v2315_v43 = vadd.f32 %v4049_v57, %v2314_v60 }
0x13ff   :  { %v4051_v39 = vpop.eup %4050 }
0x1400   :  { %v2319_v49 = vsel %vm2318_vm14, %v4049_v57, %v2315_v43  ;;  %v2414_v50 = vmul.f32 %v4051_v39, %v2412_v1  ;;  %v2429_v15 = vpop.permute.xlu2 %2428  ;;  %vm2419_vm2 = vweird.f32 %v4051_v39  ;;  %v3902_v44 = vpop.permute.xlu0 %3901 }
0x1401   :  { %v2324_v45 = vsel %vm2321_vm15, %v2323_v33, %v2319_v49  ;;  %2449 = vmatpush.msrb.mxu2 %v2429_v15  ;;  %vm2420_vm4 = vmor %vm2418_vm3, %vm2419_vm2  ;;  %v3903_v17 = vunpack.i.l.bf16 %v3902_v44 }
0x1402   :  { %v2415_v51 = vsub.f32 1.0, %v2414_v50  ;;  %v2325_v53 = vmul.f32 %v4043_v9, %v2324_v45 }
0x1403   :  { %2679 = vmatpush.msra.mxu2 %v3903_v17 }
0x1404   :  { %v2416_v47 = vmul.f32 %v4051_v39, %v2415_v51  ;;  %3781 = vmatmul.msk.f32.vlgmr.msra.gmra.mxu3 %vm112_vm1, %v2325_v53 }
0x1406   :  { %v2417_v56 = vadd.f32 %v4051_v39, %v2416_v47 }
0x1408   :  { %v2421_v30 = vsel %vm2420_vm4, %v4051_v39, %v2417_v56  ;;  %v2458_v8 = vpop.permute.xlu1 %2457  ;;  %v3912_v46 = vpop.permute.xlu2 %3911  ;;  %v4848_v56 = vperm.slane %v4714_v11, 3 }
0x1409   :  { %v2426_v13 = vsel %vm2423_vm5, %v2425_v58, %v2421_v30  ;;  %3786 = vmatpush.xpose.msk.msrb.mxu3 %vm112_vm1, %v2458_v8  ;;  %v3914_v10 = vunpack.i.h.bf16 %v3912_v46  ;;  %v3913_v16 = vunpack.i.l.bf16 %v3912_v46 }
0x140a   :  { %v2427_v9 = vmul.f32 %v4785_v7, %v2426_v13 }
0x140b   :  { %2641 = vmatpush.msrb.mxu1 %v3913_v16 }
0x140c   :  { %3785 = vmatmul.msk.f32.vlgmr.msrb.gmra.mxu2 %vm112_vm1, %v2427_v9  ;;  %3787 = vmatmul.msk.f32.vlgmr.msrb.gmra.mxu3 %vm112_vm1, %v2456_v42 }
0x140d   :  { %2642 = vmatpush.msrb.mxu1 %v3914_v10 }
0x1410   :  { %v4835_v19 = vpop.permute.xlu2 %2593 }
0x1449   :  { %v2252_v6 = vpop.xlane.xlu2 %2251 }
0x144a   :  { %v2253_v57 = vsub.f32 %v4777_v32, %v2252_v6  ;;  %v4110_v6 = vld [vmem:[%s5162_s0 + $0x20] sm:$0xff] }
0x144c   :  { %v2254_v4 = vmul.f32 1.442695, %v2253_v57 }
0x144e   :  { %4052 = vpow2.f32 %v2254_v4 }
0x1454   :  { %v4840_v25 = vpop.eup %4052 }
0x1478   :  { %v2219_v3 = vpop.f32.mrf.mxu0 }
0x1479   :  { %v2222_v5 = vadd.f32 %v2219_v3, %v2143_v41 }
0x147b   :  { %v2539_v7 = vadd.f32 %v4823_v23, %v2222_v5 }
0x147d   :  { %v2541_v0 = vadd.f32 %v2539_v7, %v4685_v38  ;;  %v3904_v38 = vunpack.i.h.bf16 %v3902_v44  ;;  %v3753_v44 = vld [vmem:[%s5161_s1 + $0xc8] sm:$0xff] }
0x147f   :  { %v2543_v28 = vsel %vm50_vm0, %v2541_v0, 0.0  ;;  %v2551_v42 = vmul.f32 %v2541_v0, %v2541_v0  ;;  %2680 = vmatpush.msra.mxu2 %v3904_v38  ;;  %v3749_v38 = vld [vmem:[%s5161_s1 + $0xa8] sm:$0xff] }
0x1480   :  { %2544 = vadd.xlane.f32.xlu0 %v2543_v28 }
0x1481   :  { %v2553_v27 = vsel %vm50_vm0, %v2551_v42, 0.0 }
0x1482   :  { %2554 = vadd.xlane.f32.xlu1 %v2553_v27 }
0x1487   :  { %v4838_v34 = vpop.f32.mrf.mxu3 }
0x148f   :  { %v2480_v18 = vpop.f32.mrf.mxu3  ;;  %v4882_v17 = vpop.f32.mrf.mxu2 }
0x1490   :  { %v2483_v35 = vsel %vm112_vm1, %v2480_v18, -inf }
0x1494   :  { %3916 = vrot.lane.b32.xlu0 %v3915_v29, %s4122_s19 }
0x149b   :  { %3906 = vrot.lane.b32.xlu1 %v3915_v29, %s4121_s18  ;;  %v3757_v29 = vld [vmem:[%s5161_s1 + $0xe8] sm:$0xff] }
0x149c   :  { %2664 = vrot.lane.b32.xlu0 %v4717_v62, %s4121_s18  ;;  %v2256_v62 = vsel %vm112_vm1, %v4840_v25, 0.0  ;;  %2708 = vmatpush.msra.mxu3 %v3757_v29 }
0x149e   :  { %2709 = vmatpush.msra.mxu3 %v3753_v44 }
0x14a0   :  { %2710 = vmatpush.msra.mxu3 %v3749_v38 }
0x14c5   :  { %2484 = vmax.xlane.f32.xlu1 %v2483_v35 }
0x14c6   :  { %2257 = vadd.xlane.f32.xlu0 %v2256_v62  ;;  %v4112_v62 = vld [vmem:[%s5162_s0 + $0x30] sm:$0xff] }
0x14f3   :  { %v2545_v1 = vpop.xlane.xlu0 %2544 }
0x14f4   :  { %v2549_v31 = vmul.f32 %v2545_v1, %v4344_v22  ;;  %v4907_v1 = vpop.permute.xlu2 %2620 }
0x14f5   :  { %v2555_v37 = vpop.xlane.xlu1 %2554 }
0x14f6   :  { %v2561_v40 = vmul.f32 %v2549_v31, %v2549_v31  ;;  %v2559_v32 = vmul.f32 %v2555_v37, %v4344_v22  ;;  %v2565_v61 = vsub.f32 %v2541_v0, %v2549_v31 }
0x14f8   :  { %v2563_v60 = vsub.f32 %v2559_v32, %v2561_v40  ;;  %v4113_v32 = vld [vmem:[%s5162_s0 + $0x38] sm:$0xff] }
0x14fa   :  { %v2567_v54 = vadd.f32 1e-05, %v2563_v60 }
0x14fc   :  { %4054 = vrsqrt.f32 %v2567_v54  ;;  %vm2575_vm7 = vweird.f32 %v2567_v54 }
0x1502   :  { %v4055_v43 = vpop.eup %4054 }
0x1503   :  { %v2570_v39 = vmul.f32 %v4055_v43, %v2567_v54  ;;  %vm2576_vm6 = vweird.f32 %v4055_v43 }
0x1504   :  { %vm2577_vm8 = vmor %vm2575_vm7, %vm2576_vm6 }
0x1505   :  { %v2571_v33 = vmul.f32 %v4055_v43, %v2570_v39 }
0x1506   :  { %v3917_v49 = vpop.permute.xlu0 %3916 }
0x1507   :  { %v2572_v50 = vmul.f32 0.5, %v2571_v33  ;;  %v3919_v15 = vunpack.i.h.bf16 %v3917_v49  ;;  %v3918_v45 = vunpack.i.l.bf16 %v3917_v49 }
0x1509   :  { %v2573_v51 = vsub.f32 1.5, %v2572_v50  ;;  %2643 = vmatpush.msrb.mxu1 %v3918_v45 }
0x150b   :  { %v2574_v53 = vmul.f32 %v4055_v43, %v2573_v51  ;;  %2644 = vmatpush.msrb.mxu1 %v3919_v15 }
0x150d   :  { %v2578_v47 = vsel %vm2577_vm8, %v4055_v43, %v2574_v53  ;;  %v3907_v55 = vpop.permute.xlu1 %3906 }
0x150e   :  { %v2589_v58 = vmul.f32 %v2578_v47, %v2565_v61  ;;  %v3908_v30 = vunpack.i.l.bf16 %v3907_v55  ;;  %v3909_v46 = vunpack.i.h.bf16 %v3907_v55  ;;  %v2665_v11 = vpop.permute.xlu0 %2664 }
0x1510   :  { %v2596_v8 = vmul.f32 %v4835_v19, %v2589_v58  ;;  %2681 = vmatpush.msra.mxu2 %v3908_v30 }
0x1512   :  { %2682 = vmatpush.msra.mxu2 %v3909_v46  ;;  %v4852_v13 = vadd.f32 %v4848_v56, %v2596_v8 }
0x1513   :  { %3791 = vmatmul.msk.f32.vlgmr.msra.gmra.mxu2 %vm50_vm0, %v4364_v52 }
0x1514   :  { %v2601_v10 = vadd.f32 %v4690_v36, %v4852_v13 }
0x1516   :  { %3789 = vmatmul.msk.f32.vlgmr.msrb.gmra.mxu1 %vm50_vm0, %v2601_v10 }
0x151b   :  { %3792 = vmatmul.msk.f32.gmra.mxu2 %vm50_vm0, %v4381_v63 }
0x1523   :  { %3793 = vmatmul.msk.f32.gmra.mxu2 %vm50_vm0, %v4394_v2 }
0x152b   :  { %3794 = vmatmul.msk.f32.gmra.mxu2 %vm50_vm0, %v4404_v14 }
0x1538   :  { %v2485_v16 = vpop.xlane.xlu1 %2484 }
0x1539   :  { %v2486_v9 = vsub.f32 %v2480_v18, %v2485_v16  ;;  %v2258_v20 = vpop.xlane.xlu0 %2257  ;;  %v4111_v18 = vld [vmem:[%s5162_s0 + $0x28] sm:$0xff] }
0x153a   :  { %4056 = vrcp.f32 %v2258_v20  ;;  %v2270_v5 = vand.u32 2147483648, %v2258_v20  ;;  %v2268_v7 = vand.u32 2147483647, %v2258_v20  ;;  %vm2264_vm12 = vweird.f32 %v2258_v20 }
0x153b   :  { %v2487_v52 = vmul.f32 1.442695, %v2486_v9 }
0x153c   :  { %v2271_v0 = vor.u32 1.1754944e-38, %v2270_v5  ;;  %vm2269_vm14 = vcmp.eq.f32.partialorder %v2268_v7, 8.507059e+37 }
0x153d   :  { %4058 = vpow2.f32 %v2487_v52 }
0x1540   :  { %v4057_v24 = vpop.eup %4056 }
0x1541   :  { %v2260_v36 = vmul.f32 %v4057_v24, %v2258_v20  ;;  %vm2265_vm11 = vweird.f32 %v4057_v24 }
0x1542   :  { %vm2266_vm13 = vmor %vm2264_vm12, %vm2265_vm11 }
0x1543   :  { %v4865_v41 = vpop.eup %4058  ;;  %v2261_v3 = vsub.f32 1.0, %v2260_v36 }
0x1544   :  { %v2489_v63 = vsel %vm112_vm1, %v4865_v41, 0.0 }
0x1545   :  { %v2262_v2 = vmul.f32 %v4057_v24, %v2261_v3  ;;  %2490 = vadd.xlane.f32.xlu1 %v2489_v63 }
0x1547   :  { %v2263_v14 = vadd.f32 %v4057_v24, %v2262_v2 }
0x1549   :  { %v2267_v28 = vsel %vm2266_vm13, %v4057_v24, %v2263_v14 }
0x154a   :  { %v2272_v42 = vsel %vm2269_vm14, %v2271_v0, %v2267_v28 }
0x154b   :  { %v2273_v27 = vmul.f32 %v4840_v25, %v2272_v42 }
0x154d   :  { %3782 = vmatmul.msk.f32.vlgmr.msra.gmra.mxu0 %vm112_vm1, %v2273_v27 }
0x155e   :  { %2507 = vrot.lane.b32.xlu1 %v4751_v48, %s4121_s18  ;;  %v3745_v48 = vld [vmem:[%s5161_s1 + $0x88] sm:$0xff] }
0x155f   :  { %2711 = vmatpush.msra.mxu3 %v3745_v48 }
0x1560   :  { %3795 = vmatmul.msk.f32.vlgmr.msra.gmra.mxu3 %vm50_vm0, %v4110_v6 }
0x1568   :  { %3796 = vmatmul.msk.f32.gmra.mxu3 %vm50_vm0, %v4111_v18 }
0x1570   :  { %3797 = vmatmul.msk.f32.gmra.mxu3 %vm50_vm0, %v4112_v62 }
0x1578   :  { %3798 = vmatmul.msk.f32.gmra.mxu3 %vm50_vm0, %v4113_v32 }
0x1593   :  { %v2646_v31 = vpop.f32.mrf.mxu1 }
0x1594   :  { %v4910_v40 = vadd.f32 %v2646_v31, %v4907_v1 }
0x1596   :  { %v2684_v57 = vpop.f32.mrf.mxu2 }
0x1597   :  { %v4891_v4 = vadd.f32 %v2684_v57, %v2665_v11 }
0x1599   :  { %2780 = vrot.lane.b32.xlu2 %v4891_v4, %s4116_s9 }
0x159e   :  { %v2687_v25 = vpop.f32.mrf.mxu2 }
0x159f   :  { %v4899_v35 = vadd.f32 %v2687_v25, %v2665_v11 }
0x15a1   :  { %2782 = vrot.lane.b32.xlu0 %v4899_v35, %s4116_s9 }
0x15a6   :  { %v2690_v37 = vpop.f32.mrf.mxu2 }
0x15a7   :  { %v4922_v43 = vadd.f32 %v2690_v37, %v2665_v11 }
0x15a9   :  { %2778 = vrot.lane.b32.xlu0 %v4910_v40, %s4116_s9 }
0x15ae   :  { %v2693_v60 = vpop.f32.mrf.mxu2 }
0x15af   :  { %v4918_v54 = vadd.f32 %v2693_v60, %v2665_v11 }
0x15b1   :  { %3815 = vmatpush.xpose.msk.msrb.mxu3 %vm112_vm1, %v4918_v54 }
0x15b5   :  { %3816 = vmatpush.xpose.msk.msrb.mxu3 %vm112_vm1, %v4922_v43 }
0x15b8   :  { %v2491_v39 = vpop.xlane.xlu1 %2490 }
0x15b9   :  { %4060 = vrcp.f32 %v2491_v39  ;;  %v2503_v51 = vand.u32 2147483648, %v2491_v39  ;;  %vm2497_vm2 = vweird.f32 %v2491_v39  ;;  %v2501_v53 = vand.u32 2147483647, %v2491_v39 }
0x15bb   :  { %v2504_v47 = vor.u32 1.1754944e-38, %v2503_v51  ;;  %vm2502_vm4 = vcmp.eq.f32.partialorder %v2501_v53, 8.507059e+37 }
0x15bf   :  { %v4061_v33 = vpop.eup %4060 }
0x15c0   :  { %v2493_v49 = vmul.f32 %v4061_v33, %v2491_v39  ;;  %vm2498_vm15 = vweird.f32 %v4061_v33 }
0x15c1   :  { %vm2499_vm3 = vmor %vm2497_vm2, %vm2498_vm15 }
0x15c2   :  { %v2494_v50 = vsub.f32 1.0, %v2493_v49 }
0x15c4   :  { %v2495_v15 = vmul.f32 %v4061_v33, %v2494_v50 }
0x15c6   :  { %v2496_v45 = vadd.f32 %v4061_v33, %v2495_v15 }
0x15c8   :  { %v2500_v61 = vsel %vm2499_vm3, %v4061_v33, %v2496_v45 }
0x15c9   :  { %v2505_v55 = vsel %vm2502_vm4, %v2504_v47, %v2500_v61 }
0x15ca   :  { %v2506_v30 = vmul.f32 %v4865_v41, %v2505_v55  ;;  %v2373_v9 = vpop.f32.mrf.mxu0 }
0x15cb   :  { %v2374_v20 = vadd.f32 %v2373_v9, %v4838_v34 }
0x15cd   :  { %v2454_v52 = vadd.f32 %v4882_v17, %v2374_v20 }
0x15d0   :  { %v2508_v58 = vpop.permute.xlu1 %2507 }
0x15d1   :  { %2528 = vmatpush.msrb.mxu0 %v2508_v58 }
0x15d2   :  { %3788 = vmatmul.msk.f32.vlgmr.msrb.gmra.mxu0 %vm112_vm1, %v2506_v30 }
0x15d3   :  { %3799 = vmatpush.xpose.msk.msra.mxu0 %vm112_vm1, %v4899_v35 }
0x15d7   :  { %3800 = vmatpush.xpose.msk.msra.mxu0 %vm112_vm1, %v4891_v4 }
0x15da   :  { %3801 = vmatmul.msk.f32.vlgmr.msra.gmra.mxu0 %vm112_vm1, %v4910_v40 }
0x15e3   :  { %v2713_v11 = vpop.f32.mrf.mxu3 }
0x15eb   :  { %v2716_v16 = vpop.f32.mrf.mxu3 }
0x15ec   :  { %v4943_v7 = vpack.i.bf16 %v2713_v11, %v2716_v16 }
0x15f3   :  { %v2781_v46 = vpop.permute.xlu2 %2780 }
0x1613   :  { %v2783_v8 = vpop.permute.xlu0 %2782 }
0x1614   :  { %3802 = vmatpush.xpose.msk.msrb.mxu0 %vm112_vm1, %v2783_v8 }
0x1618   :  { %3803 = vmatpush.xpose.msk.msrb.mxu0 %vm112_vm1, %v2781_v46 }
0x161b   :  { %v2779_v10 = vpop.permute.xlu0 %2778 }
0x161c   :  { %3804 = vmatmul.msk.f32.vlgmr.msrb.gmra.mxu0 %vm112_vm1, %v2779_v10 }
0x161d   :  { %2882 = vmatpush.msra.mxu0 %v2716_v16 }
0x161f   :  { %2883 = vmatpush.msra.mxu0 %v2713_v11 }
0x164f   :  { %v2530_v24 = vpop.f32.mrf.mxu0 }
0x1650   :  { %v2533_v36 = vadd.f32 %v2530_v24, %v2454_v52 }
0x1652   :  { %v2540_v41 = vadd.f32 %v4823_v23, %v2533_v36 }
0x1654   :  { %v2542_v3 = vadd.f32 %v2540_v41, %v4699_v26 }
0x1656   :  { %v2546_v5 = vsel %vm50_vm0, %v2542_v3, 0.0  ;;  %v2552_v63 = vmul.f32 %v2542_v3, %v2542_v3 }
0x1657   :  { %2547 = vadd.xlane.f32.xlu1 %v2546_v5  ;;  %v2751_v23 = vpop.f32.mrf.mxu0 }
0x1658   :  { %v2556_v2 = vsel %vm50_vm0, %v2552_v63, 0.0  ;;  %v2754_v34 = vsel %vm983_vm10, %v2751_v23, -inf }
0x1659   :  { %2557 = vadd.xlane.f32.xlu0 %v2556_v2 }
0x166d   :  { %2892 = vrot.lane.b32.xlu0 %v4899_v35, %s4120_s17 }
0x1670   :  { %3921 = vrot.lane.b32.xlu1 %v4943_v7, %s4114_s7 }
0x1675   :  { %2888 = vrot.lane.b32.xlu0 %v4910_v40, %s4120_s17 }
0x1699   :  { %v2807_v26 = vpop.f32.mrf.mxu0 }
0x169a   :  { %2755 = vmax.xlane.f32.xlu1 %v2754_v34  ;;  %v2810_v14 = vsel %vm983_vm10, %v2807_v26, -inf }
0x169b   :  { %2811 = vmax.xlane.f32.xlu2 %v2810_v14 }
0x16ca   :  { %v2548_v0 = vpop.xlane.xlu1 %2547 }
0x16cb   :  { %v2550_v28 = vmul.f32 %v2548_v0, %v4344_v22 }
0x16cc   :  { %v2558_v42 = vpop.xlane.xlu0 %2557 }
0x16cd   :  { %v2562_v27 = vmul.f32 %v2550_v28, %v2550_v28  ;;  %v2560_v29 = vmul.f32 %v2558_v42, %v4344_v22  ;;  %v2566_v31 = vsub.f32 %v2542_v3, %v2550_v28 }
0x16cf   :  { %v2564_v44 = vsub.f32 %v2560_v29, %v2562_v27 }
0x16d1   :  { %v2568_v38 = vadd.f32 1e-05, %v2564_v44 }
0x16d3   :  { %4062 = vrsqrt.f32 %v2568_v38  ;;  %vm2585_vm6 = vweird.f32 %v2568_v38 }
0x16d9   :  { %v4063_v17 = vpop.eup %4062 }
0x16da   :  { %v2580_v48 = vmul.f32 %v4063_v17, %v2568_v38  ;;  %vm2586_vm5 = vweird.f32 %v4063_v17 }
0x16db   :  { %vm2587_vm7 = vmor %vm2585_vm6, %vm2586_vm5 }
0x16dc   :  { %v2581_v6 = vmul.f32 %v4063_v17, %v2580_v48 }
0x16de   :  { %v2582_v57 = vmul.f32 0.5, %v2581_v6 }
0x16df   :  { %v2893_v33 = vpop.permute.xlu0 %2892 }
0x16e0   :  { %v2583_v18 = vsub.f32 1.5, %v2582_v57 }
0x16e2   :  { %v2584_v25 = vmul.f32 %v4063_v17, %v2583_v18  ;;  %v3922_v62 = vpop.permute.xlu1 %3921  ;;  %v4989_v18 = vpop.f32.mrf.mxu3 }
0x16e3   :  { %v3924_v37 = vunpack.i.h.bf16 %v3922_v62  ;;  %v3923_v32 = vunpack.i.l.bf16 %v3922_v62 }
0x16e4   :  { %v2588_v60 = vsel %vm2587_vm7, %v4063_v17, %v2584_v25 }
0x16e5   :  { %2859 = vmatpush.msra.mxu1 %v3923_v32  ;;  %v2590_v39 = vmul.f32 %v2588_v60, %v2566_v31 }
0x16e7   :  { %2860 = vmatpush.msra.mxu1 %v3924_v37  ;;  %v2597_v49 = vmul.f32 %v4835_v19, %v2590_v39  ;;  %v2889_v10 = vpop.permute.xlu0 %2888 }
0x16e9   :  { %3807 = vmatpush.xpose.msk.msrb.mxu1 %vm112_vm1, %v2893_v33  ;;  %v4958_v50 = vadd.f32 %v4848_v56, %v2597_v49 }
0x16ea   :  { %v4993_v25 = vpop.f32.mrf.mxu3 }
0x16eb   :  { %v2602_v15 = vadd.f32 %v4706_v59, %v4958_v50  ;;  %v4997_v62 = vpack.i.bf16 %v4989_v18, %v4993_v25 }
0x16ed   :  { %3790 = vmatmul.msk.f32.gmra.mxu1 %vm50_vm0, %v2602_v15 }
0x170d   :  { %v2756_v45 = vpop.xlane.xlu1 %2755 }
0x170e   :  { %v2757_v51 = vsub.f32 %v2751_v23, %v2756_v45  ;;  %v2812_v53 = vpop.xlane.xlu2 %2811 }
0x170f   :  { %v2813_v61 = vsub.f32 %v2807_v26, %v2812_v53 }
0x1710   :  { %v2758_v47 = vmul.f32 1.442695, %v2757_v51 }
0x1711   :  { %v2814_v55 = vmul.f32 1.442695, %v2813_v61 }
0x1712   :  { %4064 = vpow2.f32 %v2758_v47 }
0x1713   :  { %4066 = vpow2.f32 %v2814_v55 }
0x1718   :  { %v4065_v58 = vpop.eup %4064 }
0x1719   :  { %v4067_v19 = vpop.eup %4066  ;;  %v2760_v30 = vsel %vm983_vm10, %v4065_v58, 0.0 }
0x171a   :  { %2761 = vadd.xlane.f32.xlu0 %v2760_v30  ;;  %v2816_v8 = vsel %vm983_vm10, %v4067_v19, 0.0 }
0x171b   :  { %2817 = vadd.xlane.f32.xlu2 %v2816_v8 }
0x172e   :  { %3117 = vrot.lane.b32.xlu0 %v4918_v54, %s4116_s9 }
0x1733   :  { %2890 = vrot.lane.b32.xlu2 %v4891_v4, %s4120_s17 }
0x176a   :  { %v2649_v59 = vpop.f32.mrf.mxu1 }
0x176b   :  { %v4970_v46 = vadd.f32 %v2649_v59, %v4907_v1 }
0x176d   :  { %3817 = vmatmul.msk.f32.vlgmr.msrb.gmra.mxu3 %vm112_vm1, %v4970_v46 }
0x178d   :  { %v2762_v11 = vpop.xlane.xlu0 %2761 }
0x178e   :  { %4068 = vrcp.f32 %v2762_v11  ;;  %v2818_v16 = vpop.xlane.xlu2 %2817  ;;  %v2774_v3 = vand.u32 2147483648, %v2762_v11  ;;  %v2772_v63 = vand.u32 2147483647, %v2762_v11  ;;  %vm2768_vm12 = vweird.f32 %v2762_v11 }
0x178f   :  { %4070 = vrcp.f32 %v2818_v16  ;;  %v2830_v2 = vand.u32 2147483648, %v2818_v16  ;;  %v2828_v26 = vand.u32 2147483647, %v2818_v16  ;;  %vm2824_vm14 = vweird.f32 %v2818_v16 }
0x1790   :  { %v2775_v14 = vor.u32 1.1754944e-38, %v2774_v3  ;;  %vm2773_vm15 = vcmp.eq.f32.partialorder %v2772_v63, 8.507059e+37 }
0x1791   :  { %v2831_v42 = vor.u32 1.1754944e-38, %v2830_v2  ;;  %vm2829_vm3 = vcmp.eq.f32.partialorder %v2828_v26, 8.507059e+37 }
0x1794   :  { %v4069_v9 = vpop.eup %4068 }
0x1795   :  { %v4071_v20 = vpop.eup %4070  ;;  %v2764_v52 = vmul.f32 %v4069_v9, %v2762_v11  ;;  %vm2769_vm8 = vweird.f32 %v4069_v9 }
0x1796   :  { %v2820_v24 = vmul.f32 %v4071_v20, %v2818_v16  ;;  %v2891_v36 = vpop.permute.xlu2 %2890  ;;  %vm2825_vm11 = vweird.f32 %v4071_v20  ;;  %vm2770_vm13 = vmor %vm2768_vm12, %vm2769_vm8 }
0x1797   :  { %v2765_v41 = vsub.f32 1.0, %v2764_v52  ;;  %3808 = vmatpush.xpose.msk.msrb.mxu1 %vm112_vm1, %v2891_v36  ;;  %vm2826_vm2 = vmor %vm2824_vm14, %vm2825_vm11 }
0x1798   :  { %v2821_v5 = vsub.f32 1.0, %v2820_v24 }
0x1799   :  { %v2766_v1 = vmul.f32 %v4069_v9, %v2765_v41 }
0x179a   :  { %v2822_v23 = vmul.f32 %v4071_v20, %v2821_v5 }
0x179b   :  { %v2767_v34 = vadd.f32 %v4069_v9, %v2766_v1 }
0x179c   :  { %v2823_v0 = vadd.f32 %v4071_v20, %v2822_v23 }
0x179d   :  { %v2771_v28 = vsel %vm2770_vm13, %v4069_v9, %v2767_v34 }
0x179e   :  { %v2776_v27 = vsel %vm2773_vm15, %v2775_v14, %v2771_v28  ;;  %v2827_v29 = vsel %vm2826_vm2, %v4071_v20, %v2823_v0 }
0x179f   :  { %v2832_v44 = vsel %vm2829_vm3, %v2831_v42, %v2827_v29  ;;  %v2777_v38 = vmul.f32 %v4065_v58, %v2776_v27 }
0x17a0   :  { %v2833_v17 = vmul.f32 %v4067_v19, %v2832_v44  ;;  %v3118_v33 = vpop.permute.xlu0 %3117 }
0x17a1   :  { %3806 = vmatmul.msk.f32.vlgmr.msra.gmra.mxu0 %vm983_vm10, %v2777_v38 }
0x17a2   :  { %3805 = vmatmul.msk.f32.vlgmr.msra.gmra.mxu1 %vm983_vm10, %v2833_v17 }
0x17aa   :  { %3809 = vmatmul.msk.f32.vlgmr.msrb.gmra.mxu1 %vm112_vm1, %v2889_v10 }
0x17f0   :  { %v3086_v63 = vpop.f32.mrf.mxu3 }
0x17f1   :  { %v3089_v38 = vsel %vm983_vm10, %v3086_v63, -inf }
0x181e   :  { %v2885_v26 = vpop.f32.mrf.mxu0 }
0x181f   :  { %v4978_v48 = vpop.f32.mrf.mxu1 }
0x1820   :  { %v2886_v34 = vadd.f32 %v2885_v26, %v4978_v48 }
0x1827   :  { %v2917_v6 = vpop.f32.mrf.mxu1 }
0x1828   :  { %v2920_v57 = vsel %vm983_vm10, %v2917_v6, -inf }
0x1829   :  { %2921 = vmax.xlane.f32.xlu2 %v2920_v57 }
0x1841   :  { %3926 = vrot.lane.b32.xlu2 %v4943_v7, %s4122_s19 }
0x1849   :  { %3113 = vrot.lane.b32.xlu2 %v4970_v46, %s4116_s9 }
0x1851   :  { %2978 = vrot.lane.b32.xlu2 %v4899_v35, %s4119_s12 }
0x1859   :  { %2976 = vrot.lane.b32.xlu2 %v4891_v4, %s4119_s12 }
0x1861   :  { %2974 = vrot.lane.b32.xlu2 %v4910_v40, %s4119_s12 }
0x1869   :  { %3931 = vrot.lane.b32.xlu2 %v4997_v62, %s4114_s7 }
0x1871   :  { %3227 = vrot.lane.b32.xlu2 %v4918_v54, %s4120_s17 }
0x1879   :  { %3225 = vrot.lane.b32.xlu2 %v4922_v43, %s4120_s17 }
0x1881   :  { %3223 = vrot.lane.b32.xlu2 %v4970_v46, %s4120_s17 }
0x189c   :  { %v2922_v4 = vpop.xlane.xlu2 %2921 }
0x189d   :  { %v2923_v35 = vsub.f32 %v2917_v6, %v2922_v4 }
0x189f   :  { %v2924_v40 = vmul.f32 1.442695, %v2923_v35 }
0x18a1   :  { %4072 = vpow2.f32 %v2924_v40 }
0x18a4   :  { %v3927_v31 = vpop.permute.xlu2 %3926 }
0x18a5   :  { %v3928_v37 = vunpack.i.l.bf16 %v3927_v31  ;;  %v3929_v60 = vunpack.i.h.bf16 %v3927_v31 }
0x18a7   :  { %v4073_v32 = vpop.eup %4072  ;;  %2967 = vmatpush.msrb.mxu0 %v3928_v37 }
0x18a8   :  { %v2926_v39 = vsel %vm983_vm10, %v4073_v32, 0.0 }
0x18a9   :  { %2968 = vmatpush.msrb.mxu0 %v3929_v60  ;;  %2927 = vadd.xlane.f32.xlu1 %v2926_v39 }
0x18ab   :  { %3818 = vmatpush.xpose.msk.msra.mxu0 %vm112_vm1, %v3118_v33 }
0x18ac   :  { %v3114_v49 = vpop.permute.xlu2 %3113 }
0x18b4   :  { %v2979_v15 = vpop.permute.xlu2 %2978 }
0x18b5   :  { %3811 = vmatpush.xpose.msk.msra.mxu1 %vm112_vm1, %v2979_v15 }
0x18bc   :  { %v2977_v45 = vpop.permute.xlu2 %2976 }
0x18bd   :  { %3812 = vmatpush.xpose.msk.msra.mxu1 %vm112_vm1, %v2977_v45 }
0x18c2   :  { %3115 = vrot.lane.b32.xlu1 %v4922_v43, %s4116_s9 }
0x18c4   :  { %v2975_v51 = vpop.permute.xlu2 %2974 }
0x18c5   :  { %3813 = vmatmul.msk.f32.vlgmr.msra.gmra.mxu1 %vm112_vm1, %v2975_v51 }
0x18cc   :  { %v3932_v53 = vpop.permute.xlu2 %3931 }
0x18cd   :  { %v3934_v61 = vunpack.i.h.bf16 %v3932_v53  ;;  %v3933_v47 = vunpack.i.l.bf16 %v3932_v53 }
0x18cf   :  { %3194 = vmatpush.msrb.mxu1 %v3933_v47 }
0x18d1   :  { %3195 = vmatpush.msrb.mxu1 %v3934_v61 }
0x18d4   :  { %v3228_v55 = vpop.permute.xlu2 %3227 }
0x18d5   :  { %3823 = vmatpush.xpose.msk.msra.mxu3 %vm112_vm1, %v3228_v55 }
0x18dc   :  { %v3226_v58 = vpop.permute.xlu2 %3225 }
0x18dd   :  { %3824 = vmatpush.xpose.msk.msra.mxu3 %vm112_vm1, %v3226_v58 }
0x18e4   :  { %v3224_v19 = vpop.permute.xlu2 %3223 }
0x18e5   :  { %3825 = vmatmul.msk.f32.vlgmr.msra.gmra.mxu3 %vm112_vm1, %v3224_v19 }
0x191c   :  { %v2928_v30 = vpop.xlane.xlu1 %2927 }
0x191d   :  { %4074 = vrcp.f32 %v2928_v30  ;;  %v2940_v11 = vand.u32 2147483648, %v2928_v30  ;;  %v2938_v9 = vand.u32 2147483647, %v2928_v30  ;;  %vm2934_vm5 = vweird.f32 %v2928_v30 }
0x191f   :  { %v2941_v52 = vor.u32 1.1754944e-38, %v2940_v11  ;;  %vm2939_vm7 = vcmp.eq.f32.partialorder %v2938_v9, 8.507059e+37 }
0x1923   :  { %v4075_v8 = vpop.eup %4074 }
0x1924   :  { %v2930_v59 = vmul.f32 %v4075_v8, %v2928_v30  ;;  %vm2935_vm4 = vweird.f32 %v4075_v8 }
0x1925   :  { %vm2936_vm6 = vmor %vm2934_vm5, %vm2935_vm4 }
0x1926   :  { %v2931_v10 = vsub.f32 1.0, %v2930_v59 }
0x1928   :  { %v2932_v16 = vmul.f32 %v4075_v8, %v2931_v10 }
0x192a   :  { %v2933_v20 = vadd.f32 %v4075_v8, %v2932_v16 }
0x192c   :  { %v2937_v24 = vsel %vm2936_vm6, %v4075_v8, %v2933_v20 }
0x192d   :  { %v2942_v36 = vsel %vm2939_vm7, %v2941_v52, %v2937_v24 }
0x192e   :  { %v2943_v41 = vmul.f32 %v4073_v32, %v2942_v36 }
0x1930   :  { %3810 = vmatmul.msk.f32.vlgmr.msrb.gmra.mxu0 %vm983_vm10, %v2943_v41 }
0x1934   :  { %v3116_v3 = vpop.permute.xlu1 %3115 }
0x1935   :  { %3819 = vmatpush.xpose.msk.msra.mxu0 %vm112_vm1, %v3116_v3 }
0x1938   :  { %3820 = vmatmul.msk.f32.vlgmr.msra.gmra.mxu0 %vm112_vm1, %v3114_v49 }
0x1942   :  { %v3003_v5 = vpop.f32.mrf.mxu1 }
0x1943   :  { %v3006_v1 = vsel %vm983_vm10, %v3003_v5, -inf }
0x1944   :  { %3007 = vmax.xlane.f32.xlu2 %v3006_v1 }
0x1968   :  { %v3252_v2 = vpop.f32.mrf.mxu3 }
0x1969   :  { %v3255_v23 = vsel %vm983_vm10, %v3252_v2, -inf }
0x196a   :  { %3256 = vmax.xlane.f32.xlu2 %v3255_v23 }
0x19ad   :  { %v2970_v14 = vpop.f32.mrf.mxu0 }
0x19ae   :  { %v5023_v0 = vadd.f32 %v2970_v14, %v2886_v34 }
0x19b5   :  { %v3142_v28 = vpop.f32.mrf.mxu0 }
0x19b6   :  { %v3145_v42 = vsel %vm983_vm10, %v3142_v28, -inf }
0x19b7   :  { %3146 = vmax.xlane.f32.xlu0 %v3145_v42  ;;  %v3008_v27 = vpop.xlane.xlu2 %3007 }
0x19b8   :  { %v3009_v29 = vsub.f32 %v3003_v5, %v3008_v27 }
0x19ba   :  { %v3010_v44 = vmul.f32 1.442695, %v3009_v29 }
0x19bc   :  { %4076 = vpow2.f32 %v3010_v44 }
0x19c2   :  { %v4077_v17 = vpop.eup %4076 }
0x19c3   :  { %v3012_v48 = vsel %vm983_vm10, %v4077_v17, 0.0 }
0x19cb   :  { %3313 = vrot.lane.b32.xlu0 %v4918_v54, %s4119_s12 }
0x19d3   :  { %3309 = vrot.lane.b32.xlu0 %v4970_v46, %s4119_s12 }
0x19dd   :  { %v3257_v40 = vpop.xlane.xlu2 %3256 }
0x19de   :  { %v3258_v32 = vsub.f32 %v3252_v2, %v3257_v40 }
0x19e0   :  { %v3259_v39 = vmul.f32 1.442695, %v3258_v32 }
0x19fd   :  { %3090 = vmax.xlane.f32.xlu0 %v3089_v38 }
0x1a05   :  { %3013 = vadd.xlane.f32.xlu0 %v3012_v48 }
0x1a19   :  { %3936 = vrot.lane.b32.xlu0 %v4943_v7, %s4121_s18 }
0x1a21   :  { %3395 = vrot.lane.b32.xlu0 %v4807_v21, %s4121_s18 }
0x1a2a   :  { %v3147_v54 = vpop.xlane.xlu0 %3146 }
0x1a2b   :  { %v3148_v6 = vsub.f32 %v3142_v28, %v3147_v54 }
0x1a2d   :  { %v3149_v46 = vmul.f32 1.442695, %v3148_v6 }
0x1a2f   :  { %4078 = vpow2.f32 %v3149_v46 }
0x1a35   :  { %v5036_v57 = vpop.eup %4078 }
0x1a36   :  { %v3151_v4 = vsel %vm983_vm10, %v5036_v57, 0.0 }
0x1a37   :  { %3152 = vadd.xlane.f32.xlu1 %v3151_v4 }
0x1a3d   :  { %v3314_v35 = vpop.permute.xlu0 %3313 }
0x1a3e   :  { %3827 = vmatpush.xpose.msk.msra.mxu1 %vm112_vm1, %v3314_v35 }
0x1a45   :  { %v3310_v7 = vpop.permute.xlu0 %3309 }
0x1a50   :  { %3311 = vrot.lane.b32.xlu1 %v4922_v43, %s4119_s12 }
0x1a70   :  { %v3091_v31 = vpop.xlane.xlu0 %3090 }
0x1a71   :  { %v3092_v37 = vsub.f32 %v3086_v63, %v3091_v31 }
0x1a73   :  { %v3093_v60 = vmul.f32 1.442695, %v3092_v37 }
0x1a75   :  { %4080 = vpow2.f32 %v3093_v60 }
0x1a78   :  { %v3014_v33 = vpop.xlane.xlu0 %3013 }
0x1a79   :  { %4082 = vrcp.f32 %v3014_v33  ;;  %v3026_v58 = vand.u32 2147483648, %v3014_v33  ;;  %vm3020_vm11 = vweird.f32 %v3014_v33  ;;  %v3024_v19 = vand.u32 2147483647, %v3014_v33 }
0x1a7a   :  { %4084 = vpow2.f32 %v3259_v39 }
0x1a7b   :  { %v5043_v49 = vpop.eup %4080  ;;  %v3027_v8 = vor.u32 1.1754944e-38, %v3026_v58  ;;  %vm3025_vm13 = vcmp.eq.f32.partialorder %v3024_v19, 8.507059e+37 }
0x1a7c   :  { %v3095_v15 = vsel %vm983_vm10, %v5043_v49, 0.0 }
0x1a7d   :  { %3096 = vadd.xlane.f32.xlu2 %v3095_v15 }
0x1a7f   :  { %v4083_v45 = vpop.eup %4082 }
0x1a80   :  { %v3016_v51 = vmul.f32 %v4083_v45, %v3014_v33  ;;  %v5047_v43 = vpop.eup %4084  ;;  %vm3021_vm8 = vweird.f32 %v4083_v45 }
0x1a81   :  { %v3261_v47 = vsel %vm983_vm10, %v5047_v43, 0.0  ;;  %vm3022_vm12 = vmor %vm3020_vm11, %vm3021_vm8 }
0x1a82   :  { %v3017_v53 = vsub.f32 1.0, %v3016_v51 }
0x1a84   :  { %v3018_v61 = vmul.f32 %v4083_v45, %v3017_v53 }
0x1a85   :  { %3262 = vadd.xlane.f32.xlu2 %v3261_v47 }
0x1a86   :  { %v3019_v55 = vadd.f32 %v4083_v45, %v3018_v61 }
0x1a88   :  { %v3023_v30 = vsel %vm3022_vm12, %v4083_v45, %v3019_v55 }
0x1a89   :  { %v3028_v10 = vsel %vm3025_vm13, %v3027_v8, %v3023_v30 }
0x1a8a   :  { %v3029_v9 = vmul.f32 %v4077_v17, %v3028_v10 }
0x1a8b   :  { %v3937_v59 = vpop.permute.xlu0 %3936 }
0x1a8c   :  { %v3938_v11 = vunpack.i.l.bf16 %v3937_v59  ;;  %v3939_v16 = vunpack.i.h.bf16 %v3937_v59 }
0x1a8e   :  { %3053 = vmatpush.msrb.mxu2 %v3938_v11 }
0x1a90   :  { %3054 = vmatpush.msrb.mxu2 %v3939_v16 }
0x1a91   :  { %3814 = vmatmul.msk.f32.vlgmr.msrb.gmra.mxu2 %vm983_vm10, %v3029_v9 }
0x1a92   :  { %3217 = vmatpush.msra.mxu2 %v4993_v25 }
0x1a93   :  { %v3396_v51 = vpop.permute.xlu0 %3395 }
0x1a94   :  { %3218 = vmatpush.msra.mxu2 %v4989_v18 }
0x1a9d   :  { %3946 = vrot.lane.b32.xlu2 %v4997_v62, %s4122_s19 }
0x1aaa   :  { %v3153_v20 = vpop.xlane.xlu1 %3152 }
0x1aab   :  { %4086 = vrcp.f32 %v3153_v20  ;;  %v3165_v41 = vand.u32 2147483648, %v3153_v20  ;;  %v3163_v5 = vand.u32 2147483647, %v3153_v20  ;;  %vm3159_vm15 = vweird.f32 %v3153_v20 }
0x1aad   :  { %v3166_v63 = vor.u32 1.1754944e-38, %v3165_v41  ;;  %vm3164_vm3 = vcmp.eq.f32.partialorder %v3163_v5, 8.507059e+37 }
0x1ab1   :  { %v4087_v52 = vpop.eup %4086 }
0x1ab2   :  { %v3155_v24 = vmul.f32 %v4087_v52, %v3153_v20  ;;  %vm3160_vm14 = vweird.f32 %v4087_v52 }
0x1ab3   :  { %vm3161_vm2 = vmor %vm3159_vm15, %vm3160_vm14 }
0x1ab4   :  { %v3156_v36 = vsub.f32 1.0, %v3155_v24 }
0x1ab6   :  { %v3157_v3 = vmul.f32 %v4087_v52, %v3156_v36 }
0x1ab8   :  { %v3158_v1 = vadd.f32 %v4087_v52, %v3157_v3 }
0x1aba   :  { %v3162_v2 = vsel %vm3161_vm2, %v4087_v52, %v3158_v1 }
0x1abb   :  { %v3167_v25 = vsel %vm3164_vm3, %v3166_v63, %v3162_v2 }
0x1abc   :  { %v3168_v18 = vmul.f32 %v5036_v57, %v3167_v25 }
0x1abe   :  { %3821 = vmatmul.msk.f32.vlgmr.msrb.gmra.mxu1 %vm983_vm10, %v3168_v18 }
0x1ac2   :  { %v3312_v23 = vpop.permute.xlu1 %3311 }
0x1ac3   :  { %3828 = vmatpush.xpose.msk.msra.mxu1 %vm112_vm1, %v3312_v23 }
0x1ac6   :  { %3829 = vmatmul.msk.f32.vlgmr.msra.gmra.mxu1 %vm112_vm1, %v3310_v7 }
0x1af0   :  { %v3097_v26 = vpop.xlane.xlu2 %3096 }
0x1af1   :  { %4088 = vrcp.f32 %v3097_v26  ;;  %v3109_v27 = vand.u32 2147483648, %v3097_v26  ;;  %v3107_v44 = vand.u32 2147483647, %v3097_v26  ;;  %vm3103_vm5 = vweird.f32 %v3097_v26 }
0x1af3   :  { %v3110_v48 = vor.u32 1.1754944e-38, %v3109_v27  ;;  %vm3108_vm7 = vcmp.eq.f32.partialorder %v3107_v44, 8.507059e+37 }
0x1af7   :  { %v4089_v34 = vpop.eup %4088 }
0x1af8   :  { %v3099_v14 = vmul.f32 %v4089_v34, %v3097_v26  ;;  %v3263_v28 = vpop.xlane.xlu2 %3262  ;;  %vm3104_vm4 = vweird.f32 %v4089_v34 }
0x1af9   :  { %4090 = vrcp.f32 %v3263_v28  ;;  %vm3105_vm6 = vmor %vm3103_vm5, %vm3104_vm4  ;;  %v3275_v40 = vand.u32 2147483648, %v3263_v28  ;;  %v3273_v32 = vand.u32 2147483647, %v3263_v28  ;;  %vm3269_vm8 = vweird.f32 %v3263_v28 }
0x1afa   :  { %v3100_v42 = vsub.f32 1.0, %v3099_v14 }
0x1afb   :  { %v3276_v39 = vor.u32 1.1754944e-38, %v3275_v40  ;;  %vm3274_vm12 = vcmp.eq.f32.partialorder %v3273_v32, 8.507059e+37  ;;  %v3751_v40 = vld [vmem:[%s5161_s1 + $0xb8] sm:$0xff] }
0x1afc   :  { %v3101_v29 = vmul.f32 %v4089_v34, %v3100_v42 }
0x1afe   :  { %v3102_v38 = vadd.f32 %v4089_v34, %v3101_v29 }
0x1aff   :  { %v4091_v17 = vpop.eup %4090 }
0x1b00   :  { %v3106_v54 = vsel %vm3105_vm6, %v4089_v34, %v3102_v38  ;;  %v3265_v6 = vmul.f32 %v4091_v17, %v3263_v28  ;;  %v3947_v46 = vpop.permute.xlu2 %3946  ;;  %vm3270_vm1 = vweird.f32 %v4091_v17 }
0x1b01   :  { %v3111_v57 = vsel %vm3108_vm7, %v3110_v48, %v3106_v54  ;;  %v3948_v4 = vunpack.i.l.bf16 %v3947_v46  ;;  %v3949_v31 = vunpack.i.h.bf16 %v3947_v46  ;;  %vm3271_vm11 = vmor %vm3269_vm8, %vm3270_vm1 }
0x1b02   :  { %v3266_v35 = vsub.f32 1.0, %v3265_v6  ;;  %v3112_v7 = vmul.f32 %v5043_v49, %v3111_v57 }
0x1b03   :  { %3302 = vmatpush.msrb.mxu0 %v3948_v4 }
0x1b04   :  { %v3267_v37 = vmul.f32 %v4091_v17, %v3266_v35  ;;  %3822 = vmatmul.msk.f32.vlgmr.msra.gmra.mxu2 %vm983_vm10, %v3112_v7  ;;  %v3759_v35 = vld [vmem:[%s5161_s1 + $0xf8] sm:$0xff] }
0x1b05   :  { %3303 = vmatpush.msrb.mxu0 %v3949_v31  ;;  %3479 = vmatpush.msrb.mxu3 %v3759_v35  ;;  %v3755_v7 = vld [vmem:[%s5161_s1 + $0xd8] sm:$0xff] }
0x1b06   :  { %v3268_v60 = vadd.f32 %v4091_v17, %v3267_v37  ;;  %v3747_v37 = vld [vmem:[%s5161_s1 + $0x98] sm:$0xff] }
0x1b07   :  { %3480 = vmatpush.msrb.mxu3 %v3755_v7 }
0x1b08   :  { %v3272_v33 = vsel %vm3271_vm11, %v4091_v17, %v3268_v60 }
0x1b09   :  { %v3277_v15 = vsel %vm3274_vm12, %v3276_v39, %v3272_v33  ;;  %3481 = vmatpush.msrb.mxu3 %v3751_v40 }
0x1b0a   :  { %v3278_v45 = vmul.f32 %v5047_v43, %v3277_v15 }
0x1b0b   :  { %3482 = vmatpush.msrb.mxu3 %v3747_v37 }
0x1b0c   :  { %3826 = vmatmul.msk.f32.vlgmr.msrb.gmra.mxu0 %vm983_vm10, %v3278_v45 }
0x1b14   :  { %v3056_v49 = vpop.f32.mrf.mxu2 }
0x1b15   :  { %v3059_v53 = vadd.f32 %v3056_v49, %v5023_v0 }
0x1b17   :  { %v3398_v61 = vadd.f32 %v3396_v51, %v3059_v53 }
0x1b19   :  { %v5066_v47 = vadd.f32 %v3398_v61, %v4852_v13 }
0x1b1b   :  { %v3402_v55 = vsel %vm50_vm0, %v5066_v47, 0.0  ;;  %v3410_v13 = vmul.f32 %v5066_v47, %v5066_v47 }
0x1b1c   :  { %3403 = vadd.xlane.f32.xlu0 %v3402_v55 }
0x1b1d   :  { %v3412_v11 = vsel %vm50_vm0, %v3410_v13, 0.0 }
0x1b3b   :  { %v3197_v58 = vpop.f32.mrf.mxu1 }
0x1b43   :  { %v3338_v19 = vpop.f32.mrf.mxu1 }
0x1b44   :  { %v3341_v30 = vsel %vm983_vm10, %v3338_v19, -inf }
0x1b45   :  { %3342 = vmax.xlane.f32.xlu1 %v3341_v30 }
0x1b87   :  { %v3220_v23 = vpop.f32.mrf.mxu2 }
0x1b88   :  { %v3221_v26 = vadd.f32 %v3220_v23, %v3197_v58 }
0x1b89   :  { %v3305_v34 = vpop.f32.mrf.mxu0 }
0x1b8a   :  { %v3308_v14 = vadd.f32 %v3305_v34, %v3221_v26 }
0x1b8f   :  { %v3404_v48 = vpop.xlane.xlu0 %3403 }
0x1b90   :  { %v3408_v6 = vmul.f32 %v3404_v48, %v4344_v22 }
0x1b92   :  { %v3420_v46 = vmul.f32 %v3408_v6, %v3408_v6 }
0x1bb8   :  { %v3343_v43 = vpop.xlane.xlu1 %3342 }
0x1bb9   :  { %v3344_v8 = vsub.f32 %v3338_v19, %v3343_v43 }
0x1bbb   :  { %v3345_v59 = vmul.f32 1.442695, %v3344_v8 }
0x1bbd   :  { %4092 = vpow2.f32 %v3345_v59 }
0x1bc3   :  { %v4093_v10 = vpop.eup %4092 }
0x1bc4   :  { %v3347_v0 = vsel %vm983_vm10, %v4093_v10, 0.0 }
0x1bc5   :  { %3348 = vadd.xlane.f32.xlu1 %v3347_v0 }
0x1bde   :  { %3941 = vrot.lane.b32.xlu1 %v4997_v62, %s4121_s18 }
0x1c08   :  { %3413 = vadd.xlane.f32.xlu1 %v3412_v11 }
0x1c21   :  { %3450 = vrot.lane.b32.xlu1 %v4800_v12, %s4122_s19 }
0x1c29   :  { %3500 = vrot.lane.b32.xlu1 %v3755_v7, %s4122_s19 }
0x1c38   :  { %v3349_v16 = vpop.xlane.xlu1 %3348 }
0x1c39   :  { %4094 = vrcp.f32 %v3349_v16  ;;  %v3361_v41 = vand.u32 2147483648, %v3349_v16  ;;  %vm3355_vm14 = vweird.f32 %v3349_v16  ;;  %v3359_v62 = vand.u32 2147483647, %v3349_v16 }
0x1c3b   :  { %v3362_v5 = vor.u32 1.1754944e-38, %v3361_v41  ;;  %vm3360_vm2 = vcmp.eq.f32.partialorder %v3359_v62, 8.507059e+37 }
0x1c3f   :  { %v4095_v9 = vpop.eup %4094 }
0x1c40   :  { %v3351_v20 = vmul.f32 %v4095_v9, %v3349_v16  ;;  %vm3356_vm13 = vweird.f32 %v4095_v9 }
0x1c41   :  { %vm3357_vm15 = vmor %vm3355_vm14, %vm3356_vm13 }
0x1c42   :  { %v3352_v52 = vsub.f32 1.0, %v3351_v20 }
0x1c44   :  { %v3353_v24 = vmul.f32 %v4095_v9, %v3352_v52 }
0x1c46   :  { %v3354_v36 = vadd.f32 %v4095_v9, %v3353_v24 }
0x1c48   :  { %v3358_v3 = vsel %vm3357_vm15, %v4095_v9, %v3354_v36 }
0x1c49   :  { %v3363_v63 = vsel %vm3360_vm2, %v3362_v5, %v3358_v3 }
0x1c4a   :  { %v3364_v18 = vmul.f32 %v4093_v10, %v3363_v63 }
0x1c50   :  { %v3942_v1 = vpop.permute.xlu1 %3941 }
0x1c51   :  { %v3943_v2 = vunpack.i.l.bf16 %v3942_v1  ;;  %v3944_v25 = vunpack.i.h.bf16 %v3942_v1 }
0x1c53   :  { %3388 = vmatpush.msrb.mxu2 %v3943_v2 }
0x1c55   :  { %3389 = vmatpush.msrb.mxu2 %v3944_v25 }
0x1c56   :  { %3830 = vmatmul.msk.f32.vlgmr.msrb.gmra.mxu2 %vm983_vm10, %v3364_v18 }
0x1c7b   :  { %v3414_v54 = vpop.xlane.xlu1 %3413 }
0x1c93   :  { %v3451_v30 = vpop.permute.xlu1 %3450 }
0x1c9b   :  { %v3501_v5 = vpop.permute.xlu1 %3500 }
0x1cd9   :  { %v3391_v28 = vpop.f32.mrf.mxu2 }
0x1cda   :  { %v3394_v42 = vadd.f32 %v3391_v28, %v3308_v14 }
0x1cdc   :  { %v3399_v27 = vadd.f32 %v3396_v51, %v3394_v42  ;;  %v3424_v51 = vsub.f32 %v5066_v47, %v3408_v6 }
0x1cde   :  { %v5081_v29 = vadd.f32 %v3399_v27, %v4958_v50  ;;  %v3418_v50 = vmul.f32 %v3414_v54, %v4344_v22 }
0x1ce0   :  { %v3405_v44 = vsel %vm50_vm0, %v5081_v29, 0.0  ;;  %v3411_v38 = vmul.f32 %v5081_v29, %v5081_v29  ;;  %v3422_v57 = vsub.f32 %v3418_v50, %v3420_v46 }
0x1ce1   :  { %3406 = vadd.xlane.f32.xlu2 %v3405_v44 }
0x1ce2   :  { %v3415_v17 = vsel %vm50_vm0, %v3411_v38, 0.0  ;;  %v3426_v4 = vadd.f32 1e-05, %v3422_v57 }
0x1ce3   :  { %3416 = vadd.xlane.f32.xlu0 %v3415_v17 }
0x1ce4   :  { %4096 = vrsqrt.f32 %v3426_v4  ;;  %vm3434_vm3 = vweird.f32 %v3426_v4 }
0x1cea   :  { %v4097_v31 = vpop.eup %4096 }
0x1ceb   :  { %v3429_v32 = vmul.f32 %v4097_v31, %v3426_v4  ;;  %vm3435_vm10 = vweird.f32 %v4097_v31 }
0x1cec   :  { %vm3436_vm4 = vmor %vm3434_vm3, %vm3435_vm10 }
0x1ced   :  { %v3430_v60 = vmul.f32 %v4097_v31, %v3429_v32 }
0x1cef   :  { %v3431_v39 = vmul.f32 0.5, %v3430_v60 }
0x1cf1   :  { %v3432_v33 = vsub.f32 1.5, %v3431_v39 }
0x1cf3   :  { %v3433_v15 = vmul.f32 %v4097_v31, %v3432_v33 }
0x1cf5   :  { %v3437_v45 = vsel %vm3436_vm4, %v4097_v31, %v3433_v15 }
0x1cf6   :  { %v3448_v55 = vmul.f32 %v3437_v45, %v3424_v51 }
0x1cf7   :  { %3502 = vrot.lane.b32.xlu0 %v3759_v35, %s4122_s19 }
0x1cf8   :  { %v3453_v8 = vmul.f32 %v3451_v30, %v3448_v55 }
0x1cf9   :  { %3456 = vrot.lane.b32.xlu2 %v4848_v56, %s4114_s7 }
0x1cff   :  { %3496 = vrot.lane.b32.xlu0 %v3747_v37, %s4122_s19 }
0x1d01   :  { %3498 = vrot.lane.b32.xlu2 %v3751_v40, %s4122_s19 }
0x1d54   :  { %v3407_v49 = vpop.xlane.xlu2 %3406 }
0x1d55   :  { %v3409_v53 = vmul.f32 %v3407_v49, %v4344_v22 }
0x1d56   :  { %v3417_v61 = vpop.xlane.xlu0 %3416 }
0x1d57   :  { %v3421_v58 = vmul.f32 %v3409_v53, %v3409_v53  ;;  %v3419_v19 = vmul.f32 %v3417_v61, %v4344_v22  ;;  %v3425_v52 = vsub.f32 %v5081_v29, %v3409_v53 }
0x1d59   :  { %v3423_v43 = vsub.f32 %v3419_v19, %v3421_v58 }
0x1d5b   :  { %v3427_v59 = vadd.f32 1e-05, %v3423_v43 }
0x1d5c   :  { %v3457_v10 = vpop.permute.xlu2 %3456 }
0x1d5d   :  { %4098 = vrsqrt.f32 %v3427_v59  ;;  %v3459_v0 = vadd.f32 %v3457_v10, %v3453_v8  ;;  %vm3444_vm6 = vweird.f32 %v3427_v59  ;;  %v3839_v8 = vld [vmem:[%s5163_s2 + $0x8] sm:$0xf] }
0x1d5f   :  { %3831 = vmatmul.msk.f32.vlgmr.msrb.gmra.mxu3 %vm50_vm0, %v3459_v0 }
0x1d63   :  { %v4099_v13 = vpop.eup %4098 }
0x1d64   :  { %v3439_v11 = vmul.f32 %v4099_v13, %v3427_v59  ;;  %vm3445_vm5 = vweird.f32 %v4099_v13  ;;  %v3499_v1 = vpop.permute.xlu2 %3498 }
0x1d65   :  { %vm3446_vm7 = vmor %vm3444_vm6, %vm3445_vm5 }
0x1d66   :  { %v3440_v16 = vmul.f32 %v4099_v13, %v3439_v11 }
0x1d68   :  { %v3441_v47 = vmul.f32 0.5, %v3440_v16 }
0x1d69   :  { %v3503_v3 = vpop.permute.xlu0 %3502 }
0x1d6a   :  { %v3442_v9 = vsub.f32 1.5, %v3441_v47  ;;  %3833 = vmatpush.xpose.msk.msra.mxu0 %vm1734_vm9, %v3503_v3 }
0x1d6c   :  { %v3443_v20 = vmul.f32 %v4099_v13, %v3442_v9 }
0x1d6e   :  { %v3447_v24 = vsel %vm3446_vm7, %v4099_v13, %v3443_v20  ;;  %3834 = vmatpush.xpose.msk.msra.mxu0 %vm1734_vm9, %v3501_v5 }
0x1d6f   :  { %v3449_v36 = vmul.f32 %v3447_v24, %v3425_v52 }
0x1d71   :  { %v3454_v41 = vmul.f32 %v3451_v30, %v3449_v36  ;;  %v3497_v63 = vpop.permute.xlu0 %3496 }
0x1d72   :  { %3835 = vmatpush.xpose.msk.msra.mxu0 %vm1734_vm9, %v3499_v1 }
0x1d73   :  { %v3460_v62 = vadd.f32 %v3457_v10, %v3454_v41  ;;  %v5139_v10 = vperm.slane %v3839_v8, 0 }
0x1d75   :  { %3832 = vmatmul.msk.f32.gmra.mxu3 %vm50_vm0, %v3460_v62 }
0x1d76   :  { %3836 = vmatpush.xpose.msk.msra.mxu0 %vm1734_vm9, %v3497_v63 }
0x1de2   :  { %v3484_v2 = vpop.f32.mrf.mxu3 }
0x1de3   :  { %v3485_v25 = vadd.f32 %v3484_v2, %v4807_v21 }
0x1de5   :  { %v3490_v18 = vmax.f32 %v3485_v25, 0.0 }
0x1de7   :  { %3837 = vmatmul.msk.f32.vlgmr.msra.gmra.mxu0 %vm1734_vm9, %v3490_v18 }
0x1df8   :  { %v3487_v23 = vpop.f32.mrf.mxu3 }
0x1df9   :  { %v3488_v26 = vadd.f32 %v3487_v23, %v4807_v21 }
0x1dfb   :  { %v3491_v34 = vmax.f32 %v3488_v26, 0.0 }
0x1dfd   :  { %3838 = vmatmul.msk.f32.gmra.mxu0 %vm1734_vm9, %v3491_v34 }
0x1e64   :  { %v3535_v14 = vpop.f32.mrf.mxu0 }
0x1e65   :  { %v3536_v28 = vadd.f32 %v3535_v14, %v4800_v12 }
0x1e67   :  { %v3541_v42 = vadd.f32 %v3536_v28, %v3459_v0 }
0x1e69   :  { %v3543_v27 = vsel %vm50_vm0, %v3541_v42, 0.0  ;;  %v3551_v29 = vmul.f32 %v3541_v42, %v3541_v42 }
0x1e6a   :  { %3544 = vadd.xlane.f32.xlu1 %v3543_v27 }
0x1e6b   :  { %v3553_v44 = vsel %vm50_vm0, %v3551_v29, 0.0 }
0x1e6c   :  { %3554 = vadd.xlane.f32.xlu0 %v3553_v44 }
0x1e7a   :  { %v3538_v38 = vpop.f32.mrf.mxu0 }
0x1e7b   :  { %v3539_v17 = vadd.f32 %v3538_v38, %v4800_v12 }
0x1e7d   :  { %v3542_v48 = vadd.f32 %v3539_v17, %v3460_v62 }
0x1e7f   :  { %v3546_v21 = vsel %vm50_vm0, %v3542_v48, 0.0  ;;  %v3552_v54 = vmul.f32 %v3542_v48, %v3542_v48 }
0x1e80   :  { %3547 = vadd.xlane.f32.xlu2 %v3546_v21  ;;  %3596 = vrot.lane.b32.xlu0 %v4848_v56, %s4122_s19 }
0x1e81   :  { %v3556_v6 = vsel %vm50_vm0, %v3552_v54, 0.0 }
0x1e82   :  { %3557 = vadd.xlane.f32.xlu1 %v3556_v6 }
0x1e98   :  { %3591 = vrot.lane.b32.xlu2 %v4800_v12, %s4121_s18 }
0x1ea0   :  { %3655 = vrot.lane.b32.xlu2 %v5139_v10, %s4114_s7 }
0x1edd   :  { %v3545_v50 = vpop.xlane.xlu1 %3544 }
0x1ede   :  { %v3549_v46 = vmul.f32 %v3545_v50, %v4344_v22 }
0x1edf   :  { %v3555_v57 = vpop.xlane.xlu0 %3554 }
0x1ee0   :  { %v3561_v4 = vmul.f32 %v3549_v46, %v3549_v46  ;;  %v3559_v35 = vmul.f32 %v3555_v57, %v4344_v22  ;;  %v3565_v53 = vsub.f32 %v3541_v42, %v3549_v46 }
0x1ee2   :  { %v3563_v7 = vsub.f32 %v3559_v35, %v3561_v4 }
0x1ee4   :  { %v3567_v40 = vadd.f32 1e-05, %v3563_v7 }
0x1ee6   :  { %4100 = vrsqrt.f32 %v3567_v40  ;;  %vm3575_vm1 = vweird.f32 %v3567_v40 }
0x1eec   :  { %v4101_v31 = vpop.eup %4100 }
0x1eed   :  { %v3570_v37 = vmul.f32 %v4101_v31, %v3567_v40  ;;  %vm3576_vm9 = vweird.f32 %v4101_v31 }
0x1eee   :  { %vm3577_vm8 = vmor %vm3575_vm1, %vm3576_vm9 }
0x1eef   :  { %v3571_v32 = vmul.f32 %v4101_v31, %v3570_v37 }
0x1ef1   :  { %v3572_v56 = vmul.f32 0.5, %v3571_v32 }
0x1ef2   :  { %v3597_v30 = vpop.permute.xlu0 %3596 }
0x1ef3   :  { %v3573_v60 = vsub.f32 1.5, %v3572_v56  ;;  %v3548_v39 = vpop.xlane.xlu2 %3547 }
0x1ef4   :  { %v3550_v33 = vmul.f32 %v3548_v39, %v4344_v22 }
0x1ef5   :  { %v3558_v12 = vpop.xlane.xlu1 %3557  ;;  %v3574_v15 = vmul.f32 %v4101_v31, %v3573_v60 }
0x1ef6   :  { %v3562_v45 = vmul.f32 %v3550_v33, %v3550_v33  ;;  %v3560_v49 = vmul.f32 %v3558_v12, %v4344_v22  ;;  %v3566_v36 = vsub.f32 %v3542_v48, %v3550_v33 }
0x1ef7   :  { %v3578_v51 = vsel %vm3577_vm8, %v4101_v31, %v3574_v15 }
0x1ef8   :  { %v3564_v61 = vsub.f32 %v3560_v49, %v3562_v45  ;;  %v3589_v58 = vmul.f32 %v3578_v51, %v3565_v53 }
0x1efa   :  { %v3568_v55 = vadd.f32 1e-05, %v3564_v61 }
0x1efb   :  { %v3592_v19 = vpop.permute.xlu2 %3591 }
0x1efc   :  { %4102 = vrsqrt.f32 %v3568_v55  ;;  %v3594_v43 = vmul.f32 %v3592_v19, %v3589_v58  ;;  %vm3585_vm12 = vweird.f32 %v3568_v55 }
0x1efe   :  { %v3599_v59 = vadd.f32 %v3597_v30, %v3594_v43 }
0x1f00   :  { %v3603_v0 = vsel %vm50_vm0, %v3599_v59, 0.0  ;;  %v3611_v13 = vmul.f32 %v3599_v59, %v3599_v59 }
0x1f01   :  { %3604 = vadd.xlane.f32.xlu1 %v3603_v0 }
0x1f02   :  { %v4103_v11 = vpop.eup %4102  ;;  %v3613_v16 = vsel %vm50_vm0, %v3611_v13, 0.0 }
0x1f03   :  { %v3580_v47 = vmul.f32 %v4103_v11, %v3568_v55  ;;  %3614 = vadd.xlane.f32.xlu0 %v3613_v16  ;;  %vm3586_vm11 = vweird.f32 %v4103_v11  ;;  %v3656_v57 = vpop.permute.xlu2 %3655 }
0x1f04   :  { %vm3587_vm13 = vmor %vm3585_vm12, %vm3586_vm11 }
0x1f05   :  { %v3581_v9 = vmul.f32 %v4103_v11, %v3580_v47 }
0x1f07   :  { %v3582_v20 = vmul.f32 0.5, %v3581_v9 }
0x1f09   :  { %v3583_v52 = vsub.f32 1.5, %v3582_v20 }
0x1f0b   :  { %v3584_v24 = vmul.f32 %v4103_v11, %v3583_v52 }
0x1f0d   :  { %v3588_v41 = vsel %vm3587_vm13, %v4103_v11, %v3584_v24 }
0x1f0e   :  { %v3590_v62 = vmul.f32 %v3588_v41, %v3566_v36 }
0x1f10   :  { %v3595_v3 = vmul.f32 %v3592_v19, %v3590_v62 }
0x1f12   :  { %v3600_v5 = vadd.f32 %v3597_v30, %v3595_v3 }
0x1f14   :  { %v3606_v1 = vsel %vm50_vm0, %v3600_v5, 0.0  ;;  %v3612_v63 = vmul.f32 %v3600_v5, %v3600_v5 }
0x1f15   :  { %3607 = vadd.xlane.f32.xlu1 %v3606_v1 }
0x1f16   :  { %v3616_v2 = vsel %vm50_vm0, %v3612_v63, 0.0 }
0x1f1d   :  { %3617 = vadd.xlane.f32.xlu1 %v3616_v2 }
0x1f74   :  { %v3605_v25 = vpop.xlane.xlu1 %3604 }
0x1f75   :  { %v3609_v18 = vmul.f32 %v3605_v25, %v4344_v22 }
0x1f76   :  { %v3615_v23 = vpop.xlane.xlu0 %3614 }
0x1f77   :  { %v3621_v26 = vmul.f32 %v3609_v18, %v3609_v18  ;;  %v3619_v34 = vmul.f32 %v3615_v23, %v4344_v22  ;;  %v3625_v21 = vsub.f32 %v3599_v59, %v3609_v18 }
0x1f79   :  { %v3623_v14 = vsub.f32 %v3619_v34, %v3621_v26 }
0x1f7b   :  { %v3627_v28 = vadd.f32 1e-05, %v3623_v14 }
0x1f7d   :  { %4104 = vrsqrt.f32 %v3627_v28  ;;  %vm3635_vm15 = vweird.f32 %v3627_v28 }
0x1f83   :  { %v4105_v42 = vpop.eup %4104 }
0x1f84   :  { %v3630_v27 = vmul.f32 %v4105_v42, %v3627_v28  ;;  %vm3636_vm14 = vweird.f32 %v4105_v42 }
0x1f85   :  { %vm3637_vm2 = vmor %vm3635_vm15, %vm3636_vm14 }
0x1f86   :  { %v3631_v29 = vmul.f32 %v4105_v42, %v3630_v27 }
0x1f88   :  { %v3632_v44 = vmul.f32 0.5, %v3631_v29  ;;  %v3608_v38 = vpop.xlane.xlu1 %3607 }
0x1f89   :  { %v3610_v54 = vmul.f32 %v3608_v38, %v4344_v22 }
0x1f8a   :  { %v3633_v17 = vsub.f32 1.5, %v3632_v44 }
0x1f8b   :  { %v3622_v4 = vmul.f32 %v3610_v54, %v3610_v54 }
0x1f8c   :  { %v3634_v48 = vmul.f32 %v4105_v42, %v3633_v17 }
0x1f8e   :  { %v3638_v6 = vsel %vm3637_vm2, %v4105_v42, %v3634_v48 }
0x1f8f   :  { %v3649_v50 = vmul.f32 %v3638_v6, %v3625_v21 }
0x1f90   :  { %v3618_v46 = vpop.xlane.xlu1 %3617 }
0x1f91   :  { %v3620_v35 = vmul.f32 %v3618_v46, %v4344_v22  ;;  %v3652_v7 = vmul.f32 %v5139_v10, %v3649_v50  ;;  %v3626_v22 = vsub.f32 %v3600_v5, %v3610_v54 }
0x1f93   :  { %v3624_v40 = vsub.f32 %v3620_v35, %v3622_v4  ;;  %v3658_v31 = vadd.f32 %v3656_v57, %v3652_v7 }
0x1f95   :  { %v3628_v37 = vadd.f32 1e-05, %v3624_v40  ;;  %3660 = vst.msk [vmem:[%s5164_s3] sm:$0xff] %vm50_vm0, %v3658_v31 }
0x1f97   :  { %4106 = vrsqrt.f32 %v3628_v37  ;;  %vm3645_vm3 = vweird.f32 %v3628_v37 }
0x1f9d   :  { %v4107_v32 = vpop.eup %4106 }
0x1f9e   :  { %v3640_v56 = vmul.f32 %v4107_v32, %v3628_v37  ;;  %vm3646_vm10 = vweird.f32 %v4107_v32 }
0x1f9f   :  { %vm3647_vm4 = vmor %vm3645_vm3, %vm3646_vm10 }
0x1fa0   :  { %v3641_v60 = vmul.f32 %v4107_v32, %v3640_v56 }
0x1fa2   :  { %v3642_v39 = vmul.f32 0.5, %v3641_v60 }
0x1fa4   :  { %v3643_v33 = vsub.f32 1.5, %v3642_v39 }
0x1fa6   :  { %v3644_v12 = vmul.f32 %v4107_v32, %v3643_v33 }
0x1fa8   :  { %v3648_v15 = vsel %vm3647_vm4, %v4107_v32, %v3644_v12 }
0x1fa9   :  { %v3650_v45 = vmul.f32 %v3648_v15, %v3626_v22 }
0x1fab   :  { %v3653_v49 = vmul.f32 %v5139_v10, %v3650_v45 }
0x1fad   :  { %v3659_v51 = vadd.f32 %v3656_v57, %v3653_v49 }
0x1faf   :  { %3661 = vst.msk [vmem:[%s5164_s3 + $0x8] sm:$0xff] %vm50_vm0, %v3659_v51 }

</bundles_post_ra>
